<compile_context>
chip_gen: v6e
topology: v6e:2x2x1
jax: 0.10.0
libtpu: 0.0.40
codegen_flags: <defaults>
</compile_context>

<pallas_src>
import functools

import jax
import jax.numpy as jnp
from jax.experimental import pallas as pl
from jax.experimental.pallas import tpu as pltpu

BN_EPS = 1e-5

_VMEM = pl.BlockSpec(memory_space=pltpu.MemorySpace.VMEM)
_SMEM = pl.BlockSpec(memory_space=pltpu.MemorySpace.SMEM)


# ----------------------------- in-kernel helpers ---------------------------- #

def _mlp_block(x_f32, w1, b1, g, be, w2, b2):
    """Linear -> BatchNorm1d(train batch stats over this view) -> ReLU -> Linear.

    Weights w1/w2 arrive pre-cast to bf16 (MXU inputs); BN math stays f32.
    """
    h = jnp.dot(x_f32.astype(jnp.bfloat16), w1,
                preferred_element_type=jnp.float32) + b1
    mean = jnp.mean(h, axis=0, keepdims=True)
    c = h - mean
    var = jnp.mean(c * c, axis=0, keepdims=True)        # centered variance (no cancellation)
    hn = jnp.maximum(c * jax.lax.rsqrt(var + BN_EPS) * g + be, 0.0)
    return jnp.dot(hn.astype(jnp.bfloat16), w2,
                   preferred_element_type=jnp.float32) + b2


# ----------------------------- Pallas kernels ------------------------------ #

def _fused_fwd_kernel(x_ref,
                      # online encoder (backbone Linear + projector MLP)
                      wb_ref, bb_ref, w1_ref, b1_ref, g1_ref, be1_ref, w2_ref, b2_ref,
                      # online predictor MLP
                      wp1_ref, bp1_ref, gp1_ref, bep1_ref, wp2_ref, bp2_ref,
                      # target encoder (already momentum-updated)
                      twb_ref, tbb_ref, tw1_ref, tb1_ref, tg1_ref, tbe1_ref, tw2_ref, tb2_ref,
                      # outputs
                      p_ref, z_ref):
    """One grid step = one augmented view (B rows). BN stats are block-local (per view)."""
    x = x_ref[...]                                       # bf16 (B, in_feat)

    # ---- online branch: backbone Linear -> projector MLP -> predictor MLP ----
    feat = jnp.dot(x, wb_ref[...], preferred_element_type=jnp.float32) + bb_ref[...]
    zq = _mlp_block(feat, w1_ref[...], b1_ref[...], g1_ref[...], be1_ref[...],
                    w2_ref[...], b2_ref[...])
    p_ref[...] = _mlp_block(zq, wp1_ref[...], bp1_ref[...], gp1_ref[...], bep1_ref[...],
                            wp2_ref[...], bp2_ref[...])

    # ---- target branch: backbone Linear -> projector MLP (no_grad semantics) ----
    tfeat = jnp.dot(x, twb_ref[...], preferred_element_type=jnp.float32) + tbb_ref[...]
    z_ref[...] = _mlp_block(tfeat, tw1_ref[...], tb1_ref[...], tg1_ref[...], tbe1_ref[...],
                            tw2_ref[...], tb2_ref[...])


def _momentum_kernel(n, mm_ref, *refs):
    """Per-leaf AXPY: k <- mm*k + (1-mm)*q for n leaves. refs = q[0..n), k[0..n), out[0..n)."""
    mm = mm_ref[0]
    q_refs = refs[:n]
    k_refs = refs[n:2 * n]
    o_refs = refs[2 * n:]
    for q, k, o in zip(q_refs, k_refs, o_refs):
        o[...] = mm * k[...] + (1.0 - mm) * q[...]


# ----------------------------- wrappers ------------------------------------ #

def _row(v):
    return v.reshape(1, -1)


def _bf16(w):
    return w.astype(jnp.bfloat16)


def _const_spec(arr):
    """Whole-array block with a constant index map (weights shared across the view grid)."""
    return pl.BlockSpec(arr.shape, lambda v: (0, 0))


def pallas_fused_forward(x_views, online, predictor, target):
    """x_views: (n_views, B, in_feat) bf16. Returns (p, z) each (n_views, B, proj_out) f32."""
    n_views, b, din = x_views.shape
    proj_out = online["w2"].shape[1]

    args = [
        x_views,
        _bf16(online["wb"]), _row(online["bb"]),
        _bf16(online["w1"]), _row(online["b1"]), _row(online["g1"]), _row(online["be1"]),
        _bf16(online["w2"]), _row(online["b2"]),
        _bf16(predictor["w1"]), _row(predictor["b1"]),
        _row(predictor["g1"]), _row(predictor["be1"]),
        _bf16(predictor["w2"]), _row(predictor["b2"]),
        _bf16(target["wb"]), _row(target["bb"]),
        _bf16(target["w1"]), _row(target["b1"]), _row(target["g1"]), _row(target["be1"]),
        _bf16(target["w2"]), _row(target["b2"]),
    ]

    in_specs = ([pl.BlockSpec((None, b, din), lambda v: (v, 0, 0))]
                + [_const_spec(a) for a in args[1:]])
    out_specs = (
        pl.BlockSpec((None, b, proj_out), lambda v: (v, 0, 0)),
        pl.BlockSpec((None, b, proj_out), lambda v: (v, 0, 0)),
    )
    out_shape = (
        jax.ShapeDtypeStruct((n_views, b, proj_out), jnp.float32),
        jax.ShapeDtypeStruct((n_views, b, proj_out), jnp.float32),
    )
    return pl.pallas_call(
        _fused_fwd_kernel,
        grid=(n_views,),
        out_shape=out_shape,
        in_specs=in_specs,
        out_specs=out_specs,
        compiler_params=pltpu.CompilerParams(dimension_semantics=("parallel",)),
    )(*args)


def pallas_momentum_update(mm, online_tree, target_tree):
    """Single fused per-leaf AXPY over all encoder params: k <- mm*k + (1-mm)*q (f32 masters)."""
    leaves_q, treedef = jax.tree.flatten(online_tree)
    leaves_k = jax.tree.leaves(target_tree)
    shapes = [l.shape for l in leaves_q]

    # 1-D leaves are presented lane-dense as (1, N) rows; 2-D leaves pass through unchanged.
    q2 = [l.reshape(1, -1) if l.ndim == 1 else l for l in leaves_q]
    k2 = [l.reshape(1, -1) if l.ndim == 1 else l for l in leaves_k]
    n = len(q2)
    mm_arr = jnp.asarray(mm, dtype=jnp.float32).reshape((1,))

    out_shape = tuple(jax.ShapeDtypeStruct(a.shape, a.dtype) for a in k2)
    outs = pl.pallas_call(
        functools.partial(_momentum_kernel, n),
        out_shape=out_shape,
        in_specs=[_SMEM] + [_VMEM] * (2 * n),
        out_specs=tuple([_VMEM] * n),
        # alias each k leaf to its output (in-place when the target tree is donated)
        input_output_aliases={1 + n + i: i for i in range(n)},
    )(mm_arr, *q2, *k2)

    new_leaves = [o.reshape(s) for o, s in zip(outs, shapes)]
    return jax.tree.unflatten(treedef, new_leaves)


# ----------------------------- parameter init ------------------------------ #

def _init_linear(key, din, dout):
    kw, kb = jax.random.split(key)
    bound = 1.0 / jnp.sqrt(float(din))
    w = jax.random.uniform(kw, (din, dout), jnp.float32, -bound, bound)
    b = jax.random.uniform(kb, (dout,), jnp.float32, -bound, bound)
    return w, b


def init_simsiam_params(key, in_feat, backbone_out, proj_hidden, proj_out, pred_hidden):
    k = jax.random.split(key, 6)
    wb, bb = _init_linear(k[0], in_feat, backbone_out)        # backbone stand-in
    w1, b1 = _init_linear(k[1], backbone_out, proj_hidden)    # projector layer1
    w2, b2 = _init_linear(k[2], proj_hidden, proj_out)        # projector layer2
    encoder = {
        "wb": wb, "bb": bb,
        "w1": w1, "b1": b1,
        "g1": jnp.ones((proj_hidden,), jnp.float32),
        "be1": jnp.zeros((proj_hidden,), jnp.float32),
        "w2": w2, "b2": b2,
    }
    wp1, bp1 = _init_linear(k[3], proj_out, pred_hidden)      # predictor layer1
    wp2, bp2 = _init_linear(k[4], pred_hidden, proj_out)      # predictor layer2
    predictor = {
        "w1": wp1, "b1": bp1,
        "g1": jnp.ones((pred_hidden,), jnp.float32),
        "be1": jnp.zeros((pred_hidden,), jnp.float32),
        "w2": wp2, "b2": bp2,
    }
    target = jax.tree.map(lambda a: a.copy(), encoder)        # deepcopy(online_encoder)
    return {"online": encoder, "target": target, "predictor": predictor}


# ----------------------------- forward ------------------------------------- #

@jax.jit
def simsiam_forward(params, im_aug1, im_aug2, mm):
    online, target, predictor = params["online"], params["target"], params["predictor"]
    b = im_aug1.shape[0]

    # Both views stacked on a leading axis, written bf16 (halves x HBM traffic into the kernel).
    x = jnp.stack([im_aug1.reshape(b, -1),
                   im_aug2.reshape(b, -1)]).astype(jnp.bfloat16)

    # Momentum update first (as in PyTorch it runs before the target forward; the online
    # params are untouched by it, so fusing both branches afterwards is semantics-preserving).
    new_target = pallas_momentum_update(mm, online, target)

    # One fused kernel: online encoder+predictor and target encoder, per-view parallel grid.
    p, z = pallas_fused_forward(x, online, predictor, new_target)
    z = jax.lax.stop_gradient(z)                              # torch.no_grad semantics

    out = {"z1": z[0], "z2": z[1], "p1": p[0], "p2": p[1]}
    new_params = {"online": online, "target": new_target, "predictor": predictor}
    return out, new_params


# ----------------------------- pure-JAX reference --------------------------- #

def _ref_forward(params, im1, im2, mm):
    online, target, pred = params["online"], params["target"], params["predictor"]

    def bn_relu(h, g, be):
        mean = jnp.mean(h, axis=0, keepdims=True)
        c = h - mean
        var = jnp.mean(c * c, axis=0, keepdims=True)
        return jnp.maximum(c * jax.lax.rsqrt(var + BN_EPS) * g + be, 0.0)

    def mlp(x, p):
        h = jnp.dot(x.astype(jnp.bfloat16), p["w1"].astype(jnp.bfloat16),
                    preferred_element_type=jnp.float32) + p["b1"]
        hn = bn_relu(h, p["g1"], p["be1"])
        return jnp.dot(hn.astype(jnp.bfloat16), p["w2"].astype(jnp.bfloat16),
                       preferred_element_type=jnp.float32) + p["b2"]

    def encode(enc, im):
        x = im.reshape(im.shape[0], -1)
        feat = jnp.dot(x.astype(jnp.bfloat16), enc["wb"].astype(jnp.bfloat16),
                       preferred_element_type=jnp.float32) + enc["bb"]
        return mlp(feat, enc)

    p1 = mlp(encode(online, im1), pred)
    p2 = mlp(encode(online, im2), pred)
    new_target = jax.tree.map(lambda q, k: mm * k + (1.0 - mm) * q, online, target)
    z1 = encode(new_target, im1)
    z2 = encode(new_target, im2)
    return {"z1": z1, "z2": z2, "p1": p1, "p2": p2}, new_target


# ----------------------------- main ----------------------------------------- #

if __name__ == "__main__":
    # small shapes; all feature dims are multiples of 128 (lane-dense), B multiple of 8
    B, C, H, W = 8, 4, 16, 16           # NCHW images -> in_feat = 1024
    BACKBONE_OUT = 128                  # scaled-down stand-in for resnet out_dim (e.g. 2048)
    PROJ_HIDDEN, PROJ_OUT = 256, 128    # scaled-down 4096 / 256
    PRED_HIDDEN = 256                   # scaled-down 4096

    key = jax.random.PRNGKey(0)
    kp, k1, k2 = jax.random.split(key, 3)

    params = init_simsiam_params(kp, C * H * W, BACKBONE_OUT,
                                 PROJ_HIDDEN, PROJ_OUT, PRED_HIDDEN)

    im_aug1 = jax.random.normal(k1, (B, C, H, W), jnp.float32)
    im_aug2 = jax.random.normal(k2, (B, C, H, W), jnp.float32)
    mm = jnp.float32(0.99)

    out, new_params = simsiam_forward(params, im_aug1, im_aug2, mm)
    jax.block_until_ready(out)
    jax.block_until_ready(new_params)

    # correctness vs pure-JAX reference (same bf16/f32 math)
    ref_out, ref_target = _ref_forward(params, im_aug1, im_aug2, mm)
    for name in ("p1", "p2", "z1", "z2"):
        assert out[name].shape == (B, PROJ_OUT)
        assert bool(jnp.allclose(out[name], ref_out[name], atol=2e-2, rtol=2e-2)), name
    for a, r in zip(jax.tree.leaves(new_params["target"]), jax.tree.leaves(ref_target)):
        assert bool(jnp.allclose(a, r, atol=1e-5, rtol=1e-5))

    print("KERNEL_OK")
</pallas_src>

<mosaic_0001>
module attributes {stable_mosaic.version = 11 : i64} {
  func.func @_momentum_kernel(%arg0: memref<1xf32, #tpu.memory_space<smem>>, %arg1: memref<1x256xf32, #tpu.memory_space<vmem>>, %arg2: memref<1x128xf32, #tpu.memory_space<vmem>>, %arg3: memref<1x128xf32, #tpu.memory_space<vmem>>, %arg4: memref<1x256xf32, #tpu.memory_space<vmem>>, %arg5: memref<1x256xf32, #tpu.memory_space<vmem>>, %arg6: memref<128x256xf32, #tpu.memory_space<vmem>>, %arg7: memref<256x128xf32, #tpu.memory_space<vmem>>, %arg8: memref<1024x128xf32, #tpu.memory_space<vmem>>, %arg9: memref<1x256xf32, #tpu.memory_space<vmem>>, %arg10: memref<1x128xf32, #tpu.memory_space<vmem>>, %arg11: memref<1x128xf32, #tpu.memory_space<vmem>>, %arg12: memref<1x256xf32, #tpu.memory_space<vmem>>, %arg13: memref<1x256xf32, #tpu.memory_space<vmem>>, %arg14: memref<128x256xf32, #tpu.memory_space<vmem>>, %arg15: memref<256x128xf32, #tpu.memory_space<vmem>>, %arg16: memref<1024x128xf32, #tpu.memory_space<vmem>>, %arg17: memref<1x256xf32, #tpu.memory_space<vmem>>, %arg18: memref<1x128xf32, #tpu.memory_space<vmem>>, %arg19: memref<1x128xf32, #tpu.memory_space<vmem>>, %arg20: memref<1x256xf32, #tpu.memory_space<vmem>>, %arg21: memref<1x256xf32, #tpu.memory_space<vmem>>, %arg22: memref<128x256xf32, #tpu.memory_space<vmem>>, %arg23: memref<256x128xf32, #tpu.memory_space<vmem>>, %arg24: memref<1024x128xf32, #tpu.memory_space<vmem>>) attributes {dimension_semantics = [], scalar_prefetch = 0 : i64, scratch_operands = 0 : i64, tpu.core_type = #tpu.core_type<tc>} {
    %c0 = arith.constant 0 : index
    %0 = memref.load %arg0[%c0] : memref<1xf32, #tpu.memory_space<smem>>
    %c0_0 = arith.constant 0 : index
    %c0_1 = arith.constant 0 : index
    %1 = vector.load %arg9[%c0_0, %c0_1] : memref<1x256xf32, #tpu.memory_space<vmem>>, vector<1x256xf32>
    %2 = vector.broadcast %0 : f32 to vector<1x256xf32>
    %3 = arith.mulf %2, %1 : vector<1x256xf32>
    %cst = arith.constant 1.000000e+00 : f32
    %4 = arith.subf %cst, %0 : f32
    %c0_2 = arith.constant 0 : index
    %c0_3 = arith.constant 0 : index
    %5 = vector.load %arg1[%c0_2, %c0_3] : memref<1x256xf32, #tpu.memory_space<vmem>>, vector<1x256xf32>
    %6 = vector.broadcast %4 : f32 to vector<1x256xf32>
    %7 = arith.mulf %6, %5 : vector<1x256xf32>
    %8 = arith.addf %3, %7 : vector<1x256xf32>
    %c0_4 = arith.constant 0 : index
    %c0_5 = arith.constant 0 : index
    %9 = vector.load %arg17[%c0_4, %c0_5] : memref<1x256xf32, #tpu.memory_space<vmem>>, vector<1x256xf32>
    tpu.vector_store %arg17[%c0_4, %c0_5], %8 {strides = array<i32>} : memref<1x256xf32, #tpu.memory_space<vmem>>, vector<1x256xf32>,
    %c0_6 = arith.constant 0 : index
    %c0_7 = arith.constant 0 : index
    %10 = vector.load %arg10[%c0_6, %c0_7] : memref<1x128xf32, #tpu.memory_space<vmem>>, vector<1x128xf32>
    %11 = vector.broadcast %0 : f32 to vector<1x128xf32>
    %12 = arith.mulf %11, %10 : vector<1x128xf32>
    %cst_8 = arith.constant 1.000000e+00 : f32
    %13 = arith.subf %cst_8, %0 : f32
    %c0_9 = arith.constant 0 : index
    %c0_10 = arith.constant 0 : index
    %14 = vector.load %arg2[%c0_9, %c0_10] : memref<1x128xf32, #tpu.memory_space<vmem>>, vector<1x128xf32>
    %15 = vector.broadcast %13 : f32 to vector<1x128xf32>
    %16 = arith.mulf %15, %14 : vector<1x128xf32>
    %17 = arith.addf %12, %16 : vector<1x128xf32>
    %c0_11 = arith.constant 0 : index
    %c0_12 = arith.constant 0 : index
    %18 = vector.load %arg18[%c0_11, %c0_12] : memref<1x128xf32, #tpu.memory_space<vmem>>, vector<1x128xf32>
    tpu.vector_store %arg18[%c0_11, %c0_12], %17 {strides = array<i32>} : memref<1x128xf32, #tpu.memory_space<vmem>>, vector<1x128xf32>,
    %c0_13 = arith.constant 0 : index
    %c0_14 = arith.constant 0 : index
    %19 = vector.load %arg11[%c0_13, %c0_14] : memref<1x128xf32, #tpu.memory_space<vmem>>, vector<1x128xf32>
    %20 = vector.broadcast %0 : f32 to vector<1x128xf32>
    %21 = arith.mulf %20, %19 : vector<1x128xf32>
    %cst_15 = arith.constant 1.000000e+00 : f32
    %22 = arith.subf %cst_15, %0 : f32
    %c0_16 = arith.constant 0 : index
    %c0_17 = arith.constant 0 : index
    %23 = vector.load %arg3[%c0_16, %c0_17] : memref<1x128xf32, #tpu.memory_space<vmem>>, vector<1x128xf32>
    %24 = vector.broadcast %22 : f32 to vector<1x128xf32>
    %25 = arith.mulf %24, %23 : vector<1x128xf32>
    %26 = arith.addf %21, %25 : vector<1x128xf32>
    %c0_18 = arith.constant 0 : index
    %c0_19 = arith.constant 0 : index
    %27 = vector.load %arg19[%c0_18, %c0_19] : memref<1x128xf32, #tpu.memory_space<vmem>>, vector<1x128xf32>
    tpu.vector_store %arg19[%c0_18, %c0_19], %26 {strides = array<i32>} : memref<1x128xf32, #tpu.memory_space<vmem>>, vector<1x128xf32>,
    %c0_20 = arith.constant 0 : index
    %c0_21 = arith.constant 0 : index
    %28 = vector.load %arg12[%c0_20, %c0_21] : memref<1x256xf32, #tpu.memory_space<vmem>>, vector<1x256xf32>
    %29 = vector.broadcast %0 : f32 to vector<1x256xf32>
    %30 = arith.mulf %29, %28 : vector<1x256xf32>
    %cst_22 = arith.constant 1.000000e+00 : f32
    %31 = arith.subf %cst_22, %0 : f32
    %c0_23 = arith.constant 0 : index
    %c0_24 = arith.constant 0 : index
    %32 = vector.load %arg4[%c0_23, %c0_24] : memref<1x256xf32, #tpu.memory_space<vmem>>, vector<1x256xf32>
    %33 = vector.broadcast %31 : f32 to vector<1x256xf32>
    %34 = arith.mulf %33, %32 : vector<1x256xf32>
    %35 = arith.addf %30, %34 : vector<1x256xf32>
    %c0_25 = arith.constant 0 : index
    %c0_26 = arith.constant 0 : index
    %36 = vector.load %arg20[%c0_25, %c0_26] : memref<1x256xf32, #tpu.memory_space<vmem>>, vector<1x256xf32>
    tpu.vector_store %arg20[%c0_25, %c0_26], %35 {strides = array<i32>} : memref<1x256xf32, #tpu.memory_space<vmem>>, vector<1x256xf32>,
    %c0_27 = arith.constant 0 : index
    %c0_28 = arith.constant 0 : index
    %37 = vector.load %arg13[%c0_27, %c0_28] : memref<1x256xf32, #tpu.memory_space<vmem>>, vector<1x256xf32>
    %38 = vector.broadcast %0 : f32 to vector<1x256xf32>
    %39 = arith.mulf %38, %37 : vector<1x256xf32>
    %cst_29 = arith.constant 1.000000e+00 : f32
    %40 = arith.subf %cst_29, %0 : f32
    %c0_30 = arith.constant 0 : index
    %c0_31 = arith.constant 0 : index
    %41 = vector.load %arg5[%c0_30, %c0_31] : memref<1x256xf32, #tpu.memory_space<vmem>>, vector<1x256xf32>
    %42 = vector.broadcast %40 : f32 to vector<1x256xf32>
    %43 = arith.mulf %42, %41 : vector<1x256xf32>
    %44 = arith.addf %39, %43 : vector<1x256xf32>
    %c0_32 = arith.constant 0 : index
    %c0_33 = arith.constant 0 : index
    %45 = vector.load %arg21[%c0_32, %c0_33] : memref<1x256xf32, #tpu.memory_space<vmem>>, vector<1x256xf32>
    tpu.vector_store %arg21[%c0_32, %c0_33], %44 {strides = array<i32>} : memref<1x256xf32, #tpu.memory_space<vmem>>, vector<1x256xf32>,
    %c0_34 = arith.constant 0 : index
    %c0_35 = arith.constant 0 : index
    %46 = vector.load %arg14[%c0_34, %c0_35] : memref<128x256xf32, #tpu.memory_space<vmem>>, vector<128x256xf32>
    %47 = vector.broadcast %0 : f32 to vector<128x256xf32>
    %48 = arith.mulf %47, %46 : vector<128x256xf32>
    %cst_36 = arith.constant 1.000000e+00 : f32
    %49 = arith.subf %cst_36, %0 : f32
    %c0_37 = arith.constant 0 : index
    %c0_38 = arith.constant 0 : index
    %50 = vector.load %arg6[%c0_37, %c0_38] : memref<128x256xf32, #tpu.memory_space<vmem>>, vector<128x256xf32>
    %51 = vector.broadcast %49 : f32 to vector<128x256xf32>
    %52 = arith.mulf %51, %50 : vector<128x256xf32>
    %53 = arith.addf %48, %52 : vector<128x256xf32>
    %c0_39 = arith.constant 0 : index
    %c0_40 = arith.constant 0 : index
    %54 = vector.load %arg22[%c0_39, %c0_40] : memref<128x256xf32, #tpu.memory_space<vmem>>, vector<128x256xf32>
    tpu.vector_store %arg22[%c0_39, %c0_40], %53 {strides = array<i32>} : memref<128x256xf32, #tpu.memory_space<vmem>>, vector<128x256xf32>,
    %c0_41 = arith.constant 0 : index
    %c0_42 = arith.constant 0 : index
    %55 = vector.load %arg15[%c0_41, %c0_42] : memref<256x128xf32, #tpu.memory_space<vmem>>, vector<256x128xf32>
    %56 = vector.broadcast %0 : f32 to vector<256x128xf32>
    %57 = arith.mulf %56, %55 : vector<256x128xf32>
    %cst_43 = arith.constant 1.000000e+00 : f32
    %58 = arith.subf %cst_43, %0 : f32
    %c0_44 = arith.constant 0 : index
    %c0_45 = arith.constant 0 : index
    %59 = vector.load %arg7[%c0_44, %c0_45] : memref<256x128xf32, #tpu.memory_space<vmem>>, vector<256x128xf32>
    %60 = vector.broadcast %58 : f32 to vector<256x128xf32>
    %61 = arith.mulf %60, %59 : vector<256x128xf32>
    %62 = arith.addf %57, %61 : vector<256x128xf32>
    %c0_46 = arith.constant 0 : index
    %c0_47 = arith.constant 0 : index
    %63 = vector.load %arg23[%c0_46, %c0_47] : memref<256x128xf32, #tpu.memory_space<vmem>>, vector<256x128xf32>
    tpu.vector_store %arg23[%c0_46, %c0_47], %62 {strides = array<i32>} : memref<256x128xf32, #tpu.memory_space<vmem>>, vector<256x128xf32>,
    %c0_48 = arith.constant 0 : index
    %c0_49 = arith.constant 0 : index
    %64 = vector.load %arg16[%c0_48, %c0_49] : memref<1024x128xf32, #tpu.memory_space<vmem>>, vector<1024x128xf32>
    %65 = vector.broadcast %0 : f32 to vector<1024x128xf32>
    %66 = arith.mulf %65, %64 : vector<1024x128xf32>
    %cst_50 = arith.constant 1.000000e+00 : f32
    %67 = arith.subf %cst_50, %0 : f32
    %c0_51 = arith.constant 0 : index
    %c0_52 = arith.constant 0 : index
    %68 = vector.load %arg8[%c0_51, %c0_52] : memref<1024x128xf32, #tpu.memory_space<vmem>>, vector<1024x128xf32>
    %69 = vector.broadcast %67 : f32 to vector<1024x128xf32>
    %70 = arith.mulf %69, %68 : vector<1024x128xf32>
    %71 = arith.addf %66, %70 : vector<1024x128xf32>
    %c0_53 = arith.constant 0 : index
    %c0_54 = arith.constant 0 : index
    %72 = vector.load %arg24[%c0_53, %c0_54] : memref<1024x128xf32, #tpu.memory_space<vmem>>, vector<1024x128xf32>
    tpu.vector_store %arg24[%c0_53, %c0_54], %71 {strides = array<i32>} : memref<1024x128xf32, #tpu.memory_space<vmem>>, vector<1024x128xf32>,
    return
  }
}

module attributes {stable_mosaic.version = 11 : i64} {
  func.func @_fused_fwd_kernel(%arg0: i32, %arg1: memref<1x8x1024xbf16, #tpu.memory_space<vmem>>, %arg2: memref<1024x128xbf16, #tpu.memory_space<vmem>>, %arg3: memref<1x128xf32, #tpu.memory_space<vmem>>, %arg4: memref<128x256xbf16, #tpu.memory_space<vmem>>, %arg5: memref<1x256xf32, #tpu.memory_space<vmem>>, %arg6: memref<1x256xf32, #tpu.memory_space<vmem>>, %arg7: memref<1x256xf32, #tpu.memory_space<vmem>>, %arg8: memref<256x128xbf16, #tpu.memory_space<vmem>>, %arg9: memref<1x128xf32, #tpu.memory_space<vmem>>, %arg10: memref<128x256xbf16, #tpu.memory_space<vmem>>, %arg11: memref<1x256xf32, #tpu.memory_space<vmem>>, %arg12: memref<1x256xf32, #tpu.memory_space<vmem>>, %arg13: memref<1x256xf32, #tpu.memory_space<vmem>>, %arg14: memref<256x128xbf16, #tpu.memory_space<vmem>>, %arg15: memref<1x128xf32, #tpu.memory_space<vmem>>, %arg16: memref<1024x128xbf16, #tpu.memory_space<vmem>>, %arg17: memref<1x128xf32, #tpu.memory_space<vmem>>, %arg18: memref<128x256xbf16, #tpu.memory_space<vmem>>, %arg19: memref<1x256xf32, #tpu.memory_space<vmem>>, %arg20: memref<1x256xf32, #tpu.memory_space<vmem>>, %arg21: memref<1x256xf32, #tpu.memory_space<vmem>>, %arg22: memref<256x128xbf16, #tpu.memory_space<vmem>>, %arg23: memref<1x128xf32, #tpu.memory_space<vmem>>, %arg24: memref<1x8x128xf32, #tpu.memory_space<vmem>>, %arg25: memref<1x8x128xf32, #tpu.memory_space<vmem>>) attributes {dimension_semantics = [#tpu.dimension_semantics<parallel>], iteration_bounds = array<i64: 2>, scalar_prefetch = 0 : i64, scratch_operands = 0 : i64, tpu.core_type = #tpu.core_type<tc>, window_params = [{transform_indices = @transform_0, window_bounds = array<i64: 1, 8, 1024>}, {pipeline_mode = #tpu.pipeline_mode<synchronous>, transform_indices = @transform_1, window_bounds = array<i64: 1024, 128>}, {pipeline_mode = #tpu.pipeline_mode<synchronous>, transform_indices = @transform_2, window_bounds = array<i64: 1, 128>}, {pipeline_mode = #tpu.pipeline_mode<synchronous>, transform_indices = @transform_3, window_bounds = array<i64: 128, 256>}, {pipeline_mode = #tpu.pipeline_mode<synchronous>, transform_indices = @transform_4, window_bounds = array<i64: 1, 256>}, {pipeline_mode = #tpu.pipeline_mode<synchronous>, transform_indices = @transform_5, window_bounds = array<i64: 1, 256>}, {pipeline_mode = #tpu.pipeline_mode<synchronous>, transform_indices = @transform_6, window_bounds = array<i64: 1, 256>}, {pipeline_mode = #tpu.pipeline_mode<synchronous>, transform_indices = @transform_7, window_bounds = array<i64: 256, 128>}, {pipeline_mode = #tpu.pipeline_mode<synchronous>, transform_indices = @transform_8, window_bounds = array<i64: 1, 128>}, {pipeline_mode = #tpu.pipeline_mode<synchronous>, transform_indices = @transform_9, window_bounds = array<i64: 128, 256>}, {pipeline_mode = #tpu.pipeline_mode<synchronous>, transform_indices = @transform_10, window_bounds = array<i64: 1, 256>}, {pipeline_mode = #tpu.pipeline_mode<synchronous>, transform_indices = @transform_11, window_bounds = array<i64: 1, 256>}, {pipeline_mode = #tpu.pipeline_mode<synchronous>, transform_indices = @transform_12, window_bounds = array<i64: 1, 256>}, {pipeline_mode = #tpu.pipeline_mode<synchronous>, transform_indices = @transform_13, window_bounds = array<i64: 256, 128>}, {pipeline_mode = #tpu.pipeline_mode<synchronous>, transform_indices = @transform_14, window_bounds = array<i64: 1, 128>}, {pipeline_mode = #tpu.pipeline_mode<synchronous>, transform_indices = @transform_15, window_bounds = array<i64: 1024, 128>}, {pipeline_mode = #tpu.pipeline_mode<synchronous>, transform_indices = @transform_16, window_bounds = array<i64: 1, 128>}, {pipeline_mode = #tpu.pipeline_mode<synchronous>, transform_indices = @transform_17, window_bounds = array<i64: 128, 256>}, {pipeline_mode = #tpu.pipeline_mode<synchronous>, transform_indices = @transform_18, window_bounds = array<i64: 1, 256>}, {pipeline_mode = #tpu.pipeline_mode<synchronous>, transform_indices = @transform_19, window_bounds = array<i64: 1, 256>}, {pipeline_mode = #tpu.pipeline_mode<synchronous>, transform_indices = @transform_20, window_bounds = array<i64: 1, 256>}, {pipeline_mode = #tpu.pipeline_mode<synchronous>, transform_indices = @transform_21, window_bounds = array<i64: 256, 128>}, {pipeline_mode = #tpu.pipeline_mode<synchronous>, transform_indices = @transform_22, window_bounds = array<i64: 1, 128>}, {transform_indices = @transform_23, window_bounds = array<i64: 1, 8, 128>}, {transform_indices = @transform_24, window_bounds = array<i64: 1, 8, 128>}]} {
    %c0 = arith.constant 0 : index
    %c0_0 = arith.constant 0 : index
    %c0_1 = arith.constant 0 : index
    %0 = vector.load %arg1[%c0, %c0_0, %c0_1] : memref<1x8x1024xbf16, #tpu.memory_space<vmem>>, vector<1x8x1024xbf16>
    %1 = vector.shape_cast %0 : vector<1x8x1024xbf16> to vector<8x1024xbf16>
    %c0_2 = arith.constant 0 : index
    %c0_3 = arith.constant 0 : index
    %2 = vector.load %arg2[%c0_2, %c0_3] : memref<1024x128xbf16, #tpu.memory_space<vmem>>, vector<1024x128xbf16>
    %cst = arith.constant dense<0.000000e+00> : vector<8x128xf32>
    %3 = tpu.matmul %1, %2, %cst {dimension_numbers = #tpu.dot_dimension_numbers<[1], [0], [0], [1], [0, 0, 1, 1], [], []>} : vector<8x1024xbf16>, vector<1024x128xbf16>, vector<8x128xf32> -> vector<8x128xf32>
    %c0_4 = arith.constant 0 : index
    %c0_5 = arith.constant 0 : index
    %4 = vector.load %arg3[%c0_4, %c0_5] : memref<1x128xf32, #tpu.memory_space<vmem>>, vector<1x128xf32>
    %5 = vector.broadcast %4 : vector<1x128xf32> to vector<8x128xf32>
    %6 = arith.addf %3, %5 : vector<8x128xf32>
    %c0_6 = arith.constant 0 : index
    %c0_7 = arith.constant 0 : index
    %7 = vector.load %arg4[%c0_6, %c0_7] : memref<128x256xbf16, #tpu.memory_space<vmem>>, vector<128x256xbf16>
    %c0_8 = arith.constant 0 : index
    %c0_9 = arith.constant 0 : index
    %8 = vector.load %arg5[%c0_8, %c0_9] : memref<1x256xf32, #tpu.memory_space<vmem>>, vector<1x256xf32>
    %c0_10 = arith.constant 0 : index
    %c0_11 = arith.constant 0 : index
    %9 = vector.load %arg6[%c0_10, %c0_11] : memref<1x256xf32, #tpu.memory_space<vmem>>, vector<1x256xf32>
    %c0_12 = arith.constant 0 : index
    %c0_13 = arith.constant 0 : index
    %10 = vector.load %arg7[%c0_12, %c0_13] : memref<1x256xf32, #tpu.memory_space<vmem>>, vector<1x256xf32>
    %c0_14 = arith.constant 0 : index
    %c0_15 = arith.constant 0 : index
    %11 = vector.load %arg8[%c0_14, %c0_15] : memref<256x128xbf16, #tpu.memory_space<vmem>>, vector<256x128xbf16>
    %c0_16 = arith.constant 0 : index
    %c0_17 = arith.constant 0 : index
    %12 = vector.load %arg9[%c0_16, %c0_17] : memref<1x128xf32, #tpu.memory_space<vmem>>, vector<1x128xf32>
    %13 = arith.truncf %6 : vector<8x128xf32> to vector<8x128xbf16>
    %cst_18 = arith.constant dense<0.000000e+00> : vector<8x256xf32>
    %14 = tpu.matmul %13, %7, %cst_18 {dimension_numbers = #tpu.dot_dimension_numbers<[1], [0], [0], [1], [0, 0, 1, 1], [], []>} : vector<8x128xbf16>, vector<128x256xbf16>, vector<8x256xf32> -> vector<8x256xf32>
    %15 = vector.broadcast %8 : vector<1x256xf32> to vector<8x256xf32>
    %16 = arith.addf %14, %15 : vector<8x256xf32>
    %cst_19 = arith.constant dense<0.000000e+00> : vector<256xf32>
    %17 = vector.multi_reduction <add>, %16, %cst_19 [0] : vector<8x256xf32> to vector<256xf32>
    %18 = vector.shape_cast %17 : vector<256xf32> to vector<1x256xf32>
    %cst_20 = arith.constant 8.000000e+00 : f32
    %19 = vector.broadcast %cst_20 : f32 to vector<1x256xf32>
    %20 = arith.divf %18, %19 : vector<1x256xf32>
    %21 = vector.broadcast %20 : vector<1x256xf32> to vector<8x256xf32>
    %22 = arith.subf %16, %21 : vector<8x256xf32>
    %23 = arith.mulf %22, %22 : vector<8x256xf32>
    %cst_21 = arith.constant dense<0.000000e+00> : vector<256xf32>
    %24 = vector.multi_reduction <add>, %23, %cst_21 [0] : vector<8x256xf32> to vector<256xf32>
    %25 = vector.shape_cast %24 : vector<256xf32> to vector<1x256xf32>
    %cst_22 = arith.constant 8.000000e+00 : f32
    %26 = vector.broadcast %cst_22 : f32 to vector<1x256xf32>
    %27 = arith.divf %25, %26 : vector<1x256xf32>
    %cst_23 = arith.constant 9.99999974E-6 : f32
    %28 = vector.broadcast %cst_23 : f32 to vector<1x256xf32>
    %29 = arith.addf %27, %28 : vector<1x256xf32>
    %30 = math.rsqrt %29 : vector<1x256xf32>
    %31 = vector.broadcast %30 : vector<1x256xf32> to vector<8x256xf32>
    %32 = arith.mulf %22, %31 : vector<8x256xf32>
    %33 = vector.broadcast %9 : vector<1x256xf32> to vector<8x256xf32>
    %34 = arith.mulf %32, %33 : vector<8x256xf32>
    %35 = vector.broadcast %10 : vector<1x256xf32> to vector<8x256xf32>
    %36 = arith.addf %34, %35 : vector<8x256xf32>
    %cst_24 = arith.constant 0.000000e+00 : f32
    %37 = vector.broadcast %cst_24 : f32 to vector<8x256xf32>
    %38 = arith.maximumf %36, %37 : vector<8x256xf32>
    %39 = arith.truncf %38 : vector<8x256xf32> to vector<8x256xbf16>
    %cst_25 = arith.constant dense<0.000000e+00> : vector<8x128xf32>
    %40 = tpu.matmul %39, %11, %cst_25 {dimension_numbers = #tpu.dot_dimension_numbers<[1], [0], [0], [1], [0, 0, 1, 1], [], []>} : vector<8x256xbf16>, vector<256x128xbf16>, vector<8x128xf32> -> vector<8x128xf32>
    %41 = vector.broadcast %12 : vector<1x128xf32> to vector<8x128xf32>
    %42 = arith.addf %40, %41 : vector<8x128xf32>
    %c0_26 = arith.constant 0 : index
    %c0_27 = arith.constant 0 : index
    %43 = vector.load %arg10[%c0_26, %c0_27] : memref<128x256xbf16, #tpu.memory_space<vmem>>, vector<128x256xbf16>
    %c0_28 = arith.constant 0 : index
    %c0_29 = arith.constant 0 : index
    %44 = vector.load %arg11[%c0_28, %c0_29] : memref<1x256xf32, #tpu.memory_space<vmem>>, vector<1x256xf32>
    %c0_30 = arith.constant 0 : index
    %c0_31 = arith.constant 0 : index
    %45 = vector.load %arg12[%c0_30, %c0_31] : memref<1x256xf32, #tpu.memory_space<vmem>>, vector<1x256xf32>
    %c0_32 = arith.constant 0 : index
    %c0_33 = arith.constant 0 : index
    %46 = vector.load %arg13[%c0_32, %c0_33] : memref<1x256xf32, #tpu.memory_space<vmem>>, vector<1x256xf32>
    %c0_34 = arith.constant 0 : index
    %c0_35 = arith.constant 0 : index
    %47 = vector.load %arg14[%c0_34, %c0_35] : memref<256x128xbf16, #tpu.memory_space<vmem>>, vector<256x128xbf16>
    %c0_36 = arith.constant 0 : index
    %c0_37 = arith.constant 0 : index
    %48 = vector.load %arg15[%c0_36, %c0_37] : memref<1x128xf32, #tpu.memory_space<vmem>>, vector<1x128xf32>
    %49 = arith.truncf %42 : vector<8x128xf32> to vector<8x128xbf16>
    %cst_38 = arith.constant dense<0.000000e+00> : vector<8x256xf32>
    %50 = tpu.matmul %49, %43, %cst_38 {dimension_numbers = #tpu.dot_dimension_numbers<[1], [0], [0], [1], [0, 0, 1, 1], [], []>} : vector<8x128xbf16>, vector<128x256xbf16>, vector<8x256xf32> -> vector<8x256xf32>
    %51 = vector.broadcast %44 : vector<1x256xf32> to vector<8x256xf32>
    %52 = arith.addf %50, %51 : vector<8x256xf32>
    %cst_39 = arith.constant dense<0.000000e+00> : vector<256xf32>
    %53 = vector.multi_reduction <add>, %52, %cst_39 [0] : vector<8x256xf32> to vector<256xf32>
    %54 = vector.shape_cast %53 : vector<256xf32> to vector<1x256xf32>
    %cst_40 = arith.constant 8.000000e+00 : f32
    %55 = vector.broadcast %cst_40 : f32 to vector<1x256xf32>
    %56 = arith.divf %54, %55 : vector<1x256xf32>
    %57 = vector.broadcast %56 : vector<1x256xf32> to vector<8x256xf32>
    %58 = arith.subf %52, %57 : vector<8x256xf32>
    %59 = arith.mulf %58, %58 : vector<8x256xf32>
    %cst_41 = arith.constant dense<0.000000e+00> : vector<256xf32>
    %60 = vector.multi_reduction <add>, %59, %cst_41 [0] : vector<8x256xf32> to vector<256xf32>
    %61 = vector.shape_cast %60 : vector<256xf32> to vector<1x256xf32>
    %cst_42 = arith.constant 8.000000e+00 : f32
    %62 = vector.broadcast %cst_42 : f32 to vector<1x256xf32>
    %63 = arith.divf %61, %62 : vector<1x256xf32>
    %cst_43 = arith.constant 9.99999974E-6 : f32
    %64 = vector.broadcast %cst_43 : f32 to vector<1x256xf32>
    %65 = arith.addf %63, %64 : vector<1x256xf32>
    %66 = math.rsqrt %65 : vector<1x256xf32>
    %67 = vector.broadcast %66 : vector<1x256xf32> to vector<8x256xf32>
    %68 = arith.mulf %58, %67 : vector<8x256xf32>
    %69 = vector.broadcast %45 : vector<1x256xf32> to vector<8x256xf32>
    %70 = arith.mulf %68, %69 : vector<8x256xf32>
    %71 = vector.broadcast %46 : vector<1x256xf32> to vector<8x256xf32>
    %72 = arith.addf %70, %71 : vector<8x256xf32>
    %cst_44 = arith.constant 0.000000e+00 : f32
    %73 = vector.broadcast %cst_44 : f32 to vector<8x256xf32>
    %74 = arith.maximumf %72, %73 : vector<8x256xf32>
    %75 = arith.truncf %74 : vector<8x256xf32> to vector<8x256xbf16>
    %cst_45 = arith.constant dense<0.000000e+00> : vector<8x128xf32>
    %76 = tpu.matmul %75, %47, %cst_45 {dimension_numbers = #tpu.dot_dimension_numbers<[1], [0], [0], [1], [0, 0, 1, 1], [], []>} : vector<8x256xbf16>, vector<256x128xbf16>, vector<8x128xf32> -> vector<8x128xf32>
    %77 = vector.broadcast %48 : vector<1x128xf32> to vector<8x128xf32>
    %78 = arith.addf %76, %77 : vector<8x128xf32>
    %c0_46 = arith.constant 0 : index
    %c0_47 = arith.constant 0 : index
    %c0_48 = arith.constant 0 : index
    %79 = vector.load %arg24[%c0_46, %c0_47, %c0_48] : memref<1x8x128xf32, #tpu.memory_space<vmem>>, vector<1x8x128xf32>
    %80 = vector.shape_cast %79 : vector<1x8x128xf32> to vector<8x128xf32>
    %81 = vector.shape_cast %78 : vector<8x128xf32> to vector<1x8x128xf32>
    tpu.vector_store %arg24[%c0_46, %c0_47, %c0_48], %81 {strides = array<i32>} : memref<1x8x128xf32, #tpu.memory_space<vmem>>, vector<1x8x128xf32>,
    %c0_49 = arith.constant 0 : index
    %c0_50 = arith.constant 0 : index
    %82 = vector.load %arg16[%c0_49, %c0_50] : memref<1024x128xbf16, #tpu.memory_space<vmem>>, vector<1024x128xbf16>
    %cst_51 = arith.constant dense<0.000000e+00> : vector<8x128xf32>
    %83 = tpu.matmul %1, %82, %cst_51 {dimension_numbers = #tpu.dot_dimension_numbers<[1], [0], [0], [1], [0, 0, 1, 1], [], []>} : vector<8x1024xbf16>, vector<1024x128xbf16>, vector<8x128xf32> -> vector<8x128xf32>
    %c0_52 = arith.constant 0 : index
    %c0_53 = arith.constant 0 : index
    %84 = vector.load %arg17[%c0_52, %c0_53] : memref<1x128xf32, #tpu.memory_space<vmem>>, vector<1x128xf32>
    %85 = vector.broadcast %84 : vector<1x128xf32> to vector<8x128xf32>
    %86 = arith.addf %83, %85 : vector<8x128xf32>
    %c0_54 = arith.constant 0 : index
    %c0_55 = arith.constant 0 : index
    %87 = vector.load %arg18[%c0_54, %c0_55] : memref<128x256xbf16, #tpu.memory_space<vmem>>, vector<128x256xbf16>
    %c0_56 = arith.constant 0 : index
    %c0_57 = arith.constant 0 : index
    %88 = vector.load %arg19[%c0_56, %c0_57] : memref<1x256xf32, #tpu.memory_space<vmem>>, vector<1x256xf32>
    %c0_58 = arith.constant 0 : index
    %c0_59 = arith.constant 0 : index
    %89 = vector.load %arg20[%c0_58, %c0_59] : memref<1x256xf32, #tpu.memory_space<vmem>>, vector<1x256xf32>
    %c0_60 = arith.constant 0 : index
    %c0_61 = arith.constant 0 : index
    %90 = vector.load %arg21[%c0_60, %c0_61] : memref<1x256xf32, #tpu.memory_space<vmem>>, vector<1x256xf32>
    %c0_62 = arith.constant 0 : index
    %c0_63 = arith.constant 0 : index
    %91 = vector.load %arg22[%c0_62, %c0_63] : memref<256x128xbf16, #tpu.memory_space<vmem>>, vector<256x128xbf16>
    %c0_64 = arith.constant 0 : index
    %c0_65 = arith.constant 0 : index
    %92 = vector.load %arg23[%c0_64, %c0_65] : memref<1x128xf32, #tpu.memory_space<vmem>>, vector<1x128xf32>
    %93 = arith.truncf %86 : vector<8x128xf32> to vector<8x128xbf16>
    %cst_66 = arith.constant dense<0.000000e+00> : vector<8x256xf32>
    %94 = tpu.matmul %93, %87, %cst_66 {dimension_numbers = #tpu.dot_dimension_numbers<[1], [0], [0], [1], [0, 0, 1, 1], [], []>} : vector<8x128xbf16>, vector<128x256xbf16>, vector<8x256xf32> -> vector<8x256xf32>
    %95 = vector.broadcast %88 : vector<1x256xf32> to vector<8x256xf32>
    %96 = arith.addf %94, %95 : vector<8x256xf32>
    %cst_67 = arith.constant dense<0.000000e+00> : vector<256xf32>
    %97 = vector.multi_reduction <add>, %96, %cst_67 [0] : vector<8x256xf32> to vector<256xf32>
    %98 = vector.shape_cast %97 : vector<256xf32> to vector<1x256xf32>
    %cst_68 = arith.constant 8.000000e+00 : f32
    %99 = vector.broadcast %cst_68 : f32 to vector<1x256xf32>
    %100 = arith.divf %98, %99 : vector<1x256xf32>
    %101 = vector.broadcast %100 : vector<1x256xf32> to vector<8x256xf32>
    %102 = arith.subf %96, %101 : vector<8x256xf32>
    %103 = arith.mulf %102, %102 : vector<8x256xf32>
    %cst_69 = arith.constant dense<0.000000e+00> : vector<256xf32>
    %104 = vector.multi_reduction <add>, %103, %cst_69 [0] : vector<8x256xf32> to vector<256xf32>
    %105 = vector.shape_cast %104 : vector<256xf32> to vector<1x256xf32>
    %cst_70 = arith.constant 8.000000e+00 : f32
    %106 = vector.broadcast %cst_70 : f32 to vector<1x256xf32>
    %107 = arith.divf %105, %106 : vector<1x256xf32>
    %cst_71 = arith.constant 9.99999974E-6 : f32
    %108 = vector.broadcast %cst_71 : f32 to vector<1x256xf32>
    %109 = arith.addf %107, %108 : vector<1x256xf32>
    %110 = math.rsqrt %109 : vector<1x256xf32>
    %111 = vector.broadcast %110 : vector<1x256xf32> to vector<8x256xf32>
    %112 = arith.mulf %102, %111 : vector<8x256xf32>
    %113 = vector.broadcast %89 : vector<1x256xf32> to vector<8x256xf32>
    %114 = arith.mulf %112, %113 : vector<8x256xf32>
    %115 = vector.broadcast %90 : vector<1x256xf32> to vector<8x256xf32>
    %116 = arith.addf %114, %115 : vector<8x256xf32>
    %cst_72 = arith.constant 0.000000e+00 : f32
    %117 = vector.broadcast %cst_72 : f32 to vector<8x256xf32>
    %118 = arith.maximumf %116, %117 : vector<8x256xf32>
    %119 = arith.truncf %118 : vector<8x256xf32> to vector<8x256xbf16>
    %cst_73 = arith.constant dense<0.000000e+00> : vector<8x128xf32>
    %120 = tpu.matmul %119, %91, %cst_73 {dimension_numbers = #tpu.dot_dimension_numbers<[1], [0], [0], [1], [0, 0, 1, 1], [], []>} : vector<8x256xbf16>, vector<256x128xbf16>, vector<8x128xf32> -> vector<8x128xf32>
    %121 = vector.broadcast %92 : vector<1x128xf32> to vector<8x128xf32>
    %122 = arith.addf %120, %121 : vector<8x128xf32>
    %c0_74 = arith.constant 0 : index
    %c0_75 = arith.constant 0 : index
    %c0_76 = arith.constant 0 : index
    %123 = vector.load %arg25[%c0_74, %c0_75, %c0_76] : memref<1x8x128xf32, #tpu.memory_space<vmem>>, vector<1x8x128xf32>
    %124 = vector.shape_cast %123 : vector<1x8x128xf32> to vector<8x128xf32>
    %125 = vector.shape_cast %122 : vector<8x128xf32> to vector<1x8x128xf32>
    tpu.vector_store %arg25[%c0_74, %c0_75, %c0_76], %125 {strides = array<i32>} : memref<1x8x128xf32, #tpu.memory_space<vmem>>, vector<1x8x128xf32>,
    return
  }
  func.func @transform_0(%arg0: i32) -> (i32, i32, i32) {
    %c0_i32 = arith.constant 0 : i32
    %c0_i32_0 = arith.constant 0 : i32
    %c0_i32_1 = arith.constant 0 : i32
    return %arg0, %c0_i32, %c0_i32_0 : i32, i32, i32
  }
  func.func @transform_1(%arg0: i32) -> (i32, i32) {
    %c0_i32 = arith.constant 0 : i32
    %c0_i32_0 = arith.constant 0 : i32
    %c0_i32_1 = arith.constant 0 : i32
    return %c0_i32, %c0_i32_0 : i32, i32
  }
  func.func @transform_2(%arg0: i32) -> (i32, i32) {
    %c0_i32 = arith.constant 0 : i32
    %c0_i32_0 = arith.constant 0 : i32
    %c0_i32_1 = arith.constant 0 : i32
    return %c0_i32, %c0_i32_0 : i32, i32
  }
  func.func @transform_3(%arg0: i32) -> (i32, i32) {
    %c0_i32 = arith.constant 0 : i32
    %c0_i32_0 = arith.constant 0 : i32
    %c0_i32_1 = arith.constant 0 : i32
    return %c0_i32, %c0_i32_0 : i32, i32
  }
  func.func @transform_4(%arg0: i32) -> (i32, i32) {
    %c0_i32 = arith.constant 0 : i32
    %c0_i32_0 = arith.constant 0 : i32
    %c0_i32_1 = arith.constant 0 : i32
    return %c0_i32, %c0_i32_0 : i32, i32
  }
  func.func @transform_5(%arg0: i32) -> (i32, i32) {
    %c0_i32 = arith.constant 0 : i32
    %c0_i32_0 = arith.constant 0 : i32
    %c0_i32_1 = arith.constant 0 : i32
    return %c0_i32, %c0_i32_0 : i32, i32
  }
  func.func @transform_6(%arg0: i32) -> (i32, i32) {
    %c0_i32 = arith.constant 0 : i32
    %c0_i32_0 = arith.constant 0 : i32
    %c0_i32_1 = arith.constant 0 : i32
    return %c0_i32, %c0_i32_0 : i32, i32
  }
  func.func @transform_7(%arg0: i32) -> (i32, i32) {
    %c0_i32 = arith.constant 0 : i32
    %c0_i32_0 = arith.constant 0 : i32
    %c0_i32_1 = arith.constant 0 : i32
    return %c0_i32, %c0_i32_0 : i32, i32
  }
  func.func @transform_8(%arg0: i32) -> (i32, i32) {
    %c0_i32 = arith.constant 0 : i32
    %c0_i32_0 = arith.constant 0 : i32
    %c0_i32_1 = arith.constant 0 : i32
    return %c0_i32, %c0_i32_0 : i32, i32
  }
  func.func @transform_9(%arg0: i32) -> (i32, i32) {
    %c0_i32 = arith.constant 0 : i32
    %c0_i32_0 = arith.constant 0 : i32
    %c0_i32_1 = arith.constant 0 : i32
    return %c0_i32, %c0_i32_0 : i32, i32
  }
  func.func @transform_10(%arg0: i32) -> (i32, i32) {
    %c0_i32 = arith.constant 0 : i32
    %c0_i32_0 = arith.constant 0 : i32
    %c0_i32_1 = arith.constant 0 : i32
    return %c0_i32, %c0_i32_0 : i32, i32
  }
  func.func @transform_11(%arg0: i32) -> (i32, i32) {
    %c0_i32 = arith.constant 0 : i32
    %c0_i32_0 = arith.constant 0 : i32
    %c0_i32_1 = arith.constant 0 : i32
    return %c0_i32, %c0_i32_0 : i32, i32
  }
  func.func @transform_12(%arg0: i32) -> (i32, i32) {
    %c0_i32 = arith.constant 0 : i32
    %c0_i32_0 = arith.constant 0 : i32
    %c0_i32_1 = arith.constant 0 : i32
    return %c0_i32, %c0_i32_0 : i32, i32
  }
  func.func @transform_13(%arg0: i32) -> (i32, i32) {
    %c0_i32 = arith.constant 0 : i32
    %c0_i32_0 = arith.constant 0 : i32
    %c0_i32_1 = arith.constant 0 : i32
    return %c0_i32, %c0_i32_0 : i32, i32
  }
  func.func @transform_14(%arg0: i32) -> (i32, i32) {
    %c0_i32 = arith.constant 0 : i32
    %c0_i32_0 = arith.constant 0 : i32
    %c0_i32_1 = arith.constant 0 : i32
    return %c0_i32, %c0_i32_0 : i32, i32
  }
  func.func @transform_15(%arg0: i32) -> (i32, i32) {
    %c0_i32 = arith.constant 0 : i32
    %c0_i32_0 = arith.constant 0 : i32
    %c0_i32_1 = arith.constant 0 : i32
    return %c0_i32, %c0_i32_0 : i32, i32
  }
  func.func @transform_16(%arg0: i32) -> (i32, i32) {
    %c0_i32 = arith.constant 0 : i32
    %c0_i32_0 = arith.constant 0 : i32
    %c0_i32_1 = arith.constant 0 : i32
    return %c0_i32, %c0_i32_0 : i32, i32
  }
  func.func @transform_17(%arg0: i32) -> (i32, i32) {
    %c0_i32 = arith.constant 0 : i32
    %c0_i32_0 = arith.constant 0 : i32
    %c0_i32_1 = arith.constant 0 : i32
    return %c0_i32, %c0_i32_0 : i32, i32
  }
  func.func @transform_18(%arg0: i32) -> (i32, i32) {
    %c0_i32 = arith.constant 0 : i32
    %c0_i32_0 = arith.constant 0 : i32
    %c0_i32_1 = arith.constant 0 : i32
    return %c0_i32, %c0_i32_0 : i32, i32
  }
  func.func @transform_19(%arg0: i32) -> (i32, i32) {
    %c0_i32 = arith.constant 0 : i32
    %c0_i32_0 = arith.constant 0 : i32
    %c0_i32_1 = arith.constant 0 : i32
    return %c0_i32, %c0_i32_0 : i32, i32
  }
  func.func @transform_20(%arg0: i32) -> (i32, i32) {
    %c0_i32 = arith.constant 0 : i32
    %c0_i32_0 = arith.constant 0 : i32
    %c0_i32_1 = arith.constant 0 : i32
    return %c0_i32, %c0_i32_0 : i32, i32
  }
  func.func @transform_21(%arg0: i32) -> (i32, i32) {
    %c0_i32 = arith.constant 0 : i32
    %c0_i32_0 = arith.constant 0 : i32
    %c0_i32_1 = arith.constant 0 : i32
    return %c0_i32, %c0_i32_0 : i32, i32
  }
  func.func @transform_22(%arg0: i32) -> (i32, i32) {
    %c0_i32 = arith.constant 0 : i32
    %c0_i32_0 = arith.constant 0 : i32
    %c0_i32_1 = arith.constant 0 : i32
    return %c0_i32, %c0_i32_0 : i32, i32
  }
  func.func @transform_23(%arg0: i32) -> (i32, i32, i32) {
    %c0_i32 = arith.constant 0 : i32
    %c0_i32_0 = arith.constant 0 : i32
    %c0_i32_1 = arith.constant 0 : i32
    return %arg0, %c0_i32, %c0_i32_0 : i32, i32, i32
  }
  func.func @transform_24(%arg0: i32) -> (i32, i32, i32) {
    %c0_i32 = arith.constant 0 : i32
    %c0_i32_0 = arith.constant 0 : i32
    %c0_i32_1 = arith.constant 0 : i32
    return %arg0, %c0_i32, %c0_i32_0 : i32, i32, i32
  }
}

</mosaic_0001>

<bundles_post_ra>
// kernel: simsiam_forward.2
= control target key start
LH: loop header
LB: loop body
LE: loop exit
PB: predicated region body
PF: predicated region fallthrough
CT: control target
= control target key end

     0   :  { %v74_v0 = vlaneseq  ;;  %s3599_s0 = inlined_call_operand.<no memory space> [shape: f32[1], index: 0, kind: input, shape index: {}]   ;;  %s3600_s1 = inlined_call_operand.vmem [shape: f32[1,256], index: 1, kind: input, shape index: {}]   ;;  %s3601_s9 = inlined_call_operand.vmem [shape: f32[1,256], index: 9, kind: input, shape index: {}, may-alias: {9,17}]   ;;  %s3602_s2 = inlined_call_operand.vmem [shape: f32[1,128], index: 2, kind: input, shape index: {}]   ;;  %s3603_s10 = inlined_call_operand.vmem [shape: f32[1,128], index: 10, kind: input, shape index: {}, may-alias: {10,18}]   ;;  %s3604_s3 = inlined_call_operand.vmem [shape: f32[1,128], index: 3, kind: input, shape index: {}]   ;;  %s3605_s11 = inlined_call_operand.vmem [shape: f32[1,128], index: 11, kind: input, shape index: {}, may-alias: {11,19}]   ;;  %s3606_s12 = inlined_call_operand.vmem [shape: f32[1,256], index: 12, kind: input, shape index: {}, may-alias: {12,20}]   ;;  %s3607_s6 = inlined_call_operand.vmem [shape: f32[128,256], index: 6, kind: input, shape index: {}]   ;;  %s3608_s14 = inlined_call_operand.vmem [shape: f32[128,256], index: 14, kind: input, shape index: {}, may-alias: {14,22}]   ;;  %s3609_s4 = inlined_call_operand.vmem [shape: f32[1,256], index: 4, kind: input, shape index: {}]   ;;  %s3610_s5 = inlined_call_operand.vmem [shape: f32[1,256], index: 5, kind: input, shape index: {}]   ;;  %s3611_s13 = inlined_call_operand.vmem [shape: f32[1,256], index: 13, kind: input, shape index: {}, may-alias: {13,21}]   ;;  %s3612_s17 = inlined_call_operand.vmem [shape: f32[1,256], index: 17, kind: output, shape index: {0}, may-alias: {9,17}]   ;;  %s3613_s18 = inlined_call_operand.vmem [shape: f32[1,128], index: 18, kind: output, shape index: {1}, may-alias: {10,18}]   ;;  %s3614_s19 = inlined_call_operand.vmem [shape: f32[1,128], index: 19, kind: output, shape index: {2}, may-alias: {11,19}]   ;;  %s3615_s20 = inlined_call_operand.vmem [shape: f32[1,256], index: 20, kind: output, shape index: {3}, may-alias: {12,20}]   ;;  %s3616_s21 = inlined_call_operand.vmem [shape: f32[1,256], index: 21, kind: output, shape index: {4}, may-alias: {13,21}]   ;;  %s3617_s22 = inlined_call_operand.vmem [shape: f32[128,256], index: 22, kind: output, shape index: {5}, may-alias: {14,22}]   ;;  %s3618_s7 = inlined_call_operand.vmem [shape: f32[256,128], index: 7, kind: input, shape index: {}]   ;;  %s3619_s15 = inlined_call_operand.vmem [shape: f32[256,128], index: 15, kind: input, shape index: {}, may-alias: {15,23}]   ;;  %s3620_s23 = inlined_call_operand.vmem [shape: f32[256,128], index: 23, kind: output, shape index: {6}, may-alias: {15,23}]   ;;  %s3621_s8 = inlined_call_operand.vmem [shape: f32[1024,128], index: 8, kind: input, shape index: {}]   ;;  %s3622_s16 = inlined_call_operand.vmem [shape: f32[1024,128], index: 16, kind: input, shape index: {}, may-alias: {16,24}]   ;;  %s3623_s24 = inlined_call_operand.vmem [shape: f32[1024,128], index: 24, kind: output, shape index: {7}, may-alias: {16,24}]  }
   0x1   :  { %3626 = sst [smem:[#allocation3_spill]] %s3599_s0  ;;  %v103_v4 = vld [vmem:[%s3608_s14] sm:$0xff]  ;;  %v104_v27 = vld [vmem:[%s3608_s14 + $0x8] sm:$0xff]  ;;  %v105_v29 = vld [vmem:[%s3608_s14 + $0x10] sm:$0xff] }
   0x2   :  { %3627 = sst [smem:[#allocation4_spill]] %s3600_s1  ;;  %vm1430_vm0 = vcmp.lt.s32.totalorder %v74_v0, 256  ;;  %v93_v20 = vld [vmem:[%s3609_s4] sm:$0x3]  ;;  %v106_v35 = vld [vmem:[%s3608_s14 + $0x18] sm:$0xff]  ;;  %v108_v43 = vld [vmem:[%s3608_s14 + $0x28] sm:$0xff] }
   0x3   :  { %3628 = sst [smem:[#allocation5_spill]] %s3601_s9  ;;  %v97_v21 = vld [vmem:[%s3611_s13] sm:$0x3]  ;;  %v109_v49 = vld [vmem:[%s3608_s14 + $0x30] sm:$0xff]  ;;  %v110_v55 = vld [vmem:[%s3608_s14 + $0x38] sm:$0xff] }
   0x4   :  { %3629 = sst [smem:[#allocation6_spill]] %s3602_s2  ;;  %v99_v22 = vld [vmem:[%s3610_s5] sm:$0x3] }
   0x5   :  { %3630 = sst [smem:[#allocation7_spill]] %s3603_s10  ;;  %v107_v41 = vld [vmem:[%s3608_s14 + $0x20] sm:$0xff] }
   0x6   :  { %3631 = sst [smem:[#allocation8_spill]] %s3604_s3  ;;  %v111_v57 = vld [vmem:[%s3608_s14 + $0x40] sm:$0xff] }
   0x7   :  { %3632 = sst [smem:[#allocation9_spill]] %s3605_s11 }
   0x8   :  { %3633 = sst [smem:[#allocation10_spill]] %s3606_s12 }
   0x9   :  { %3634 = sst [smem:[#allocation11_spill]] %s3607_s6 }
   0xa   :  { %s3635_s27 = sld [smem:[#allocation5_spill]] }
   0xb   :  { %s3636_s9 = sld [smem:[#allocation3_spill]] }
   0xc   :  { %s3637_s25 = sld [smem:[#allocation4_spill]] }
   0xd   :  { %s3640_s26 = sld [smem:[#allocation7_spill]] }
   0xe   :  { %s3641_s11 = sld [smem:[#allocation6_spill]] }
   0xf   :  { %s3642_s0 = sld [smem:[#allocation11_spill]] }
  0x10   :  { %v66_v1 = vld [vmem:[%s3635_s27] sm:$0x3]  ;;  %s3644_s1 = sld [smem:[#allocation8_spill]] }
  0x11   :  { %v1418_v2 = vstv %s3636_s9  ;;  %s69_s12 = ssub.f32 1.0, %s3636_s9 }
  0x12   :  { %v70_v3 = vld [vmem:[%s3637_s25] sm:$0x3]  ;;  %v68_v5 = vmul.f32 %v1418_v2, %v66_v1  ;;  %s3643_s25 = sld [smem:[#allocation9_spill]]  ;;  %v135_v15 = vmul.f32 %v103_v4, %v1418_v2  ;;  %v98_v25 = vmul.f32 %v97_v21, %v1418_v2  ;;  %v136_v39 = vmul.f32 %v104_v27, %v1418_v2 }
  0x13   :  { %v79_v7 = vld [vmem:[%s3640_s26] sm:$0x1]  ;;  %v1443_v10 = vstv %s69_s12  ;;  %s3645_s27 = sld [smem:[#allocation10_spill]]  ;;  %v137_v45 = vmul.f32 %v105_v29, %v1418_v2  ;;  %v138_v47 = vmul.f32 %v106_v35, %v1418_v2  ;;  %v139_v53 = vmul.f32 %v107_v41, %v1418_v2 }
  0x14   :  { %v81_v8 = vld [vmem:[%s3641_s11] sm:$0x1]  ;;  %v80_v11 = vmul.f32 %v79_v7, %v1418_v2  ;;  %v72_v16 = vmul.f32 %v1443_v10, %v70_v3  ;;  %v94_v24 = vmul.f32 %v93_v20, %v1443_v10  ;;  %v100_v26 = vmul.f32 %v99_v22, %v1443_v10 }
  0x15   :  { %v167_v9 = vld [vmem:[%s3642_s0] sm:$0xff]  ;;  %v82_v17 = vmul.f32 %v81_v8, %v1443_v10  ;;  %v168_v28 = vld [vmem:[%s3642_s0 + $0x8] sm:$0xff]  ;;  %v169_v34 = vld [vmem:[%s3642_s0 + $0x10] sm:$0xff]  ;;  %v140_v59 = vmul.f32 %v108_v43, %v1418_v2  ;;  %v141_v61 = vmul.f32 %v109_v49, %v1418_v2 }
  0x16   :  { %v87_v13 = vld [vmem:[%s3644_s1] sm:$0x1]  ;;  %v73_v30 = vadd.f32 %v72_v16, %v68_v5  ;;  %v199_v33 = vmul.f32 %v167_v9, %v1443_v10  ;;  %v170_v36 = vld [vmem:[%s3642_s0 + $0x18] sm:$0xff]  ;;  %v101_v38 = vadd.f32 %v100_v26, %v98_v25  ;;  %v200_v40 = vmul.f32 %v168_v28, %v1443_v10  ;;  %v172_v48 = vld [vmem:[%s3642_s0 + $0x28] sm:$0xff] }
  0x17   :  { %v88_v19 = vmul.f32 %v87_v13, %v1443_v10  ;;  %v83_v31 = vadd.f32 %v82_v17, %v80_v11  ;;  %v171_v42 = vld [vmem:[%s3642_s0 + $0x20] sm:$0xff]  ;;  %v201_v46 = vmul.f32 %v169_v34, %v1443_v10  ;;  %v173_v50 = vld [vmem:[%s3642_s0 + $0x30] sm:$0xff]  ;;  %v202_v52 = vmul.f32 %v170_v36, %v1443_v10  ;;  %v174_v56 = vld [vmem:[%s3642_s0 + $0x38] sm:$0xff] }
  0x18   :  { %v85_v12 = vld [vmem:[%s3643_s25] sm:$0x1]  ;;  %78 = vst.msk [vmem:[%s3612_s17] sm:$0x3] %vm1430_vm0, %v73_v30  ;;  %v231_v44 = vadd.f32 %v199_v33, %v135_v15  ;;  %102 = vst.msk [vmem:[%s3616_s21] sm:$0x3] %vm1430_vm0, %v101_v38  ;;  %v232_v51 = vadd.f32 %v200_v40, %v136_v39  ;;  %v203_v54 = vmul.f32 %v171_v42, %v1443_v10 }
  0x19   :  { %v91_v14 = vld [vmem:[%s3645_s27] sm:$0x3]  ;;  %v86_v18 = vmul.f32 %v85_v12, %v1418_v2  ;;  %84 = vst [vmem:[%s3613_s18] sm:$0x1] %v83_v31  ;;  %v233_v58 = vadd.f32 %v201_v46, %v137_v45  ;;  %v204_v60 = vmul.f32 %v172_v48, %v1443_v10  ;;  %v176_v0 = vld [vmem:[%s3642_s0 + $0x48] sm:$0xff]  ;;  %v234_v1 = vadd.f32 %v202_v52, %v138_v47  ;;  %v177_v7 = vld [vmem:[%s3642_s0 + $0x50] sm:$0xff] }
  0x1a   :  { %v92_v23 = vmul.f32 %v91_v14, %v1418_v2  ;;  %263 = vst [vmem:[%s3617_s22] sm:$0xff] %v231_v44  ;;  %v175_v62 = vld [vmem:[%s3642_s0 + $0x40] sm:$0xff]  ;;  %v235_v3 = vadd.f32 %v203_v54, %v139_v53  ;;  %v205_v4 = vmul.f32 %v173_v50, %v1443_v10  ;;  %v142_v5 = vmul.f32 %v110_v55, %v1418_v2  ;;  %v178_v14 = vld [vmem:[%s3642_s0 + $0x58] sm:$0xff]  ;;  %v180_v22 = vld [vmem:[%s3642_s0 + $0x68] sm:$0xff] }
  0x1b   :  { %v89_v32 = vadd.f32 %v88_v19, %v86_v18  ;;  %v236_v9 = vadd.f32 %v204_v60, %v140_v59  ;;  %v206_v11 = vmul.f32 %v174_v56, %v1443_v10  ;;  %v143_v12 = vmul.f32 %v111_v57, %v1418_v2  ;;  %v179_v16 = vld [vmem:[%s3642_s0 + $0x60] sm:$0xff]  ;;  %v181_v28 = vld [vmem:[%s3642_s0 + $0x70] sm:$0xff]  ;;  %v182_v34 = vld [vmem:[%s3642_s0 + $0x78] sm:$0xff] }
  0x1c   :  { %v95_v37 = vadd.f32 %v94_v24, %v92_v23  ;;  %v207_v13 = vmul.f32 %v175_v62, %v1443_v10  ;;  %v237_v17 = vadd.f32 %v205_v4, %v141_v61  ;;  %v208_v19 = vmul.f32 %v176_v0, %v1443_v10  ;;  %v183_v36 = vld [vmem:[%s3642_s0 + $0x80] sm:$0xff]  ;;  %v184_v42 = vld [vmem:[%s3642_s0 + $0x88] sm:$0xff]  ;;  %v185_v48 = vld [vmem:[%s3642_s0 + $0x90] sm:$0xff] }
  0x1d   :  { %90 = vst [vmem:[%s3614_s19] sm:$0x1] %v89_v32  ;;  %v238_v24 = vadd.f32 %v206_v11, %v142_v5  ;;  %v209_v26 = vmul.f32 %v177_v7, %v1443_v10  ;;  %v210_v31 = vmul.f32 %v178_v14, %v1443_v10  ;;  %v211_v33 = vmul.f32 %v179_v16, %v1443_v10  ;;  %v186_v54 = vld [vmem:[%s3642_s0 + $0x98] sm:$0xff]  ;;  %v187_v56 = vld [vmem:[%s3642_s0 + $0xa0] sm:$0xff]  ;;  %v188_v62 = vld [vmem:[%s3642_s0 + $0xa8] sm:$0xff] }
  0x1e   :  { %96 = vst.msk [vmem:[%s3615_s20] sm:$0x3] %vm1430_vm0, %v95_v37  ;;  %v239_v25 = vadd.f32 %v207_v13, %v143_v12  ;;  %v212_v39 = vmul.f32 %v180_v22, %v1443_v10  ;;  %v213_v46 = vmul.f32 %v181_v28, %v1443_v10  ;;  %v215_v53 = vmul.f32 %v183_v36, %v1443_v10  ;;  %v189_v5 = vld [vmem:[%s3642_s0 + $0xb0] sm:$0xff]  ;;  %v190_v12 = vld [vmem:[%s3642_s0 + $0xb8] sm:$0xff]  ;;  %v191_v14 = vld [vmem:[%s3642_s0 + $0xc0] sm:$0xff] }
  0x1f   :  { %v216_v59 = vmul.f32 %v184_v42, %v1443_v10  ;;  %v219_v11 = vmul.f32 %v187_v56, %v1443_v10 }
  0x21   :  { %v112_v63 = vld [vmem:[%s3608_s14 + $0x48] sm:$0xff] }
  0x22   :  { %264 = vst [vmem:[%s3617_s22 + $0x8] sm:$0xff] %v232_v51  ;;  %v144_v18 = vmul.f32 %v112_v63, %v1418_v2  ;;  %v214_v51 = vmul.f32 %v182_v34, %v1443_v10  ;;  %v195_v34 = vld [vmem:[%s3642_s0 + $0xe0] sm:$0xff] }
  0x24   :  { %v240_v30 = vadd.f32 %v208_v19, %v144_v18 }
  0x29   :  { %v113_v6 = vld [vmem:[%s3608_s14 + $0x50] sm:$0xff]  ;;  %v114_v8 = vld [vmem:[%s3608_s14 + $0x58] sm:$0xff] }
  0x2a   :  { %265 = vst [vmem:[%s3617_s22 + $0x10] sm:$0xff] %v233_v58  ;;  %v145_v20 = vmul.f32 %v113_v6, %v1418_v2  ;;  %v146_v27 = vmul.f32 %v114_v8, %v1418_v2  ;;  %v218_v8 = vmul.f32 %v186_v54, %v1443_v10  ;;  %v359_v54 = vld [vmem:[%s3618_s7] sm:$0xff] }
  0x2c   :  { %v241_v37 = vadd.f32 %v209_v26, %v145_v20  ;;  %v242_v44 = vadd.f32 %v210_v31, %v146_v27  ;;  %v192_v20 = vld [vmem:[%s3642_s0 + $0xc8] sm:$0xff]  ;;  %v193_v26 = vld [vmem:[%s3642_s0 + $0xd0] sm:$0xff]  ;;  %v223_v31 = vmul.f32 %v191_v14, %v1443_v10 }
  0x31   :  { %v115_v15 = vld [vmem:[%s3608_s14 + $0x60] sm:$0xff] }
  0x32   :  { %266 = vst [vmem:[%s3617_s22 + $0x18] sm:$0xff] %v234_v1  ;;  %267 = vst [vmem:[%s3617_s22 + $0x20] sm:$0xff] %v235_v3  ;;  %v147_v32 = vmul.f32 %v115_v15, %v1418_v2  ;;  %v217_v3 = vmul.f32 %v185_v48, %v1443_v10 }
  0x34   :  { %v243_v45 = vadd.f32 %v211_v33, %v147_v32  ;;  %v194_v32 = vld [vmem:[%s3642_s0 + $0xd8] sm:$0xff] }
  0x39   :  { %v116_v21 = vld [vmem:[%s3608_s14 + $0x68] sm:$0xff]  ;;  %v117_v23 = vld [vmem:[%s3608_s14 + $0x70] sm:$0xff] }
  0x3a   :  { %268 = vst [vmem:[%s3617_s22 + $0x28] sm:$0xff] %v236_v9  ;;  %v148_v38 = vmul.f32 %v116_v21, %v1418_v2  ;;  %v149_v40 = vmul.f32 %v117_v23, %v1418_v2 }
  0x3c   :  { %v244_v50 = vadd.f32 %v212_v39, %v148_v38  ;;  %v245_v57 = vadd.f32 %v213_v46, %v149_v40  ;;  %v196_v40 = vld [vmem:[%s3642_s0 + $0xe8] sm:$0xff]  ;;  %v197_v46 = vld [vmem:[%s3642_s0 + $0xf0] sm:$0xff] }
  0x41   :  { %v118_v29 = vld [vmem:[%s3608_s14 + $0x78] sm:$0xff] }
  0x42   :  { %269 = vst [vmem:[%s3617_s22 + $0x30] sm:$0xff] %v237_v17  ;;  %v150_v47 = vmul.f32 %v118_v29, %v1418_v2  ;;  %v220_v17 = vmul.f32 %v188_v62, %v1443_v10  ;;  %v222_v29 = vmul.f32 %v190_v12, %v1443_v10  ;;  %v363_v12 = vld [vmem:[%s3618_s7 + $0x20] sm:$0xff] }
  0x44   :  { %v246_v0 = vadd.f32 %v214_v51, %v150_v47  ;;  %v227_v51 = vmul.f32 %v195_v34, %v1443_v10 }
  0x49   :  { %v119_v35 = vld [vmem:[%s3608_s14 + $0x80] sm:$0xff] }
  0x4a   :  { %270 = vst [vmem:[%s3617_s22 + $0x38] sm:$0xff] %v238_v24  ;;  %271 = vst [vmem:[%s3617_s22 + $0x40] sm:$0xff] %v239_v25  ;;  %v151_v52 = vmul.f32 %v119_v35, %v1418_v2  ;;  %v221_v24 = vmul.f32 %v189_v5, %v1443_v10 }
  0x4c   :  { %v247_v1 = vadd.f32 %v215_v53, %v151_v52  ;;  %v198_v52 = vld [vmem:[%s3642_s0 + $0xf8] sm:$0xff]  ;;  %v295_v53 = vld [vmem:[%s3619_s15] sm:$0xff] }
  0x51   :  { %v120_v41 = vld [vmem:[%s3608_s14 + $0x88] sm:$0xff]  ;;  %v121_v43 = vld [vmem:[%s3608_s14 + $0x90] sm:$0xff] }
  0x52   :  { %272 = vst [vmem:[%s3617_s22 + $0x48] sm:$0xff] %v240_v30  ;;  %v152_v58 = vmul.f32 %v120_v41, %v1418_v2  ;;  %v153_v60 = vmul.f32 %v121_v43, %v1418_v2 }
  0x54   :  { %v248_v7 = vadd.f32 %v216_v59, %v152_v58  ;;  %v249_v15 = vadd.f32 %v217_v3, %v153_v60  ;;  %v296_v59 = vld [vmem:[%s3619_s15 + $0x8] sm:$0xff]  ;;  %v361_v3 = vld [vmem:[%s3618_s7 + $0x10] sm:$0xff] }
  0x55   :  { %v360_v60 = vld [vmem:[%s3618_s7 + $0x8] sm:$0xff]  ;;  %v328_v14 = vmul.f32 %v296_v59, %v1418_v2 }
  0x59   :  { %v122_v49 = vld [vmem:[%s3608_s14 + $0x98] sm:$0xff] }
  0x5a   :  { %273 = vst [vmem:[%s3617_s22 + $0x50] sm:$0xff] %v241_v37  ;;  %v154_v4 = vmul.f32 %v122_v49, %v1418_v2  ;;  %v224_v37 = vmul.f32 %v192_v20, %v1443_v10  ;;  %v226_v49 = vmul.f32 %v194_v32, %v1443_v10  ;;  %v367_v32 = vld [vmem:[%s3618_s7 + $0x40] sm:$0xff] }
  0x5c   :  { %v250_v22 = vadd.f32 %v218_v8, %v154_v4  ;;  %v298_v4 = vld [vmem:[%s3619_s15 + $0x18] sm:$0xff]  ;;  %v391_v8 = vmul.f32 %v359_v54, %v1443_v10 }
  0x61   :  { %v123_v55 = vld [vmem:[%s3608_s14 + $0xa0] sm:$0xff] }
  0x62   :  { %274 = vst [vmem:[%s3617_s22 + $0x58] sm:$0xff] %v242_v44  ;;  %275 = vst [vmem:[%s3617_s22 + $0x60] sm:$0xff] %v243_v45  ;;  %v155_v9 = vmul.f32 %v123_v55, %v1418_v2  ;;  %v225_v44 = vmul.f32 %v193_v26, %v1443_v10 }
  0x64   :  { %v251_v23 = vadd.f32 %v219_v11, %v155_v9  ;;  %v362_v9 = vld [vmem:[%s3618_s7 + $0x18] sm:$0xff]  ;;  %v299_v11 = vld [vmem:[%s3619_s15 + $0x20] sm:$0xff] }
  0x69   :  { %v124_v61 = vld [vmem:[%s3608_s14 + $0xa8] sm:$0xff]  ;;  %v125_v63 = vld [vmem:[%s3608_s14 + $0xb0] sm:$0xff] }
  0x6a   :  { %276 = vst [vmem:[%s3617_s22 + $0x68] sm:$0xff] %v244_v50  ;;  %v156_v16 = vmul.f32 %v124_v61, %v1418_v2  ;;  %v157_v18 = vmul.f32 %v125_v63, %v1418_v2  ;;  %v297_v61 = vld [vmem:[%s3619_s15 + $0x10] sm:$0xff] }
  0x6c   :  { %v252_v28 = vadd.f32 %v220_v17, %v156_v16  ;;  %v253_v35 = vadd.f32 %v221_v24, %v157_v18  ;;  %v329_v16 = vmul.f32 %v297_v61, %v1418_v2  ;;  %v300_v17 = vld [vmem:[%s3619_s15 + $0x28] sm:$0xff]  ;;  %v365_v24 = vld [vmem:[%s3618_s7 + $0x30] sm:$0xff] }
  0x6d   :  { %v364_v18 = vld [vmem:[%s3618_s7 + $0x28] sm:$0xff]  ;;  %v332_v34 = vmul.f32 %v300_v17, %v1418_v2 }
  0x71   :  { %v126_v6 = vld [vmem:[%s3608_s14 + $0xb8] sm:$0xff] }
  0x72   :  { %277 = vst [vmem:[%s3617_s22 + $0x70] sm:$0xff] %v245_v57  ;;  %v158_v25 = vmul.f32 %v126_v6, %v1418_v2  ;;  %v228_v57 = vmul.f32 %v196_v40, %v1443_v10  ;;  %v230_v6 = vmul.f32 %v198_v52, %v1443_v10  ;;  %v371_v52 = vld [vmem:[%s3618_s7 + $0x60] sm:$0xff] }
  0x74   :  { %v254_v42 = vadd.f32 %v222_v29, %v158_v25  ;;  %v302_v25 = vld [vmem:[%s3619_s15 + $0x38] sm:$0xff]  ;;  %v395_v29 = vmul.f32 %v363_v12, %v1443_v10 }
  0x79   :  { %v127_v13 = vld [vmem:[%s3608_s14 + $0xc0] sm:$0xff] }
  0x7a   :  { %278 = vst [vmem:[%s3617_s22 + $0x78] sm:$0xff] %v246_v0  ;;  %279 = vst [vmem:[%s3617_s22 + $0x80] sm:$0xff] %v247_v1  ;;  %v159_v30 = vmul.f32 %v127_v13, %v1418_v2  ;;  %v229_v0 = vmul.f32 %v197_v46, %v1443_v10 }
  0x7c   :  { %v255_v43 = vadd.f32 %v223_v31, %v159_v30  ;;  %v366_v30 = vld [vmem:[%s3618_s7 + $0x38] sm:$0xff]  ;;  %v303_v31 = vld [vmem:[%s3619_s15 + $0x40] sm:$0xff] }
  0x81   :  { %v128_v19 = vld [vmem:[%s3608_s14 + $0xc8] sm:$0xff]  ;;  %v129_v21 = vld [vmem:[%s3608_s14 + $0xd0] sm:$0xff] }
  0x82   :  { %280 = vst [vmem:[%s3617_s22 + $0x88] sm:$0xff] %v248_v7  ;;  %v160_v36 = vmul.f32 %v128_v19, %v1418_v2  ;;  %v161_v38 = vmul.f32 %v129_v21, %v1418_v2  ;;  %v327_v7 = vmul.f32 %v295_v53, %v1418_v2  ;;  %v301_v19 = vld [vmem:[%s3619_s15 + $0x30] sm:$0xff] }
  0x84   :  { %v256_v48 = vadd.f32 %v224_v37, %v160_v36  ;;  %v257_v55 = vadd.f32 %v225_v44, %v161_v38  ;;  %v423_v21 = vadd.f32 %v391_v8, %v327_v7  ;;  %v333_v36 = vmul.f32 %v301_v19, %v1418_v2  ;;  %v368_v38 = vld [vmem:[%s3618_s7 + $0x48] sm:$0xff]  ;;  %v369_v44 = vld [vmem:[%s3618_s7 + $0x50] sm:$0xff]  ;;  %v374_v7 = vld [vmem:[%s3618_s7 + $0x78] sm:$0xff] }
  0x86   :  { %455 = vst [vmem:[%s3620_s23] sm:$0xff] %v423_v21 }
  0x89   :  { %v130_v27 = vld [vmem:[%s3608_s14 + $0xd8] sm:$0xff] }
  0x8a   :  { %281 = vst [vmem:[%s3617_s22 + $0x90] sm:$0xff] %v249_v15  ;;  %v162_v45 = vmul.f32 %v130_v27, %v1418_v2  ;;  %v392_v15 = vmul.f32 %v360_v60, %v1443_v10  ;;  %v394_v27 = vmul.f32 %v362_v9, %v1443_v10  ;;  %v375_v9 = vld [vmem:[%s3618_s7 + $0x80] sm:$0xff] }
  0x8c   :  { %v258_v62 = vadd.f32 %v226_v49, %v162_v45  ;;  %v424_v26 = vadd.f32 %v392_v15, %v328_v14  ;;  %v399_v49 = vmul.f32 %v367_v32, %v1443_v10 }
  0x8d   :  { %v304_v37 = vld [vmem:[%s3619_s15 + $0x48] sm:$0xff] }
  0x8e   :  { %v336_v54 = vmul.f32 %v304_v37, %v1418_v2 }
  0x91   :  { %v131_v33 = vld [vmem:[%s3608_s14 + $0xe0] sm:$0xff] }
  0x92   :  { %282 = vst [vmem:[%s3617_s22 + $0x98] sm:$0xff] %v250_v22  ;;  %283 = vst [vmem:[%s3617_s22 + $0xa0] sm:$0xff] %v251_v23  ;;  %v163_v50 = vmul.f32 %v131_v33, %v1418_v2  ;;  %v393_v22 = vmul.f32 %v361_v3, %v1443_v10  ;;  %v330_v23 = vmul.f32 %v298_v4, %v1418_v2 }
  0x94   :  { %v259_v63 = vadd.f32 %v227_v51, %v163_v50  ;;  %v425_v33 = vadd.f32 %v393_v22, %v329_v16  ;;  %v426_v40 = vadd.f32 %v394_v27, %v330_v23  ;;  %v370_v50 = vld [vmem:[%s3618_s7 + $0x58] sm:$0xff]  ;;  %v376_v16 = vld [vmem:[%s3618_s7 + $0x88] sm:$0xff]  ;;  %v377_v22 = vld [vmem:[%s3618_s7 + $0x90] sm:$0xff]  ;;  %v407_v27 = vmul.f32 %v375_v9, %v1443_v10 }
  0x95   :  { %v402_v4 = vmul.f32 %v370_v50, %v1443_v10  ;;  %v383_v50 = vld [vmem:[%s3618_s7 + $0xc0] sm:$0xff] }
  0x99   :  { %v132_v39 = vld [vmem:[%s3608_s14 + $0xe8] sm:$0xff]  ;;  %v133_v41 = vld [vmem:[%s3608_s14 + $0xf0] sm:$0xff] }
  0x9a   :  { %284 = vst [vmem:[%s3617_s22 + $0xa8] sm:$0xff] %v252_v28  ;;  %v164_v56 = vmul.f32 %v132_v39, %v1418_v2  ;;  %v165_v58 = vmul.f32 %v133_v41, %v1418_v2  ;;  %v331_v28 = vmul.f32 %v299_v11, %v1418_v2  ;;  %v305_v39 = vld [vmem:[%s3619_s15 + $0x50] sm:$0xff] }
  0x9b   :  { %456 = vst [vmem:[%s3620_s23 + $0x8] sm:$0xff] %v424_v26 }
  0x9c   :  { %v260_v5 = vadd.f32 %v228_v57, %v164_v56  ;;  %v261_v13 = vadd.f32 %v229_v0, %v165_v58  ;;  %v427_v41 = vadd.f32 %v395_v29, %v331_v28  ;;  %v337_v56 = vmul.f32 %v305_v39, %v1418_v2  ;;  %v372_v58 = vld [vmem:[%s3618_s7 + $0x68] sm:$0xff]  ;;  %v373_v0 = vld [vmem:[%s3618_s7 + $0x70] sm:$0xff]  ;;  %v378_v28 = vld [vmem:[%s3618_s7 + $0x98] sm:$0xff] }
  0xa1   :  { %v134_v47 = vld [vmem:[%s3608_s14 + $0xf8] sm:$0xff] }
  0xa2   :  { %285 = vst [vmem:[%s3617_s22 + $0xb0] sm:$0xff] %v253_v35  ;;  %286 = vst [vmem:[%s3617_s22 + $0xb8] sm:$0xff] %v254_v42  ;;  %v166_v1 = vmul.f32 %v134_v47, %v1418_v2  ;;  %v396_v35 = vmul.f32 %v364_v18, %v1443_v10  ;;  %v397_v42 = vmul.f32 %v365_v24, %v1443_v10  ;;  %v306_v45 = vld [vmem:[%s3619_s15 + $0x58] sm:$0xff] }
  0xa3   :  { %287 = vst [vmem:[%s3617_s22 + $0xc0] sm:$0xff] %v255_v43  ;;  %288 = vst [vmem:[%s3617_s22 + $0xc8] sm:$0xff] %v256_v48  ;;  %v334_v43 = vmul.f32 %v302_v25, %v1418_v2  ;;  %v398_v47 = vmul.f32 %v366_v30, %v1443_v10  ;;  %v335_v48 = vmul.f32 %v303_v31, %v1418_v2  ;;  %v379_v30 = vld [vmem:[%s3618_s7 + $0xa0] sm:$0xff] }
  0xa4   :  { %289 = vst [vmem:[%s3617_s22 + $0xd0] sm:$0xff] %v257_v55  ;;  %290 = vst [vmem:[%s3617_s22 + $0xd8] sm:$0xff] %v258_v62  ;;  %v262_v20 = vadd.f32 %v230_v6, %v166_v1  ;;  %v428_v46 = vadd.f32 %v396_v35, %v332_v34  ;;  %v429_v53 = vadd.f32 %v397_v42, %v333_v36  ;;  %v380_v36 = vld [vmem:[%s3618_s7 + $0xa8] sm:$0xff]  ;;  %v381_v42 = vld [vmem:[%s3618_s7 + $0xb0] sm:$0xff] }
  0xa5   :  { %291 = vst [vmem:[%s3617_s22 + $0xe0] sm:$0xff] %v259_v63  ;;  %292 = vst [vmem:[%s3617_s22 + $0xe8] sm:$0xff] %v260_v5  ;;  %v400_v55 = vmul.f32 %v368_v38, %v1443_v10  ;;  %v430_v60 = vadd.f32 %v398_v47, %v334_v43  ;;  %v431_v61 = vadd.f32 %v399_v49, %v335_v48  ;;  %v382_v48 = vld [vmem:[%s3618_s7 + $0xb8] sm:$0xff] }
  0xa6   :  { %293 = vst [vmem:[%s3617_s22 + $0xf0] sm:$0xff] %v261_v13  ;;  %294 = vst [vmem:[%s3617_s22 + $0xf8] sm:$0xff] %v262_v20  ;;  %v401_v62 = vmul.f32 %v369_v44, %v1443_v10  ;;  %v338_v63 = vmul.f32 %v306_v45, %v1418_v2  ;;  %v403_v6 = vmul.f32 %v371_v52, %v1443_v10 }
  0xa7   :  { %457 = vst [vmem:[%s3620_s23 + $0x10] sm:$0xff] %v425_v33  ;;  %v432_v3 = vadd.f32 %v400_v55, %v336_v54  ;;  %v404_v13 = vmul.f32 %v372_v58, %v1443_v10  ;;  %v405_v20 = vmul.f32 %v373_v0, %v1443_v10  ;;  %v406_v25 = vmul.f32 %v374_v7, %v1443_v10  ;;  %v387_v7 = vld [vmem:[%s3618_s7 + $0xe0] sm:$0xff] }
  0xa8   :  { %v433_v11 = vadd.f32 %v401_v62, %v337_v56  ;;  %v434_v18 = vadd.f32 %v402_v4, %v338_v63  ;;  %v408_v33 = vmul.f32 %v376_v16, %v1443_v10  ;;  %v410_v45 = vmul.f32 %v378_v28, %v1443_v10  ;;  %v384_v56 = vld [vmem:[%s3618_s7 + $0xc8] sm:$0xff]  ;;  %v385_v62 = vld [vmem:[%s3618_s7 + $0xd0] sm:$0xff]  ;;  %v743_v28 = vld [vmem:[%s3621_s8] sm:$0xff] }
  0xa9   :  { %v411_v47 = vmul.f32 %v379_v30, %v1443_v10  ;;  %v415_v4 = vmul.f32 %v383_v50, %v1443_v10 }
  0xae   :  { %v307_v51 = vld [vmem:[%s3619_s15 + $0x60] sm:$0xff] }
  0xaf   :  { %458 = vst [vmem:[%s3620_s23 + $0x18] sm:$0xff] %v426_v40  ;;  %459 = vst [vmem:[%s3620_s23 + $0x20] sm:$0xff] %v427_v41  ;;  %v339_v5 = vmul.f32 %v307_v51, %v1418_v2  ;;  %v409_v40 = vmul.f32 %v377_v22, %v1443_v10 }
  0xb1   :  { %v435_v19 = vadd.f32 %v403_v6, %v339_v5  ;;  %v386_v5 = vld [vmem:[%s3618_s7 + $0xd8] sm:$0xff] }
  0xb6   :  { %v308_v57 = vld [vmem:[%s3619_s15 + $0x68] sm:$0xff]  ;;  %v309_v59 = vld [vmem:[%s3619_s15 + $0x70] sm:$0xff] }
  0xb7   :  { %460 = vst [vmem:[%s3620_s23 + $0x28] sm:$0xff] %v428_v46  ;;  %v340_v12 = vmul.f32 %v308_v57, %v1418_v2  ;;  %v341_v14 = vmul.f32 %v309_v59, %v1418_v2 }
  0xb9   :  { %v436_v24 = vadd.f32 %v404_v13, %v340_v12  ;;  %v437_v31 = vadd.f32 %v405_v20, %v341_v14  ;;  %v388_v14 = vld [vmem:[%s3618_s7 + $0xe8] sm:$0xff]  ;;  %v389_v20 = vld [vmem:[%s3618_s7 + $0xf0] sm:$0xff] }
  0xbe   :  { %v310_v1 = vld [vmem:[%s3619_s15 + $0x78] sm:$0xff] }
  0xbf   :  { %461 = vst [vmem:[%s3620_s23 + $0x30] sm:$0xff] %v429_v53  ;;  %v342_v21 = vmul.f32 %v310_v1, %v1418_v2  ;;  %v412_v53 = vmul.f32 %v380_v36, %v1443_v10  ;;  %v414_v1 = vmul.f32 %v382_v48, %v1443_v10  ;;  %v747_v48 = vld [vmem:[%s3621_s8 + $0x20] sm:$0xff] }
  0xc1   :  { %v438_v38 = vadd.f32 %v406_v25, %v342_v21  ;;  %v419_v25 = vmul.f32 %v387_v7, %v1443_v10 }
  0xc6   :  { %v311_v8 = vld [vmem:[%s3619_s15 + $0x80] sm:$0xff] }
  0xc7   :  { %462 = vst [vmem:[%s3620_s23 + $0x38] sm:$0xff] %v430_v60  ;;  %463 = vst [vmem:[%s3620_s23 + $0x40] sm:$0xff] %v431_v61  ;;  %v343_v26 = vmul.f32 %v311_v8, %v1418_v2  ;;  %v413_v60 = vmul.f32 %v381_v42, %v1443_v10 }
  0xc9   :  { %v439_v39 = vadd.f32 %v407_v27, %v343_v26  ;;  %v390_v26 = vld [vmem:[%s3618_s7 + $0xf8] sm:$0xff]  ;;  %v487_v27 = vld [vmem:[%s3622_s16] sm:$0xff] }
  0xce   :  { %v312_v15 = vld [vmem:[%s3619_s15 + $0x88] sm:$0xff]  ;;  %v313_v17 = vld [vmem:[%s3619_s15 + $0x90] sm:$0xff] }
  0xcf   :  { %464 = vst [vmem:[%s3620_s23 + $0x48] sm:$0xff] %v432_v3  ;;  %v344_v32 = vmul.f32 %v312_v15, %v1418_v2  ;;  %v345_v34 = vmul.f32 %v313_v17, %v1418_v2 }
  0xd1   :  { %v440_v44 = vadd.f32 %v408_v33, %v344_v32  ;;  %v441_v51 = vadd.f32 %v409_v40, %v345_v34  ;;  %v488_v33 = vld [vmem:[%s3622_s16 + $0x8] sm:$0xff]  ;;  %v745_v40 = vld [vmem:[%s3621_s8 + $0x10] sm:$0xff] }
  0xd2   :  { %v744_v34 = vld [vmem:[%s3621_s8 + $0x8] sm:$0xff]  ;;  %v616_v50 = vmul.f32 %v488_v33, %v1418_v2 }
  0xd6   :  { %v314_v23 = vld [vmem:[%s3619_s15 + $0x98] sm:$0xff] }
  0xd7   :  { %465 = vst [vmem:[%s3620_s23 + $0x50] sm:$0xff] %v433_v11  ;;  %v346_v41 = vmul.f32 %v314_v23, %v1418_v2  ;;  %v416_v11 = vmul.f32 %v384_v56, %v1443_v10  ;;  %v418_v23 = vmul.f32 %v386_v5, %v1443_v10  ;;  %v751_v5 = vld [vmem:[%s3621_s8 + $0x40] sm:$0xff] }
  0xd9   :  { %v442_v58 = vadd.f32 %v410_v45, %v346_v41  ;;  %v490_v41 = vld [vmem:[%s3622_s16 + $0x18] sm:$0xff]  ;;  %v871_v45 = vmul.f32 %v743_v28, %v1443_v10 }
  0xde   :  { %v315_v29 = vld [vmem:[%s3619_s15 + $0xa0] sm:$0xff] }
  0xdf   :  { %466 = vst [vmem:[%s3620_s23 + $0x58] sm:$0xff] %v434_v18  ;;  %467 = vst [vmem:[%s3620_s23 + $0x60] sm:$0xff] %v435_v19  ;;  %v347_v46 = vmul.f32 %v315_v29, %v1418_v2  ;;  %v417_v18 = vmul.f32 %v385_v62, %v1443_v10 }
  0xe1   :  { %v443_v59 = vadd.f32 %v411_v47, %v347_v46  ;;  %v746_v46 = vld [vmem:[%s3621_s8 + $0x18] sm:$0xff]  ;;  %v491_v47 = vld [vmem:[%s3622_s16 + $0x20] sm:$0xff] }
  0xe6   :  { %v316_v35 = vld [vmem:[%s3619_s15 + $0xa8] sm:$0xff]  ;;  %v317_v37 = vld [vmem:[%s3619_s15 + $0xb0] sm:$0xff] }
  0xe7   :  { %468 = vst [vmem:[%s3620_s23 + $0x68] sm:$0xff] %v436_v24  ;;  %v348_v52 = vmul.f32 %v316_v35, %v1418_v2  ;;  %v349_v54 = vmul.f32 %v317_v37, %v1418_v2  ;;  %v489_v35 = vld [vmem:[%s3622_s16 + $0x10] sm:$0xff] }
  0xe9   :  { %v444_v0 = vadd.f32 %v412_v53, %v348_v52  ;;  %v445_v8 = vadd.f32 %v413_v60, %v349_v54  ;;  %v617_v52 = vmul.f32 %v489_v35, %v1418_v2  ;;  %v492_v53 = vld [vmem:[%s3622_s16 + $0x28] sm:$0xff]  ;;  %v749_v60 = vld [vmem:[%s3621_s8 + $0x30] sm:$0xff] }
  0xea   :  { %v748_v54 = vld [vmem:[%s3621_s8 + $0x28] sm:$0xff]  ;;  %v620_v7 = vmul.f32 %v492_v53, %v1418_v2 }
  0xee   :  { %v318_v43 = vld [vmem:[%s3619_s15 + $0xb8] sm:$0xff] }
  0xef   :  { %469 = vst [vmem:[%s3620_s23 + $0x70] sm:$0xff] %v437_v31  ;;  %v350_v61 = vmul.f32 %v318_v43, %v1418_v2  ;;  %v420_v31 = vmul.f32 %v388_v14, %v1443_v10  ;;  %v422_v43 = vmul.f32 %v390_v26, %v1443_v10  ;;  %v755_v26 = vld [vmem:[%s3621_s8 + $0x60] sm:$0xff] }
  0xf1   :  { %v446_v16 = vadd.f32 %v414_v1, %v350_v61  ;;  %v494_v61 = vld [vmem:[%s3622_s16 + $0x38] sm:$0xff]  ;;  %v875_v1 = vmul.f32 %v747_v48, %v1443_v10 }
  0xf6   :  { %v319_v49 = vld [vmem:[%s3619_s15 + $0xc0] sm:$0xff] }
  0xf7   :  { %470 = vst [vmem:[%s3620_s23 + $0x78] sm:$0xff] %v438_v38  ;;  %471 = vst [vmem:[%s3620_s23 + $0x80] sm:$0xff] %v439_v39  ;;  %v351_v3 = vmul.f32 %v319_v49, %v1418_v2  ;;  %v421_v38 = vmul.f32 %v389_v20, %v1443_v10 }
  0xf9   :  { %v447_v17 = vadd.f32 %v415_v4, %v351_v3  ;;  %v750_v3 = vld [vmem:[%s3621_s8 + $0x38] sm:$0xff]  ;;  %v495_v4 = vld [vmem:[%s3622_s16 + $0x40] sm:$0xff] }
  0xfe   :  { %v320_v55 = vld [vmem:[%s3619_s15 + $0xc8] sm:$0xff]  ;;  %v321_v57 = vld [vmem:[%s3619_s15 + $0xd0] sm:$0xff] }
  0xff   :  { %472 = vst [vmem:[%s3620_s23 + $0x88] sm:$0xff] %v440_v44  ;;  %v352_v9 = vmul.f32 %v320_v55, %v1418_v2  ;;  %v353_v12 = vmul.f32 %v321_v57, %v1418_v2  ;;  %v615_v44 = vmul.f32 %v487_v27, %v1418_v2  ;;  %v493_v55 = vld [vmem:[%s3622_s16 + $0x30] sm:$0xff] }
 0x101   :  { %v448_v22 = vadd.f32 %v416_v11, %v352_v9  ;;  %v449_v29 = vadd.f32 %v417_v18, %v353_v12  ;;  %v999_v57 = vadd.f32 %v871_v45, %v615_v44  ;;  %v621_v9 = vmul.f32 %v493_v55, %v1418_v2  ;;  %v752_v12 = vld [vmem:[%s3621_s8 + $0x48] sm:$0xff]  ;;  %v753_v18 = vld [vmem:[%s3621_s8 + $0x50] sm:$0xff]  ;;  %v758_v44 = vld [vmem:[%s3621_s8 + $0x78] sm:$0xff] }
 0x103   :  { %1127 = vst [vmem:[%s3623_s24] sm:$0xff] %v999_v57 }
 0x106   :  { %v322_v63 = vld [vmem:[%s3619_s15 + $0xd8] sm:$0xff] }
 0x107   :  { %473 = vst [vmem:[%s3620_s23 + $0x90] sm:$0xff] %v441_v51  ;;  %v354_v19 = vmul.f32 %v322_v63, %v1418_v2  ;;  %v872_v51 = vmul.f32 %v744_v34, %v1443_v10  ;;  %v874_v63 = vmul.f32 %v746_v46, %v1443_v10  ;;  %v759_v46 = vld [vmem:[%s3621_s8 + $0x80] sm:$0xff] }
 0x109   :  { %v450_v36 = vadd.f32 %v418_v23, %v354_v19  ;;  %v1000_v62 = vadd.f32 %v872_v51, %v616_v50  ;;  %v879_v23 = vmul.f32 %v751_v5, %v1443_v10 }
 0x10a   :  { %v496_v11 = vld [vmem:[%s3622_s16 + $0x48] sm:$0xff] }
 0x10b   :  { %v624_v28 = vmul.f32 %v496_v11, %v1418_v2 }
 0x10e   :  { %v323_v6 = vld [vmem:[%s3619_s15 + $0xe0] sm:$0xff] }
 0x10f   :  { %474 = vst [vmem:[%s3620_s23 + $0x98] sm:$0xff] %v442_v58  ;;  %475 = vst [vmem:[%s3620_s23 + $0xa0] sm:$0xff] %v443_v59  ;;  %v355_v24 = vmul.f32 %v323_v6, %v1418_v2  ;;  %v873_v58 = vmul.f32 %v745_v40, %v1443_v10  ;;  %v618_v59 = vmul.f32 %v490_v41, %v1418_v2 }
 0x111   :  { %v451_v37 = vadd.f32 %v419_v25, %v355_v24  ;;  %v1001_v6 = vadd.f32 %v873_v58, %v617_v52  ;;  %v1002_v14 = vadd.f32 %v874_v63, %v618_v59  ;;  %v754_v24 = vld [vmem:[%s3621_s8 + $0x58] sm:$0xff]  ;;  %v760_v52 = vld [vmem:[%s3621_s8 + $0x88] sm:$0xff]  ;;  %v761_v58 = vld [vmem:[%s3621_s8 + $0x90] sm:$0xff]  ;;  %v887_v63 = vmul.f32 %v759_v46, %v1443_v10 }
 0x112   :  { %v882_v41 = vmul.f32 %v754_v24, %v1443_v10  ;;  %v767_v24 = vld [vmem:[%s3621_s8 + $0xc0] sm:$0xff] }
 0x116   :  { %v324_v13 = vld [vmem:[%s3619_s15 + $0xe8] sm:$0xff]  ;;  %v325_v15 = vld [vmem:[%s3619_s15 + $0xf0] sm:$0xff] }
 0x117   :  { %476 = vst [vmem:[%s3620_s23 + $0xa8] sm:$0xff] %v444_v0  ;;  %v356_v30 = vmul.f32 %v324_v13, %v1418_v2  ;;  %v357_v32 = vmul.f32 %v325_v15, %v1418_v2  ;;  %v619_v0 = vmul.f32 %v491_v47, %v1418_v2  ;;  %v497_v13 = vld [vmem:[%s3622_s16 + $0x50] sm:$0xff] }
 0x118   :  { %1128 = vst [vmem:[%s3623_s24 + $0x8] sm:$0xff] %v1000_v62 }
 0x119   :  { %v452_v42 = vadd.f32 %v420_v31, %v356_v30  ;;  %v453_v49 = vadd.f32 %v421_v38, %v357_v32  ;;  %v1003_v15 = vadd.f32 %v875_v1, %v619_v0  ;;  %v625_v30 = vmul.f32 %v497_v13, %v1418_v2  ;;  %v756_v32 = vld [vmem:[%s3621_s8 + $0x68] sm:$0xff]  ;;  %v757_v38 = vld [vmem:[%s3621_s8 + $0x70] sm:$0xff]  ;;  %v762_v0 = vld [vmem:[%s3621_s8 + $0x98] sm:$0xff] }
 0x11e   :  { %v326_v21 = vld [vmem:[%s3619_s15 + $0xf8] sm:$0xff] }
 0x11f   :  { %477 = vst [vmem:[%s3620_s23 + $0xb0] sm:$0xff] %v445_v8  ;;  %478 = vst [vmem:[%s3620_s23 + $0xb8] sm:$0xff] %v446_v16  ;;  %v358_v39 = vmul.f32 %v326_v21, %v1418_v2  ;;  %v876_v8 = vmul.f32 %v748_v54, %v1443_v10  ;;  %v877_v16 = vmul.f32 %v749_v60, %v1443_v10  ;;  %v498_v19 = vld [vmem:[%s3622_s16 + $0x58] sm:$0xff] }
 0x120   :  { %479 = vst [vmem:[%s3620_s23 + $0xc0] sm:$0xff] %v447_v17  ;;  %480 = vst [vmem:[%s3620_s23 + $0xc8] sm:$0xff] %v448_v22  ;;  %v622_v17 = vmul.f32 %v494_v61, %v1418_v2  ;;  %v878_v21 = vmul.f32 %v750_v3, %v1443_v10  ;;  %v623_v22 = vmul.f32 %v495_v4, %v1418_v2  ;;  %v763_v3 = vld [vmem:[%s3621_s8 + $0xa0] sm:$0xff] }
 0x121   :  { %481 = vst [vmem:[%s3620_s23 + $0xd0] sm:$0xff] %v449_v29  ;;  %482 = vst [vmem:[%s3620_s23 + $0xd8] sm:$0xff] %v450_v36  ;;  %v454_v56 = vadd.f32 %v422_v43, %v358_v39  ;;  %v1004_v20 = vadd.f32 %v876_v8, %v620_v7  ;;  %v1005_v27 = vadd.f32 %v877_v16, %v621_v9  ;;  %v764_v9 = vld [vmem:[%s3621_s8 + $0xa8] sm:$0xff]  ;;  %v765_v16 = vld [vmem:[%s3621_s8 + $0xb0] sm:$0xff] }
 0x122   :  { %483 = vst [vmem:[%s3620_s23 + $0xe0] sm:$0xff] %v451_v37  ;;  %484 = vst [vmem:[%s3620_s23 + $0xe8] sm:$0xff] %v452_v42  ;;  %v880_v29 = vmul.f32 %v752_v12, %v1443_v10  ;;  %v1006_v34 = vadd.f32 %v878_v21, %v622_v17  ;;  %v1007_v35 = vadd.f32 %v879_v23, %v623_v22  ;;  %v766_v22 = vld [vmem:[%s3621_s8 + $0xb8] sm:$0xff] }
 0x123   :  { %485 = vst [vmem:[%s3620_s23 + $0xf0] sm:$0xff] %v453_v49  ;;  %486 = vst [vmem:[%s3620_s23 + $0xf8] sm:$0xff] %v454_v56  ;;  %v881_v36 = vmul.f32 %v753_v18, %v1443_v10  ;;  %v626_v37 = vmul.f32 %v498_v19, %v1418_v2  ;;  %v883_v43 = vmul.f32 %v755_v26, %v1443_v10 }
 0x124   :  { %1129 = vst [vmem:[%s3623_s24 + $0x10] sm:$0xff] %v1001_v6  ;;  %v1008_v40 = vadd.f32 %v880_v29, %v624_v28  ;;  %v884_v49 = vmul.f32 %v756_v32, %v1443_v10  ;;  %v885_v56 = vmul.f32 %v757_v38, %v1443_v10  ;;  %v886_v61 = vmul.f32 %v758_v44, %v1443_v10  ;;  %v771_v44 = vld [vmem:[%s3621_s8 + $0xe0] sm:$0xff] }
 0x125   :  { %v1009_v47 = vadd.f32 %v881_v36, %v625_v30  ;;  %v1010_v54 = vadd.f32 %v882_v41, %v626_v37  ;;  %v888_v6 = vmul.f32 %v760_v52, %v1443_v10  ;;  %v890_v19 = vmul.f32 %v762_v0, %v1443_v10  ;;  %v768_v30 = vld [vmem:[%s3621_s8 + $0xc8] sm:$0xff]  ;;  %v769_v36 = vld [vmem:[%s3621_s8 + $0xd0] sm:$0xff]  ;;  %v775_v0 = vld [vmem:[%s3621_s8 + $0x100] sm:$0xff] }
 0x126   :  { %v891_v21 = vmul.f32 %v763_v3, %v1443_v10  ;;  %v895_v41 = vmul.f32 %v767_v24, %v1443_v10 }
 0x12b   :  { %v499_v25 = vld [vmem:[%s3622_s16 + $0x60] sm:$0xff] }
 0x12c   :  { %1130 = vst [vmem:[%s3623_s24 + $0x18] sm:$0xff] %v1002_v14  ;;  %1131 = vst [vmem:[%s3623_s24 + $0x20] sm:$0xff] %v1003_v15  ;;  %v627_v42 = vmul.f32 %v499_v25, %v1418_v2  ;;  %v889_v14 = vmul.f32 %v761_v58, %v1443_v10 }
 0x12e   :  { %v1011_v55 = vadd.f32 %v883_v43, %v627_v42  ;;  %v770_v42 = vld [vmem:[%s3621_s8 + $0xd8] sm:$0xff] }
 0x133   :  { %v500_v31 = vld [vmem:[%s3622_s16 + $0x68] sm:$0xff]  ;;  %v501_v33 = vld [vmem:[%s3622_s16 + $0x70] sm:$0xff] }
 0x134   :  { %1132 = vst [vmem:[%s3623_s24 + $0x28] sm:$0xff] %v1004_v20  ;;  %v628_v48 = vmul.f32 %v500_v31, %v1418_v2  ;;  %v629_v50 = vmul.f32 %v501_v33, %v1418_v2 }
 0x136   :  { %v1012_v60 = vadd.f32 %v884_v49, %v628_v48  ;;  %v1013_v4 = vadd.f32 %v885_v56, %v629_v50  ;;  %v772_v50 = vld [vmem:[%s3621_s8 + $0xe8] sm:$0xff]  ;;  %v773_v56 = vld [vmem:[%s3621_s8 + $0xf0] sm:$0xff] }
 0x13b   :  { %v502_v39 = vld [vmem:[%s3622_s16 + $0x78] sm:$0xff] }
 0x13c   :  { %1133 = vst [vmem:[%s3623_s24 + $0x30] sm:$0xff] %v1005_v27  ;;  %v630_v57 = vmul.f32 %v502_v39, %v1418_v2  ;;  %v892_v27 = vmul.f32 %v764_v9, %v1443_v10  ;;  %v894_v39 = vmul.f32 %v766_v22, %v1443_v10  ;;  %v779_v22 = vld [vmem:[%s3621_s8 + $0x120] sm:$0xff] }
 0x13e   :  { %v1014_v12 = vadd.f32 %v886_v61, %v630_v57  ;;  %v899_v61 = vmul.f32 %v771_v44, %v1443_v10 }
 0x143   :  { %v503_v45 = vld [vmem:[%s3622_s16 + $0x80] sm:$0xff] }
 0x144   :  { %1134 = vst [vmem:[%s3623_s24 + $0x38] sm:$0xff] %v1006_v34  ;;  %1135 = vst [vmem:[%s3623_s24 + $0x40] sm:$0xff] %v1007_v35  ;;  %v631_v62 = vmul.f32 %v503_v45, %v1418_v2  ;;  %v893_v34 = vmul.f32 %v765_v16, %v1443_v10 }
 0x146   :  { %v1015_v13 = vadd.f32 %v887_v63, %v631_v62  ;;  %v774_v62 = vld [vmem:[%s3621_s8 + $0xf8] sm:$0xff] }
 0x14b   :  { %v504_v51 = vld [vmem:[%s3622_s16 + $0x88] sm:$0xff]  ;;  %v505_v53 = vld [vmem:[%s3622_s16 + $0x90] sm:$0xff] }
 0x14c   :  { %1136 = vst [vmem:[%s3623_s24 + $0x48] sm:$0xff] %v1008_v40  ;;  %v632_v5 = vmul.f32 %v504_v51, %v1418_v2  ;;  %v633_v7 = vmul.f32 %v505_v53, %v1418_v2 }
 0x14e   :  { %v1016_v18 = vadd.f32 %v888_v6, %v632_v5  ;;  %v1017_v25 = vadd.f32 %v889_v14, %v633_v7  ;;  %v776_v7 = vld [vmem:[%s3621_s8 + $0x108] sm:$0xff]  ;;  %v777_v14 = vld [vmem:[%s3621_s8 + $0x110] sm:$0xff] }
 0x153   :  { %v506_v59 = vld [vmem:[%s3622_s16 + $0x98] sm:$0xff] }
 0x154   :  { %1137 = vst [vmem:[%s3623_s24 + $0x50] sm:$0xff] %v1009_v47  ;;  %v634_v15 = vmul.f32 %v506_v59, %v1418_v2  ;;  %v896_v47 = vmul.f32 %v768_v30, %v1443_v10  ;;  %v898_v59 = vmul.f32 %v770_v42, %v1443_v10  ;;  %v783_v42 = vld [vmem:[%s3621_s8 + $0x140] sm:$0xff] }
 0x156   :  { %v1018_v32 = vadd.f32 %v890_v19, %v634_v15  ;;  %v903_v19 = vmul.f32 %v775_v0, %v1443_v10 }
 0x15b   :  { %v507_v1 = vld [vmem:[%s3622_s16 + $0xa0] sm:$0xff] }
 0x15c   :  { %1138 = vst [vmem:[%s3623_s24 + $0x58] sm:$0xff] %v1010_v54  ;;  %1139 = vst [vmem:[%s3623_s24 + $0x60] sm:$0xff] %v1011_v55  ;;  %v635_v20 = vmul.f32 %v507_v1, %v1418_v2  ;;  %v897_v54 = vmul.f32 %v769_v36, %v1443_v10 }
 0x15e   :  { %v1019_v33 = vadd.f32 %v891_v21, %v635_v20  ;;  %v778_v20 = vld [vmem:[%s3621_s8 + $0x118] sm:$0xff] }
 0x163   :  { %v508_v8 = vld [vmem:[%s3622_s16 + $0xa8] sm:$0xff]  ;;  %v509_v11 = vld [vmem:[%s3622_s16 + $0xb0] sm:$0xff] }
 0x164   :  { %1140 = vst [vmem:[%s3623_s24 + $0x68] sm:$0xff] %v1012_v60  ;;  %v636_v26 = vmul.f32 %v508_v8, %v1418_v2  ;;  %v637_v28 = vmul.f32 %v509_v11, %v1418_v2 }
 0x166   :  { %v1020_v38 = vadd.f32 %v892_v27, %v636_v26  ;;  %v1021_v45 = vadd.f32 %v893_v34, %v637_v28  ;;  %v780_v28 = vld [vmem:[%s3621_s8 + $0x128] sm:$0xff]  ;;  %v781_v34 = vld [vmem:[%s3621_s8 + $0x130] sm:$0xff] }
 0x16b   :  { %v510_v17 = vld [vmem:[%s3622_s16 + $0xb8] sm:$0xff] }
 0x16c   :  { %1141 = vst [vmem:[%s3623_s24 + $0x70] sm:$0xff] %v1013_v4  ;;  %v638_v35 = vmul.f32 %v510_v17, %v1418_v2  ;;  %v900_v4 = vmul.f32 %v772_v50, %v1443_v10  ;;  %v902_v17 = vmul.f32 %v774_v62, %v1443_v10  ;;  %v787_v62 = vld [vmem:[%s3621_s8 + $0x160] sm:$0xff] }
 0x16e   :  { %v1022_v52 = vadd.f32 %v894_v39, %v638_v35  ;;  %v907_v39 = vmul.f32 %v779_v22, %v1443_v10 }
 0x173   :  { %v511_v23 = vld [vmem:[%s3622_s16 + $0xc0] sm:$0xff] }
 0x174   :  { %1142 = vst [vmem:[%s3623_s24 + $0x78] sm:$0xff] %v1014_v12  ;;  %1143 = vst [vmem:[%s3623_s24 + $0x80] sm:$0xff] %v1015_v13  ;;  %v639_v40 = vmul.f32 %v511_v23, %v1418_v2  ;;  %v901_v12 = vmul.f32 %v773_v56, %v1443_v10 }
 0x176   :  { %v1023_v53 = vadd.f32 %v895_v41, %v639_v40  ;;  %v782_v40 = vld [vmem:[%s3621_s8 + $0x138] sm:$0xff] }
 0x17b   :  { %v512_v29 = vld [vmem:[%s3622_s16 + $0xc8] sm:$0xff]  ;;  %v513_v31 = vld [vmem:[%s3622_s16 + $0xd0] sm:$0xff] }
 0x17c   :  { %1144 = vst [vmem:[%s3623_s24 + $0x88] sm:$0xff] %v1016_v18  ;;  %v640_v46 = vmul.f32 %v512_v29, %v1418_v2  ;;  %v641_v48 = vmul.f32 %v513_v31, %v1418_v2 }
 0x17e   :  { %v1024_v58 = vadd.f32 %v896_v47, %v640_v46  ;;  %v1025_v1 = vadd.f32 %v897_v54, %v641_v48  ;;  %v784_v48 = vld [vmem:[%s3621_s8 + $0x148] sm:$0xff]  ;;  %v785_v54 = vld [vmem:[%s3621_s8 + $0x150] sm:$0xff] }
 0x183   :  { %v514_v37 = vld [vmem:[%s3622_s16 + $0xd8] sm:$0xff] }
 0x184   :  { %1145 = vst [vmem:[%s3623_s24 + $0x90] sm:$0xff] %v1017_v25  ;;  %v642_v55 = vmul.f32 %v514_v37, %v1418_v2  ;;  %v904_v25 = vmul.f32 %v776_v7, %v1443_v10  ;;  %v906_v37 = vmul.f32 %v778_v20, %v1443_v10  ;;  %v791_v20 = vld [vmem:[%s3621_s8 + $0x180] sm:$0xff] }
 0x186   :  { %v1026_v9 = vadd.f32 %v898_v59, %v642_v55  ;;  %v911_v59 = vmul.f32 %v783_v42, %v1443_v10 }
 0x18b   :  { %v515_v43 = vld [vmem:[%s3622_s16 + $0xe0] sm:$0xff] }
 0x18c   :  { %1146 = vst [vmem:[%s3623_s24 + $0x98] sm:$0xff] %v1018_v32  ;;  %1147 = vst [vmem:[%s3623_s24 + $0xa0] sm:$0xff] %v1019_v33  ;;  %v643_v60 = vmul.f32 %v515_v43, %v1418_v2  ;;  %v905_v32 = vmul.f32 %v777_v14, %v1443_v10 }
 0x18e   :  { %v1027_v11 = vadd.f32 %v899_v61, %v643_v60  ;;  %v786_v60 = vld [vmem:[%s3621_s8 + $0x158] sm:$0xff] }
 0x193   :  { %v516_v49 = vld [vmem:[%s3622_s16 + $0xe8] sm:$0xff]  ;;  %v517_v51 = vld [vmem:[%s3622_s16 + $0xf0] sm:$0xff] }
 0x194   :  { %1148 = vst [vmem:[%s3623_s24 + $0xa8] sm:$0xff] %v1020_v38  ;;  %v644_v3 = vmul.f32 %v516_v49, %v1418_v2  ;;  %v645_v5 = vmul.f32 %v517_v51, %v1418_v2 }
 0x196   :  { %v1028_v16 = vadd.f32 %v900_v4, %v644_v3  ;;  %v1029_v23 = vadd.f32 %v901_v12, %v645_v5  ;;  %v788_v5 = vld [vmem:[%s3621_s8 + $0x168] sm:$0xff]  ;;  %v789_v12 = vld [vmem:[%s3621_s8 + $0x170] sm:$0xff] }
 0x19b   :  { %v518_v57 = vld [vmem:[%s3622_s16 + $0xf8] sm:$0xff] }
 0x19c   :  { %1149 = vst [vmem:[%s3623_s24 + $0xb0] sm:$0xff] %v1021_v45  ;;  %v646_v13 = vmul.f32 %v518_v57, %v1418_v2  ;;  %v908_v45 = vmul.f32 %v780_v28, %v1443_v10  ;;  %v910_v57 = vmul.f32 %v782_v40, %v1443_v10  ;;  %v795_v40 = vld [vmem:[%s3621_s8 + $0x1a0] sm:$0xff] }
 0x19e   :  { %v1030_v30 = vadd.f32 %v902_v17, %v646_v13  ;;  %v915_v17 = vmul.f32 %v787_v62, %v1443_v10 }
 0x1a3   :  { %v519_v63 = vld [vmem:[%s3622_s16 + $0x100] sm:$0xff] }
 0x1a4   :  { %1150 = vst [vmem:[%s3623_s24 + $0xb8] sm:$0xff] %v1022_v52  ;;  %1151 = vst [vmem:[%s3623_s24 + $0xc0] sm:$0xff] %v1023_v53  ;;  %v647_v18 = vmul.f32 %v519_v63, %v1418_v2  ;;  %v909_v52 = vmul.f32 %v781_v34, %v1443_v10 }
 0x1a6   :  { %v1031_v31 = vadd.f32 %v903_v19, %v647_v18  ;;  %v790_v18 = vld [vmem:[%s3621_s8 + $0x178] sm:$0xff] }
 0x1ab   :  { %v520_v6 = vld [vmem:[%s3622_s16 + $0x108] sm:$0xff]  ;;  %v521_v8 = vld [vmem:[%s3622_s16 + $0x110] sm:$0xff] }
 0x1ac   :  { %1152 = vst [vmem:[%s3623_s24 + $0xc8] sm:$0xff] %v1024_v58  ;;  %v648_v24 = vmul.f32 %v520_v6, %v1418_v2  ;;  %v649_v26 = vmul.f32 %v521_v8, %v1418_v2 }
 0x1ae   :  { %v1032_v36 = vadd.f32 %v904_v25, %v648_v24  ;;  %v1033_v43 = vadd.f32 %v905_v32, %v649_v26  ;;  %v792_v26 = vld [vmem:[%s3621_s8 + $0x188] sm:$0xff]  ;;  %v793_v32 = vld [vmem:[%s3621_s8 + $0x190] sm:$0xff] }
 0x1b3   :  { %v522_v15 = vld [vmem:[%s3622_s16 + $0x118] sm:$0xff] }
 0x1b4   :  { %1153 = vst [vmem:[%s3623_s24 + $0xd0] sm:$0xff] %v1025_v1  ;;  %v650_v33 = vmul.f32 %v522_v15, %v1418_v2  ;;  %v912_v1 = vmul.f32 %v784_v48, %v1443_v10  ;;  %v914_v15 = vmul.f32 %v786_v60, %v1443_v10  ;;  %v799_v60 = vld [vmem:[%s3621_s8 + $0x1c0] sm:$0xff] }
 0x1b6   :  { %v1034_v50 = vadd.f32 %v906_v37, %v650_v33  ;;  %v919_v37 = vmul.f32 %v791_v20, %v1443_v10 }
 0x1bb   :  { %v523_v21 = vld [vmem:[%s3622_s16 + $0x120] sm:$0xff] }
 0x1bc   :  { %1154 = vst [vmem:[%s3623_s24 + $0xd8] sm:$0xff] %v1026_v9  ;;  %1155 = vst [vmem:[%s3623_s24 + $0xe0] sm:$0xff] %v1027_v11  ;;  %v651_v38 = vmul.f32 %v523_v21, %v1418_v2  ;;  %v913_v9 = vmul.f32 %v785_v54, %v1443_v10 }
 0x1be   :  { %v1035_v51 = vadd.f32 %v907_v39, %v651_v38  ;;  %v794_v38 = vld [vmem:[%s3621_s8 + $0x198] sm:$0xff] }
 0x1c3   :  { %v524_v27 = vld [vmem:[%s3622_s16 + $0x128] sm:$0xff]  ;;  %v525_v29 = vld [vmem:[%s3622_s16 + $0x130] sm:$0xff] }
 0x1c4   :  { %1156 = vst [vmem:[%s3623_s24 + $0xe8] sm:$0xff] %v1028_v16  ;;  %v652_v44 = vmul.f32 %v524_v27, %v1418_v2  ;;  %v653_v46 = vmul.f32 %v525_v29, %v1418_v2 }
 0x1c6   :  { %v1036_v56 = vadd.f32 %v908_v45, %v652_v44  ;;  %v1037_v63 = vadd.f32 %v909_v52, %v653_v46  ;;  %v796_v46 = vld [vmem:[%s3621_s8 + $0x1a8] sm:$0xff]  ;;  %v797_v52 = vld [vmem:[%s3621_s8 + $0x1b0] sm:$0xff] }
 0x1cb   :  { %v526_v35 = vld [vmem:[%s3622_s16 + $0x138] sm:$0xff] }
 0x1cc   :  { %1157 = vst [vmem:[%s3623_s24 + $0xf0] sm:$0xff] %v1029_v23  ;;  %v654_v53 = vmul.f32 %v526_v35, %v1418_v2  ;;  %v916_v23 = vmul.f32 %v788_v5, %v1443_v10  ;;  %v918_v35 = vmul.f32 %v790_v18, %v1443_v10  ;;  %v803_v18 = vld [vmem:[%s3621_s8 + $0x1e0] sm:$0xff] }
 0x1ce   :  { %v1038_v7 = vadd.f32 %v910_v57, %v654_v53  ;;  %v923_v57 = vmul.f32 %v795_v40, %v1443_v10 }
 0x1d3   :  { %v527_v41 = vld [vmem:[%s3622_s16 + $0x140] sm:$0xff] }
 0x1d4   :  { %1158 = vst [vmem:[%s3623_s24 + $0xf8] sm:$0xff] %v1030_v30  ;;  %1159 = vst [vmem:[%s3623_s24 + $0x100] sm:$0xff] %v1031_v31  ;;  %v655_v58 = vmul.f32 %v527_v41, %v1418_v2  ;;  %v917_v30 = vmul.f32 %v789_v12, %v1443_v10 }
 0x1d6   :  { %v1039_v8 = vadd.f32 %v911_v59, %v655_v58  ;;  %v798_v58 = vld [vmem:[%s3621_s8 + $0x1b8] sm:$0xff] }
 0x1db   :  { %v528_v47 = vld [vmem:[%s3622_s16 + $0x148] sm:$0xff]  ;;  %v529_v49 = vld [vmem:[%s3622_s16 + $0x150] sm:$0xff] }
 0x1dc   :  { %1160 = vst [vmem:[%s3623_s24 + $0x108] sm:$0xff] %v1032_v36  ;;  %v656_v0 = vmul.f32 %v528_v47, %v1418_v2  ;;  %v657_v3 = vmul.f32 %v529_v49, %v1418_v2 }
 0x1de   :  { %v1040_v14 = vadd.f32 %v912_v1, %v656_v0  ;;  %v1041_v21 = vadd.f32 %v913_v9, %v657_v3  ;;  %v800_v3 = vld [vmem:[%s3621_s8 + $0x1c8] sm:$0xff]  ;;  %v801_v9 = vld [vmem:[%s3621_s8 + $0x1d0] sm:$0xff] }
 0x1e3   :  { %v530_v55 = vld [vmem:[%s3622_s16 + $0x158] sm:$0xff] }
 0x1e4   :  { %1161 = vst [vmem:[%s3623_s24 + $0x110] sm:$0xff] %v1033_v43  ;;  %v658_v11 = vmul.f32 %v530_v55, %v1418_v2  ;;  %v920_v43 = vmul.f32 %v792_v26, %v1443_v10  ;;  %v922_v55 = vmul.f32 %v794_v38, %v1443_v10  ;;  %v807_v38 = vld [vmem:[%s3621_s8 + $0x200] sm:$0xff] }
 0x1e6   :  { %v1042_v28 = vadd.f32 %v914_v15, %v658_v11  ;;  %v927_v15 = vmul.f32 %v799_v60, %v1443_v10 }
 0x1eb   :  { %v531_v61 = vld [vmem:[%s3622_s16 + $0x160] sm:$0xff] }
 0x1ec   :  { %1162 = vst [vmem:[%s3623_s24 + $0x118] sm:$0xff] %v1034_v50  ;;  %1163 = vst [vmem:[%s3623_s24 + $0x120] sm:$0xff] %v1035_v51  ;;  %v659_v16 = vmul.f32 %v531_v61, %v1418_v2  ;;  %v921_v50 = vmul.f32 %v793_v32, %v1443_v10 }
 0x1ee   :  { %v1043_v29 = vadd.f32 %v915_v17, %v659_v16  ;;  %v802_v16 = vld [vmem:[%s3621_s8 + $0x1d8] sm:$0xff] }
 0x1f3   :  { %v532_v4 = vld [vmem:[%s3622_s16 + $0x168] sm:$0xff]  ;;  %v533_v6 = vld [vmem:[%s3622_s16 + $0x170] sm:$0xff] }
 0x1f4   :  { %1164 = vst [vmem:[%s3623_s24 + $0x128] sm:$0xff] %v1036_v56  ;;  %v660_v22 = vmul.f32 %v532_v4, %v1418_v2  ;;  %v661_v24 = vmul.f32 %v533_v6, %v1418_v2 }
 0x1f6   :  { %v1044_v34 = vadd.f32 %v916_v23, %v660_v22  ;;  %v1045_v41 = vadd.f32 %v917_v30, %v661_v24  ;;  %v804_v24 = vld [vmem:[%s3621_s8 + $0x1e8] sm:$0xff]  ;;  %v805_v30 = vld [vmem:[%s3621_s8 + $0x1f0] sm:$0xff] }
 0x1fb   :  { %v534_v13 = vld [vmem:[%s3622_s16 + $0x178] sm:$0xff] }
 0x1fc   :  { %1165 = vst [vmem:[%s3623_s24 + $0x130] sm:$0xff] %v1037_v63  ;;  %v662_v31 = vmul.f32 %v534_v13, %v1418_v2  ;;  %v924_v63 = vmul.f32 %v796_v46, %v1443_v10  ;;  %v926_v13 = vmul.f32 %v798_v58, %v1443_v10  ;;  %v811_v58 = vld [vmem:[%s3621_s8 + $0x220] sm:$0xff] }
 0x1fe   :  { %v1046_v48 = vadd.f32 %v918_v35, %v662_v31  ;;  %v931_v35 = vmul.f32 %v803_v18, %v1443_v10 }
 0x203   :  { %v535_v19 = vld [vmem:[%s3622_s16 + $0x180] sm:$0xff] }
 0x204   :  { %1166 = vst [vmem:[%s3623_s24 + $0x138] sm:$0xff] %v1038_v7  ;;  %1167 = vst [vmem:[%s3623_s24 + $0x140] sm:$0xff] %v1039_v8  ;;  %v663_v36 = vmul.f32 %v535_v19, %v1418_v2  ;;  %v925_v7 = vmul.f32 %v797_v52, %v1443_v10 }
 0x206   :  { %v1047_v49 = vadd.f32 %v919_v37, %v663_v36  ;;  %v806_v36 = vld [vmem:[%s3621_s8 + $0x1f8] sm:$0xff] }
 0x20b   :  { %v536_v25 = vld [vmem:[%s3622_s16 + $0x188] sm:$0xff]  ;;  %v537_v27 = vld [vmem:[%s3622_s16 + $0x190] sm:$0xff] }
 0x20c   :  { %1168 = vst [vmem:[%s3623_s24 + $0x148] sm:$0xff] %v1040_v14  ;;  %v664_v42 = vmul.f32 %v536_v25, %v1418_v2  ;;  %v665_v44 = vmul.f32 %v537_v27, %v1418_v2 }
 0x20e   :  { %v1048_v54 = vadd.f32 %v920_v43, %v664_v42  ;;  %v1049_v61 = vadd.f32 %v921_v50, %v665_v44  ;;  %v808_v44 = vld [vmem:[%s3621_s8 + $0x208] sm:$0xff]  ;;  %v809_v50 = vld [vmem:[%s3621_s8 + $0x210] sm:$0xff] }
 0x213   :  { %v538_v33 = vld [vmem:[%s3622_s16 + $0x198] sm:$0xff] }
 0x214   :  { %1169 = vst [vmem:[%s3623_s24 + $0x150] sm:$0xff] %v1041_v21  ;;  %v666_v51 = vmul.f32 %v538_v33, %v1418_v2  ;;  %v928_v21 = vmul.f32 %v800_v3, %v1443_v10  ;;  %v930_v33 = vmul.f32 %v802_v16, %v1443_v10  ;;  %v815_v16 = vld [vmem:[%s3621_s8 + $0x240] sm:$0xff] }
 0x216   :  { %v1050_v5 = vadd.f32 %v922_v55, %v666_v51  ;;  %v935_v55 = vmul.f32 %v807_v38, %v1443_v10 }
 0x21b   :  { %v539_v39 = vld [vmem:[%s3622_s16 + $0x1a0] sm:$0xff] }
 0x21c   :  { %1170 = vst [vmem:[%s3623_s24 + $0x158] sm:$0xff] %v1042_v28  ;;  %1171 = vst [vmem:[%s3623_s24 + $0x160] sm:$0xff] %v1043_v29  ;;  %v667_v56 = vmul.f32 %v539_v39, %v1418_v2  ;;  %v929_v28 = vmul.f32 %v801_v9, %v1443_v10 }
 0x21e   :  { %v1051_v6 = vadd.f32 %v923_v57, %v667_v56  ;;  %v810_v56 = vld [vmem:[%s3621_s8 + $0x218] sm:$0xff] }
 0x223   :  { %v540_v45 = vld [vmem:[%s3622_s16 + $0x1a8] sm:$0xff]  ;;  %v541_v47 = vld [vmem:[%s3622_s16 + $0x1b0] sm:$0xff] }
 0x224   :  { %1172 = vst [vmem:[%s3623_s24 + $0x168] sm:$0xff] %v1044_v34  ;;  %v668_v62 = vmul.f32 %v540_v45, %v1418_v2  ;;  %v669_v0 = vmul.f32 %v541_v47, %v1418_v2 }
 0x226   :  { %v1052_v12 = vadd.f32 %v924_v63, %v668_v62  ;;  %v1053_v19 = vadd.f32 %v925_v7, %v669_v0  ;;  %v812_v0 = vld [vmem:[%s3621_s8 + $0x228] sm:$0xff]  ;;  %v813_v7 = vld [vmem:[%s3621_s8 + $0x230] sm:$0xff] }
 0x22b   :  { %v542_v53 = vld [vmem:[%s3622_s16 + $0x1b8] sm:$0xff] }
 0x22c   :  { %1173 = vst [vmem:[%s3623_s24 + $0x170] sm:$0xff] %v1045_v41  ;;  %v670_v8 = vmul.f32 %v542_v53, %v1418_v2  ;;  %v932_v41 = vmul.f32 %v804_v24, %v1443_v10  ;;  %v934_v53 = vmul.f32 %v806_v36, %v1443_v10  ;;  %v819_v36 = vld [vmem:[%s3621_s8 + $0x260] sm:$0xff] }
 0x22e   :  { %v1054_v26 = vadd.f32 %v926_v13, %v670_v8  ;;  %v939_v13 = vmul.f32 %v811_v58, %v1443_v10 }
 0x233   :  { %v543_v59 = vld [vmem:[%s3622_s16 + $0x1c0] sm:$0xff] }
 0x234   :  { %1174 = vst [vmem:[%s3623_s24 + $0x178] sm:$0xff] %v1046_v48  ;;  %1175 = vst [vmem:[%s3623_s24 + $0x180] sm:$0xff] %v1047_v49  ;;  %v671_v14 = vmul.f32 %v543_v59, %v1418_v2  ;;  %v933_v48 = vmul.f32 %v805_v30, %v1443_v10 }
 0x236   :  { %v1055_v27 = vadd.f32 %v927_v15, %v671_v14  ;;  %v814_v14 = vld [vmem:[%s3621_s8 + $0x238] sm:$0xff] }
 0x23b   :  { %v544_v1 = vld [vmem:[%s3622_s16 + $0x1c8] sm:$0xff]  ;;  %v545_v4 = vld [vmem:[%s3622_s16 + $0x1d0] sm:$0xff] }
 0x23c   :  { %1176 = vst [vmem:[%s3623_s24 + $0x188] sm:$0xff] %v1048_v54  ;;  %v672_v20 = vmul.f32 %v544_v1, %v1418_v2  ;;  %v673_v22 = vmul.f32 %v545_v4, %v1418_v2 }
 0x23e   :  { %v1056_v32 = vadd.f32 %v928_v21, %v672_v20  ;;  %v1057_v39 = vadd.f32 %v929_v28, %v673_v22  ;;  %v816_v22 = vld [vmem:[%s3621_s8 + $0x248] sm:$0xff]  ;;  %v817_v28 = vld [vmem:[%s3621_s8 + $0x250] sm:$0xff] }
 0x243   :  { %v546_v11 = vld [vmem:[%s3622_s16 + $0x1d8] sm:$0xff] }
 0x244   :  { %1177 = vst [vmem:[%s3623_s24 + $0x190] sm:$0xff] %v1049_v61  ;;  %v674_v29 = vmul.f32 %v546_v11, %v1418_v2  ;;  %v936_v61 = vmul.f32 %v808_v44, %v1443_v10  ;;  %v938_v11 = vmul.f32 %v810_v56, %v1443_v10  ;;  %v823_v56 = vld [vmem:[%s3621_s8 + $0x280] sm:$0xff] }
 0x246   :  { %v1058_v46 = vadd.f32 %v930_v33, %v674_v29  ;;  %v943_v33 = vmul.f32 %v815_v16, %v1443_v10 }
 0x24b   :  { %v547_v17 = vld [vmem:[%s3622_s16 + $0x1e0] sm:$0xff] }
 0x24c   :  { %1178 = vst [vmem:[%s3623_s24 + $0x198] sm:$0xff] %v1050_v5  ;;  %1179 = vst [vmem:[%s3623_s24 + $0x1a0] sm:$0xff] %v1051_v6  ;;  %v675_v34 = vmul.f32 %v547_v17, %v1418_v2  ;;  %v937_v5 = vmul.f32 %v809_v50, %v1443_v10 }
 0x24e   :  { %v1059_v47 = vadd.f32 %v931_v35, %v675_v34  ;;  %v818_v34 = vld [vmem:[%s3621_s8 + $0x258] sm:$0xff] }
 0x253   :  { %v548_v23 = vld [vmem:[%s3622_s16 + $0x1e8] sm:$0xff]  ;;  %v549_v25 = vld [vmem:[%s3622_s16 + $0x1f0] sm:$0xff] }
 0x254   :  { %1180 = vst [vmem:[%s3623_s24 + $0x1a8] sm:$0xff] %v1052_v12  ;;  %v676_v40 = vmul.f32 %v548_v23, %v1418_v2  ;;  %v677_v42 = vmul.f32 %v549_v25, %v1418_v2 }
 0x256   :  { %v1060_v52 = vadd.f32 %v932_v41, %v676_v40  ;;  %v1061_v59 = vadd.f32 %v933_v48, %v677_v42  ;;  %v820_v42 = vld [vmem:[%s3621_s8 + $0x268] sm:$0xff]  ;;  %v821_v48 = vld [vmem:[%s3621_s8 + $0x270] sm:$0xff] }
 0x25b   :  { %v550_v31 = vld [vmem:[%s3622_s16 + $0x1f8] sm:$0xff] }
 0x25c   :  { %1181 = vst [vmem:[%s3623_s24 + $0x1b0] sm:$0xff] %v1053_v19  ;;  %v678_v49 = vmul.f32 %v550_v31, %v1418_v2  ;;  %v940_v19 = vmul.f32 %v812_v0, %v1443_v10  ;;  %v942_v31 = vmul.f32 %v814_v14, %v1443_v10  ;;  %v827_v14 = vld [vmem:[%s3621_s8 + $0x2a0] sm:$0xff] }
 0x25e   :  { %v1062_v3 = vadd.f32 %v934_v53, %v678_v49  ;;  %v947_v53 = vmul.f32 %v819_v36, %v1443_v10 }
 0x263   :  { %v551_v37 = vld [vmem:[%s3622_s16 + $0x200] sm:$0xff] }
 0x264   :  { %1182 = vst [vmem:[%s3623_s24 + $0x1b8] sm:$0xff] %v1054_v26  ;;  %1183 = vst [vmem:[%s3623_s24 + $0x1c0] sm:$0xff] %v1055_v27  ;;  %v679_v54 = vmul.f32 %v551_v37, %v1418_v2  ;;  %v941_v26 = vmul.f32 %v813_v7, %v1443_v10 }
 0x266   :  { %v1063_v4 = vadd.f32 %v935_v55, %v679_v54  ;;  %v822_v54 = vld [vmem:[%s3621_s8 + $0x278] sm:$0xff] }
 0x26b   :  { %v552_v43 = vld [vmem:[%s3622_s16 + $0x208] sm:$0xff]  ;;  %v553_v45 = vld [vmem:[%s3622_s16 + $0x210] sm:$0xff] }
 0x26c   :  { %1184 = vst [vmem:[%s3623_s24 + $0x1c8] sm:$0xff] %v1056_v32  ;;  %v680_v60 = vmul.f32 %v552_v43, %v1418_v2  ;;  %v681_v62 = vmul.f32 %v553_v45, %v1418_v2 }
 0x26e   :  { %v1064_v9 = vadd.f32 %v936_v61, %v680_v60  ;;  %v1065_v17 = vadd.f32 %v937_v5, %v681_v62  ;;  %v824_v62 = vld [vmem:[%s3621_s8 + $0x288] sm:$0xff]  ;;  %v825_v5 = vld [vmem:[%s3621_s8 + $0x290] sm:$0xff] }
 0x273   :  { %v554_v51 = vld [vmem:[%s3622_s16 + $0x218] sm:$0xff] }
 0x274   :  { %1185 = vst [vmem:[%s3623_s24 + $0x1d0] sm:$0xff] %v1057_v39  ;;  %v682_v6 = vmul.f32 %v554_v51, %v1418_v2  ;;  %v944_v39 = vmul.f32 %v816_v22, %v1443_v10  ;;  %v946_v51 = vmul.f32 %v818_v34, %v1443_v10  ;;  %v831_v34 = vld [vmem:[%s3621_s8 + $0x2c0] sm:$0xff] }
 0x276   :  { %v1066_v24 = vadd.f32 %v938_v11, %v682_v6  ;;  %v951_v11 = vmul.f32 %v823_v56, %v1443_v10 }
 0x27b   :  { %v555_v57 = vld [vmem:[%s3622_s16 + $0x220] sm:$0xff] }
 0x27c   :  { %1186 = vst [vmem:[%s3623_s24 + $0x1d8] sm:$0xff] %v1058_v46  ;;  %1187 = vst [vmem:[%s3623_s24 + $0x1e0] sm:$0xff] %v1059_v47  ;;  %v683_v12 = vmul.f32 %v555_v57, %v1418_v2  ;;  %v945_v46 = vmul.f32 %v817_v28, %v1443_v10 }
 0x27e   :  { %v1067_v25 = vadd.f32 %v939_v13, %v683_v12  ;;  %v826_v12 = vld [vmem:[%s3621_s8 + $0x298] sm:$0xff] }
 0x283   :  { %v556_v63 = vld [vmem:[%s3622_s16 + $0x228] sm:$0xff]  ;;  %v557_v1 = vld [vmem:[%s3622_s16 + $0x230] sm:$0xff] }
 0x284   :  { %1188 = vst [vmem:[%s3623_s24 + $0x1e8] sm:$0xff] %v1060_v52  ;;  %v684_v18 = vmul.f32 %v556_v63, %v1418_v2  ;;  %v685_v20 = vmul.f32 %v557_v1, %v1418_v2 }
 0x286   :  { %v1068_v30 = vadd.f32 %v940_v19, %v684_v18  ;;  %v1069_v37 = vadd.f32 %v941_v26, %v685_v20  ;;  %v828_v20 = vld [vmem:[%s3621_s8 + $0x2a8] sm:$0xff]  ;;  %v829_v26 = vld [vmem:[%s3621_s8 + $0x2b0] sm:$0xff] }
 0x28b   :  { %v558_v8 = vld [vmem:[%s3622_s16 + $0x238] sm:$0xff] }
 0x28c   :  { %1189 = vst [vmem:[%s3623_s24 + $0x1f0] sm:$0xff] %v1061_v59  ;;  %v686_v27 = vmul.f32 %v558_v8, %v1418_v2  ;;  %v948_v59 = vmul.f32 %v820_v42, %v1443_v10  ;;  %v950_v8 = vmul.f32 %v822_v54, %v1443_v10  ;;  %v835_v54 = vld [vmem:[%s3621_s8 + $0x2e0] sm:$0xff] }
 0x28e   :  { %v1070_v44 = vadd.f32 %v942_v31, %v686_v27  ;;  %v955_v31 = vmul.f32 %v827_v14, %v1443_v10 }
 0x293   :  { %v559_v15 = vld [vmem:[%s3622_s16 + $0x240] sm:$0xff] }
 0x294   :  { %1190 = vst [vmem:[%s3623_s24 + $0x1f8] sm:$0xff] %v1062_v3  ;;  %1191 = vst [vmem:[%s3623_s24 + $0x200] sm:$0xff] %v1063_v4  ;;  %v687_v32 = vmul.f32 %v559_v15, %v1418_v2  ;;  %v949_v3 = vmul.f32 %v821_v48, %v1443_v10 }
 0x296   :  { %v1071_v45 = vadd.f32 %v943_v33, %v687_v32  ;;  %v830_v32 = vld [vmem:[%s3621_s8 + $0x2b8] sm:$0xff] }
 0x29b   :  { %v560_v21 = vld [vmem:[%s3622_s16 + $0x248] sm:$0xff]  ;;  %v561_v23 = vld [vmem:[%s3622_s16 + $0x250] sm:$0xff] }
 0x29c   :  { %1192 = vst [vmem:[%s3623_s24 + $0x208] sm:$0xff] %v1064_v9  ;;  %v688_v38 = vmul.f32 %v560_v21, %v1418_v2  ;;  %v689_v40 = vmul.f32 %v561_v23, %v1418_v2 }
 0x29e   :  { %v1072_v50 = vadd.f32 %v944_v39, %v688_v38  ;;  %v1073_v57 = vadd.f32 %v945_v46, %v689_v40  ;;  %v832_v40 = vld [vmem:[%s3621_s8 + $0x2c8] sm:$0xff]  ;;  %v833_v46 = vld [vmem:[%s3621_s8 + $0x2d0] sm:$0xff] }
 0x2a3   :  { %v562_v29 = vld [vmem:[%s3622_s16 + $0x258] sm:$0xff] }
 0x2a4   :  { %1193 = vst [vmem:[%s3623_s24 + $0x210] sm:$0xff] %v1065_v17  ;;  %v690_v47 = vmul.f32 %v562_v29, %v1418_v2  ;;  %v952_v17 = vmul.f32 %v824_v62, %v1443_v10  ;;  %v954_v29 = vmul.f32 %v826_v12, %v1443_v10  ;;  %v839_v12 = vld [vmem:[%s3621_s8 + $0x300] sm:$0xff] }
 0x2a6   :  { %v1074_v0 = vadd.f32 %v946_v51, %v690_v47  ;;  %v959_v51 = vmul.f32 %v831_v34, %v1443_v10 }
 0x2ab   :  { %v563_v35 = vld [vmem:[%s3622_s16 + $0x260] sm:$0xff] }
 0x2ac   :  { %1194 = vst [vmem:[%s3623_s24 + $0x218] sm:$0xff] %v1066_v24  ;;  %1195 = vst [vmem:[%s3623_s24 + $0x220] sm:$0xff] %v1067_v25  ;;  %v691_v52 = vmul.f32 %v563_v35, %v1418_v2  ;;  %v953_v24 = vmul.f32 %v825_v5, %v1443_v10 }
 0x2ae   :  { %v1075_v1 = vadd.f32 %v947_v53, %v691_v52  ;;  %v834_v52 = vld [vmem:[%s3621_s8 + $0x2d8] sm:$0xff] }
 0x2b3   :  { %v564_v41 = vld [vmem:[%s3622_s16 + $0x268] sm:$0xff]  ;;  %v565_v43 = vld [vmem:[%s3622_s16 + $0x270] sm:$0xff] }
 0x2b4   :  { %1196 = vst [vmem:[%s3623_s24 + $0x228] sm:$0xff] %v1068_v30  ;;  %v692_v58 = vmul.f32 %v564_v41, %v1418_v2  ;;  %v693_v60 = vmul.f32 %v565_v43, %v1418_v2 }
 0x2b6   :  { %v1076_v7 = vadd.f32 %v948_v59, %v692_v58  ;;  %v1077_v15 = vadd.f32 %v949_v3, %v693_v60  ;;  %v836_v60 = vld [vmem:[%s3621_s8 + $0x2e8] sm:$0xff]  ;;  %v837_v3 = vld [vmem:[%s3621_s8 + $0x2f0] sm:$0xff] }
 0x2bb   :  { %v566_v49 = vld [vmem:[%s3622_s16 + $0x278] sm:$0xff] }
 0x2bc   :  { %1197 = vst [vmem:[%s3623_s24 + $0x230] sm:$0xff] %v1069_v37  ;;  %v694_v4 = vmul.f32 %v566_v49, %v1418_v2  ;;  %v956_v37 = vmul.f32 %v828_v20, %v1443_v10  ;;  %v958_v49 = vmul.f32 %v830_v32, %v1443_v10  ;;  %v843_v32 = vld [vmem:[%s3621_s8 + $0x320] sm:$0xff] }
 0x2be   :  { %v1078_v22 = vadd.f32 %v950_v8, %v694_v4  ;;  %v963_v8 = vmul.f32 %v835_v54, %v1443_v10 }
 0x2c3   :  { %v567_v55 = vld [vmem:[%s3622_s16 + $0x280] sm:$0xff] }
 0x2c4   :  { %1198 = vst [vmem:[%s3623_s24 + $0x238] sm:$0xff] %v1070_v44  ;;  %1199 = vst [vmem:[%s3623_s24 + $0x240] sm:$0xff] %v1071_v45  ;;  %v695_v9 = vmul.f32 %v567_v55, %v1418_v2  ;;  %v957_v44 = vmul.f32 %v829_v26, %v1443_v10 }
 0x2c6   :  { %v1079_v23 = vadd.f32 %v951_v11, %v695_v9  ;;  %v838_v9 = vld [vmem:[%s3621_s8 + $0x2f8] sm:$0xff] }
 0x2cb   :  { %v568_v61 = vld [vmem:[%s3622_s16 + $0x288] sm:$0xff]  ;;  %v569_v63 = vld [vmem:[%s3622_s16 + $0x290] sm:$0xff] }
 0x2cc   :  { %1200 = vst [vmem:[%s3623_s24 + $0x248] sm:$0xff] %v1072_v50  ;;  %v696_v16 = vmul.f32 %v568_v61, %v1418_v2  ;;  %v697_v18 = vmul.f32 %v569_v63, %v1418_v2 }
 0x2ce   :  { %v1080_v28 = vadd.f32 %v952_v17, %v696_v16  ;;  %v1081_v35 = vadd.f32 %v953_v24, %v697_v18  ;;  %v840_v18 = vld [vmem:[%s3621_s8 + $0x308] sm:$0xff]  ;;  %v841_v24 = vld [vmem:[%s3621_s8 + $0x310] sm:$0xff] }
 0x2d3   :  { %v570_v6 = vld [vmem:[%s3622_s16 + $0x298] sm:$0xff] }
 0x2d4   :  { %1201 = vst [vmem:[%s3623_s24 + $0x250] sm:$0xff] %v1073_v57  ;;  %v698_v25 = vmul.f32 %v570_v6, %v1418_v2  ;;  %v960_v57 = vmul.f32 %v832_v40, %v1443_v10  ;;  %v962_v6 = vmul.f32 %v834_v52, %v1443_v10  ;;  %v847_v52 = vld [vmem:[%s3621_s8 + $0x340] sm:$0xff] }
 0x2d6   :  { %v1082_v42 = vadd.f32 %v954_v29, %v698_v25  ;;  %v967_v29 = vmul.f32 %v839_v12, %v1443_v10 }
 0x2db   :  { %v571_v13 = vld [vmem:[%s3622_s16 + $0x2a0] sm:$0xff] }
 0x2dc   :  { %1202 = vst [vmem:[%s3623_s24 + $0x258] sm:$0xff] %v1074_v0  ;;  %1203 = vst [vmem:[%s3623_s24 + $0x260] sm:$0xff] %v1075_v1  ;;  %v699_v30 = vmul.f32 %v571_v13, %v1418_v2  ;;  %v961_v0 = vmul.f32 %v833_v46, %v1443_v10 }
 0x2de   :  { %v1083_v43 = vadd.f32 %v955_v31, %v699_v30  ;;  %v842_v30 = vld [vmem:[%s3621_s8 + $0x318] sm:$0xff] }
 0x2e3   :  { %v572_v19 = vld [vmem:[%s3622_s16 + $0x2a8] sm:$0xff]  ;;  %v573_v21 = vld [vmem:[%s3622_s16 + $0x2b0] sm:$0xff] }
 0x2e4   :  { %1204 = vst [vmem:[%s3623_s24 + $0x268] sm:$0xff] %v1076_v7  ;;  %v700_v36 = vmul.f32 %v572_v19, %v1418_v2  ;;  %v701_v38 = vmul.f32 %v573_v21, %v1418_v2 }
 0x2e6   :  { %v1084_v48 = vadd.f32 %v956_v37, %v700_v36  ;;  %v1085_v55 = vadd.f32 %v957_v44, %v701_v38  ;;  %v844_v38 = vld [vmem:[%s3621_s8 + $0x328] sm:$0xff]  ;;  %v845_v44 = vld [vmem:[%s3621_s8 + $0x330] sm:$0xff] }
 0x2eb   :  { %v574_v27 = vld [vmem:[%s3622_s16 + $0x2b8] sm:$0xff] }
 0x2ec   :  { %1205 = vst [vmem:[%s3623_s24 + $0x270] sm:$0xff] %v1077_v15  ;;  %v702_v45 = vmul.f32 %v574_v27, %v1418_v2  ;;  %v964_v15 = vmul.f32 %v836_v60, %v1443_v10  ;;  %v966_v27 = vmul.f32 %v838_v9, %v1443_v10  ;;  %v851_v9 = vld [vmem:[%s3621_s8 + $0x360] sm:$0xff] }
 0x2ee   :  { %v1086_v62 = vadd.f32 %v958_v49, %v702_v45  ;;  %v971_v49 = vmul.f32 %v843_v32, %v1443_v10 }
 0x2f3   :  { %v575_v33 = vld [vmem:[%s3622_s16 + $0x2c0] sm:$0xff] }
 0x2f4   :  { %1206 = vst [vmem:[%s3623_s24 + $0x278] sm:$0xff] %v1078_v22  ;;  %1207 = vst [vmem:[%s3623_s24 + $0x280] sm:$0xff] %v1079_v23  ;;  %v703_v50 = vmul.f32 %v575_v33, %v1418_v2  ;;  %v965_v22 = vmul.f32 %v837_v3, %v1443_v10 }
 0x2f6   :  { %v1087_v63 = vadd.f32 %v959_v51, %v703_v50  ;;  %v846_v50 = vld [vmem:[%s3621_s8 + $0x338] sm:$0xff] }
 0x2fb   :  { %v576_v39 = vld [vmem:[%s3622_s16 + $0x2c8] sm:$0xff]  ;;  %v577_v41 = vld [vmem:[%s3622_s16 + $0x2d0] sm:$0xff] }
 0x2fc   :  { %1208 = vst [vmem:[%s3623_s24 + $0x288] sm:$0xff] %v1080_v28  ;;  %v704_v56 = vmul.f32 %v576_v39, %v1418_v2  ;;  %v705_v58 = vmul.f32 %v577_v41, %v1418_v2 }
 0x2fe   :  { %v1088_v5 = vadd.f32 %v960_v57, %v704_v56  ;;  %v1089_v13 = vadd.f32 %v961_v0, %v705_v58  ;;  %v848_v58 = vld [vmem:[%s3621_s8 + $0x348] sm:$0xff]  ;;  %v849_v0 = vld [vmem:[%s3621_s8 + $0x350] sm:$0xff] }
 0x303   :  { %v578_v47 = vld [vmem:[%s3622_s16 + $0x2d8] sm:$0xff] }
 0x304   :  { %1209 = vst [vmem:[%s3623_s24 + $0x290] sm:$0xff] %v1081_v35  ;;  %v706_v1 = vmul.f32 %v578_v47, %v1418_v2  ;;  %v968_v35 = vmul.f32 %v840_v18, %v1443_v10  ;;  %v970_v47 = vmul.f32 %v842_v30, %v1443_v10  ;;  %v855_v30 = vld [vmem:[%s3621_s8 + $0x380] sm:$0xff] }
 0x306   :  { %v1090_v20 = vadd.f32 %v962_v6, %v706_v1  ;;  %v975_v6 = vmul.f32 %v847_v52, %v1443_v10 }
 0x30b   :  { %v579_v53 = vld [vmem:[%s3622_s16 + $0x2e0] sm:$0xff] }
 0x30c   :  { %1210 = vst [vmem:[%s3623_s24 + $0x298] sm:$0xff] %v1082_v42  ;;  %1211 = vst [vmem:[%s3623_s24 + $0x2a0] sm:$0xff] %v1083_v43  ;;  %v707_v7 = vmul.f32 %v579_v53, %v1418_v2  ;;  %v969_v42 = vmul.f32 %v841_v24, %v1443_v10 }
 0x30e   :  { %v1091_v21 = vadd.f32 %v963_v8, %v707_v7  ;;  %v850_v7 = vld [vmem:[%s3621_s8 + $0x358] sm:$0xff] }
 0x313   :  { %v580_v59 = vld [vmem:[%s3622_s16 + $0x2e8] sm:$0xff]  ;;  %v581_v61 = vld [vmem:[%s3622_s16 + $0x2f0] sm:$0xff] }
 0x314   :  { %1212 = vst [vmem:[%s3623_s24 + $0x2a8] sm:$0xff] %v1084_v48  ;;  %v708_v14 = vmul.f32 %v580_v59, %v1418_v2  ;;  %v709_v16 = vmul.f32 %v581_v61, %v1418_v2 }
 0x316   :  { %v1092_v26 = vadd.f32 %v964_v15, %v708_v14  ;;  %v1093_v33 = vadd.f32 %v965_v22, %v709_v16  ;;  %v852_v16 = vld [vmem:[%s3621_s8 + $0x368] sm:$0xff]  ;;  %v853_v22 = vld [vmem:[%s3621_s8 + $0x370] sm:$0xff] }
 0x31b   :  { %v582_v4 = vld [vmem:[%s3622_s16 + $0x2f8] sm:$0xff] }
 0x31c   :  { %1213 = vst [vmem:[%s3623_s24 + $0x2b0] sm:$0xff] %v1085_v55  ;;  %v710_v23 = vmul.f32 %v582_v4, %v1418_v2  ;;  %v972_v55 = vmul.f32 %v844_v38, %v1443_v10  ;;  %v974_v4 = vmul.f32 %v846_v50, %v1443_v10  ;;  %v859_v50 = vld [vmem:[%s3621_s8 + $0x3a0] sm:$0xff] }
 0x31e   :  { %v1094_v40 = vadd.f32 %v966_v27, %v710_v23  ;;  %v979_v27 = vmul.f32 %v851_v9, %v1443_v10 }
 0x323   :  { %v583_v11 = vld [vmem:[%s3622_s16 + $0x300] sm:$0xff] }
 0x324   :  { %1214 = vst [vmem:[%s3623_s24 + $0x2b8] sm:$0xff] %v1086_v62  ;;  %1215 = vst [vmem:[%s3623_s24 + $0x2c0] sm:$0xff] %v1087_v63  ;;  %v711_v28 = vmul.f32 %v583_v11, %v1418_v2  ;;  %v973_v62 = vmul.f32 %v845_v44, %v1443_v10 }
 0x326   :  { %v1095_v41 = vadd.f32 %v967_v29, %v711_v28  ;;  %v854_v28 = vld [vmem:[%s3621_s8 + $0x378] sm:$0xff] }
 0x32b   :  { %v584_v17 = vld [vmem:[%s3622_s16 + $0x308] sm:$0xff]  ;;  %v585_v19 = vld [vmem:[%s3622_s16 + $0x310] sm:$0xff] }
 0x32c   :  { %1216 = vst [vmem:[%s3623_s24 + $0x2c8] sm:$0xff] %v1088_v5  ;;  %v712_v34 = vmul.f32 %v584_v17, %v1418_v2  ;;  %v713_v36 = vmul.f32 %v585_v19, %v1418_v2 }
 0x32e   :  { %v1096_v46 = vadd.f32 %v968_v35, %v712_v34  ;;  %v1097_v53 = vadd.f32 %v969_v42, %v713_v36  ;;  %v856_v36 = vld [vmem:[%s3621_s8 + $0x388] sm:$0xff]  ;;  %v857_v42 = vld [vmem:[%s3621_s8 + $0x390] sm:$0xff] }
 0x333   :  { %v586_v25 = vld [vmem:[%s3622_s16 + $0x318] sm:$0xff] }
 0x334   :  { %1217 = vst [vmem:[%s3623_s24 + $0x2d0] sm:$0xff] %v1089_v13  ;;  %v714_v43 = vmul.f32 %v586_v25, %v1418_v2  ;;  %v976_v13 = vmul.f32 %v848_v58, %v1443_v10  ;;  %v978_v25 = vmul.f32 %v850_v7, %v1443_v10  ;;  %v863_v7 = vld [vmem:[%s3621_s8 + $0x3c0] sm:$0xff] }
 0x336   :  { %v1098_v60 = vadd.f32 %v970_v47, %v714_v43  ;;  %v983_v47 = vmul.f32 %v855_v30, %v1443_v10 }
 0x33b   :  { %v587_v31 = vld [vmem:[%s3622_s16 + $0x320] sm:$0xff] }
 0x33c   :  { %1218 = vst [vmem:[%s3623_s24 + $0x2d8] sm:$0xff] %v1090_v20  ;;  %1219 = vst [vmem:[%s3623_s24 + $0x2e0] sm:$0xff] %v1091_v21  ;;  %v715_v48 = vmul.f32 %v587_v31, %v1418_v2  ;;  %v977_v20 = vmul.f32 %v849_v0, %v1443_v10 }
 0x33e   :  { %v1099_v61 = vadd.f32 %v971_v49, %v715_v48  ;;  %v858_v48 = vld [vmem:[%s3621_s8 + $0x398] sm:$0xff] }
 0x343   :  { %v588_v37 = vld [vmem:[%s3622_s16 + $0x328] sm:$0xff]  ;;  %v589_v39 = vld [vmem:[%s3622_s16 + $0x330] sm:$0xff] }
 0x344   :  { %1220 = vst [vmem:[%s3623_s24 + $0x2e8] sm:$0xff] %v1092_v26  ;;  %v716_v54 = vmul.f32 %v588_v37, %v1418_v2  ;;  %v717_v56 = vmul.f32 %v589_v39, %v1418_v2 }
 0x346   :  { %v1100_v3 = vadd.f32 %v972_v55, %v716_v54  ;;  %v1101_v11 = vadd.f32 %v973_v62, %v717_v56  ;;  %v860_v56 = vld [vmem:[%s3621_s8 + $0x3a8] sm:$0xff]  ;;  %v861_v62 = vld [vmem:[%s3621_s8 + $0x3b0] sm:$0xff] }
 0x34b   :  { %v590_v45 = vld [vmem:[%s3622_s16 + $0x338] sm:$0xff] }
 0x34c   :  { %1221 = vst [vmem:[%s3623_s24 + $0x2f0] sm:$0xff] %v1093_v33  ;;  %v718_v63 = vmul.f32 %v590_v45, %v1418_v2  ;;  %v980_v33 = vmul.f32 %v852_v16, %v1443_v10  ;;  %v982_v45 = vmul.f32 %v854_v28, %v1443_v10  ;;  %v867_v28 = vld [vmem:[%s3621_s8 + $0x3e0] sm:$0xff] }
 0x34e   :  { %v1102_v18 = vadd.f32 %v974_v4, %v718_v63  ;;  %v987_v4 = vmul.f32 %v859_v50, %v1443_v10 }
 0x353   :  { %v591_v51 = vld [vmem:[%s3622_s16 + $0x340] sm:$0xff] }
 0x354   :  { %1222 = vst [vmem:[%s3623_s24 + $0x2f8] sm:$0xff] %v1094_v40  ;;  %1223 = vst [vmem:[%s3623_s24 + $0x300] sm:$0xff] %v1095_v41  ;;  %v719_v5 = vmul.f32 %v591_v51, %v1418_v2  ;;  %v981_v40 = vmul.f32 %v853_v22, %v1443_v10 }
 0x356   :  { %v1103_v19 = vadd.f32 %v975_v6, %v719_v5  ;;  %v862_v5 = vld [vmem:[%s3621_s8 + $0x3b8] sm:$0xff] }
 0x35b   :  { %v592_v57 = vld [vmem:[%s3622_s16 + $0x348] sm:$0xff]  ;;  %v593_v59 = vld [vmem:[%s3622_s16 + $0x350] sm:$0xff] }
 0x35c   :  { %1224 = vst [vmem:[%s3623_s24 + $0x308] sm:$0xff] %v1096_v46  ;;  %v720_v12 = vmul.f32 %v592_v57, %v1418_v2  ;;  %v721_v14 = vmul.f32 %v593_v59, %v1418_v2 }
 0x35e   :  { %v1104_v24 = vadd.f32 %v976_v13, %v720_v12  ;;  %v1105_v31 = vadd.f32 %v977_v20, %v721_v14  ;;  %v864_v14 = vld [vmem:[%s3621_s8 + $0x3c8] sm:$0xff]  ;;  %v865_v20 = vld [vmem:[%s3621_s8 + $0x3d0] sm:$0xff] }
 0x363   :  { %v594_v1 = vld [vmem:[%s3622_s16 + $0x358] sm:$0xff] }
 0x364   :  { %1225 = vst [vmem:[%s3623_s24 + $0x310] sm:$0xff] %v1097_v53  ;;  %v722_v21 = vmul.f32 %v594_v1, %v1418_v2  ;;  %v984_v53 = vmul.f32 %v856_v36, %v1443_v10  ;;  %v986_v1 = vmul.f32 %v858_v48, %v1443_v10 }
 0x366   :  { %v1106_v38 = vadd.f32 %v978_v25, %v722_v21  ;;  %v991_v25 = vmul.f32 %v863_v7, %v1443_v10 }
 0x36b   :  { %v595_v8 = vld [vmem:[%s3622_s16 + $0x360] sm:$0xff] }
 0x36c   :  { %1226 = vst [vmem:[%s3623_s24 + $0x318] sm:$0xff] %v1098_v60  ;;  %1227 = vst [vmem:[%s3623_s24 + $0x320] sm:$0xff] %v1099_v61  ;;  %v723_v26 = vmul.f32 %v595_v8, %v1418_v2  ;;  %v985_v60 = vmul.f32 %v857_v42, %v1443_v10 }
 0x36e   :  { %v1107_v39 = vadd.f32 %v979_v27, %v723_v26  ;;  %v866_v26 = vld [vmem:[%s3621_s8 + $0x3d8] sm:$0xff] }
 0x373   :  { %v596_v15 = vld [vmem:[%s3622_s16 + $0x368] sm:$0xff]  ;;  %v597_v17 = vld [vmem:[%s3622_s16 + $0x370] sm:$0xff] }
 0x374   :  { %1228 = vst [vmem:[%s3623_s24 + $0x328] sm:$0xff] %v1100_v3  ;;  %v724_v32 = vmul.f32 %v596_v15, %v1418_v2  ;;  %v725_v34 = vmul.f32 %v597_v17, %v1418_v2 }
 0x376   :  { %v1108_v44 = vadd.f32 %v980_v33, %v724_v32  ;;  %v1109_v51 = vadd.f32 %v981_v40, %v725_v34  ;;  %v868_v34 = vld [vmem:[%s3621_s8 + $0x3e8] sm:$0xff]  ;;  %v869_v40 = vld [vmem:[%s3621_s8 + $0x3f0] sm:$0xff] }
 0x37b   :  { %v598_v23 = vld [vmem:[%s3622_s16 + $0x378] sm:$0xff] }
 0x37c   :  { %1229 = vst [vmem:[%s3623_s24 + $0x330] sm:$0xff] %v1101_v11  ;;  %v726_v41 = vmul.f32 %v598_v23, %v1418_v2  ;;  %v988_v11 = vmul.f32 %v860_v56, %v1443_v10  ;;  %v990_v23 = vmul.f32 %v862_v5, %v1443_v10 }
 0x37e   :  { %v1110_v58 = vadd.f32 %v982_v45, %v726_v41  ;;  %v995_v45 = vmul.f32 %v867_v28, %v1443_v10 }
 0x383   :  { %v599_v29 = vld [vmem:[%s3622_s16 + $0x380] sm:$0xff] }
 0x384   :  { %1230 = vst [vmem:[%s3623_s24 + $0x338] sm:$0xff] %v1102_v18  ;;  %1231 = vst [vmem:[%s3623_s24 + $0x340] sm:$0xff] %v1103_v19  ;;  %v727_v46 = vmul.f32 %v599_v29, %v1418_v2  ;;  %v989_v18 = vmul.f32 %v861_v62, %v1443_v10 }
 0x386   :  { %v1111_v59 = vadd.f32 %v983_v47, %v727_v46  ;;  %v870_v46 = vld [vmem:[%s3621_s8 + $0x3f8] sm:$0xff] }
 0x387   :  { %v998_v56 = vmul.f32 %v870_v46, %v1443_v10 }
 0x38b   :  { %v600_v35 = vld [vmem:[%s3622_s16 + $0x388] sm:$0xff]  ;;  %v601_v37 = vld [vmem:[%s3622_s16 + $0x390] sm:$0xff] }
 0x38c   :  { %1232 = vst [vmem:[%s3623_s24 + $0x348] sm:$0xff] %v1104_v24  ;;  %v728_v52 = vmul.f32 %v600_v35, %v1418_v2  ;;  %v729_v54 = vmul.f32 %v601_v37, %v1418_v2 }
 0x38e   :  { %v1112_v0 = vadd.f32 %v984_v53, %v728_v52  ;;  %v1113_v8 = vadd.f32 %v985_v60, %v729_v54  ;;  %v997_v53 = vmul.f32 %v869_v40, %v1443_v10 }
 0x393   :  { %v602_v43 = vld [vmem:[%s3622_s16 + $0x398] sm:$0xff] }
 0x394   :  { %1233 = vst [vmem:[%s3623_s24 + $0x350] sm:$0xff] %v1105_v31  ;;  %v730_v61 = vmul.f32 %v602_v43, %v1418_v2  ;;  %v992_v31 = vmul.f32 %v864_v14, %v1443_v10  ;;  %v994_v43 = vmul.f32 %v866_v26, %v1443_v10 }
 0x396   :  { %v1114_v16 = vadd.f32 %v986_v1, %v730_v61 }
 0x39b   :  { %v603_v49 = vld [vmem:[%s3622_s16 + $0x3a0] sm:$0xff] }
 0x39c   :  { %1234 = vst [vmem:[%s3623_s24 + $0x358] sm:$0xff] %v1106_v38  ;;  %1235 = vst [vmem:[%s3623_s24 + $0x360] sm:$0xff] %v1107_v39  ;;  %v731_v3 = vmul.f32 %v603_v49, %v1418_v2  ;;  %v993_v38 = vmul.f32 %v865_v20, %v1443_v10  ;;  %v996_v49 = vmul.f32 %v868_v34, %v1443_v10 }
 0x39e   :  { %v1115_v17 = vadd.f32 %v987_v4, %v731_v3 }
 0x3a3   :  { %v604_v55 = vld [vmem:[%s3622_s16 + $0x3a8] sm:$0xff]  ;;  %v605_v57 = vld [vmem:[%s3622_s16 + $0x3b0] sm:$0xff] }
 0x3a4   :  { %1236 = vst [vmem:[%s3623_s24 + $0x368] sm:$0xff] %v1108_v44  ;;  %v732_v9 = vmul.f32 %v604_v55, %v1418_v2  ;;  %v733_v12 = vmul.f32 %v605_v57, %v1418_v2 }
 0x3a6   :  { %v1116_v22 = vadd.f32 %v988_v11, %v732_v9  ;;  %v1117_v29 = vadd.f32 %v989_v18, %v733_v12 }
 0x3ab   :  { %v606_v63 = vld [vmem:[%s3622_s16 + $0x3b8] sm:$0xff] }
 0x3ac   :  { %1237 = vst [vmem:[%s3623_s24 + $0x370] sm:$0xff] %v1109_v51  ;;  %v734_v19 = vmul.f32 %v606_v63, %v1418_v2 }
 0x3ae   :  { %v1118_v36 = vadd.f32 %v990_v23, %v734_v19 }
 0x3b3   :  { %v607_v6 = vld [vmem:[%s3622_s16 + $0x3c0] sm:$0xff] }
 0x3b4   :  { %1238 = vst [vmem:[%s3623_s24 + $0x378] sm:$0xff] %v1110_v58  ;;  %1239 = vst [vmem:[%s3623_s24 + $0x380] sm:$0xff] %v1111_v59  ;;  %v735_v24 = vmul.f32 %v607_v6, %v1418_v2 }
 0x3b6   :  { %v1119_v37 = vadd.f32 %v991_v25, %v735_v24 }
 0x3bb   :  { %v608_v13 = vld [vmem:[%s3622_s16 + $0x3c8] sm:$0xff]  ;;  %v609_v15 = vld [vmem:[%s3622_s16 + $0x3d0] sm:$0xff] }
 0x3bc   :  { %1240 = vst [vmem:[%s3623_s24 + $0x388] sm:$0xff] %v1112_v0  ;;  %v736_v30 = vmul.f32 %v608_v13, %v1418_v2  ;;  %v737_v32 = vmul.f32 %v609_v15, %v1418_v2 }
 0x3be   :  { %v1120_v42 = vadd.f32 %v992_v31, %v736_v30  ;;  %v1121_v47 = vadd.f32 %v993_v38, %v737_v32 }
 0x3c3   :  { %v610_v21 = vld [vmem:[%s3622_s16 + $0x3d8] sm:$0xff] }
 0x3c4   :  { %1241 = vst [vmem:[%s3623_s24 + $0x390] sm:$0xff] %v1113_v8  ;;  %v738_v39 = vmul.f32 %v610_v21, %v1418_v2 }
 0x3c6   :  { %v1122_v51 = vadd.f32 %v994_v43, %v738_v39 }
 0x3cb   :  { %v611_v27 = vld [vmem:[%s3622_s16 + $0x3e0] sm:$0xff] }
 0x3cc   :  { %1242 = vst [vmem:[%s3623_s24 + $0x398] sm:$0xff] %v1114_v16  ;;  %1243 = vst [vmem:[%s3623_s24 + $0x3a0] sm:$0xff] %v1115_v17  ;;  %v739_v44 = vmul.f32 %v611_v27, %v1418_v2 }
 0x3ce   :  { %v1123_v52 = vadd.f32 %v995_v45, %v739_v44 }
 0x3d3   :  { %v612_v33 = vld [vmem:[%s3622_s16 + $0x3e8] sm:$0xff]  ;;  %v613_v35 = vld [vmem:[%s3622_s16 + $0x3f0] sm:$0xff] }
 0x3d4   :  { %1244 = vst [vmem:[%s3623_s24 + $0x3a8] sm:$0xff] %v1116_v22  ;;  %v740_v48 = vmul.f32 %v612_v33, %v1418_v2  ;;  %v741_v50 = vmul.f32 %v613_v35, %v1418_v2 }
 0x3d6   :  { %v1124_v55 = vadd.f32 %v996_v49, %v740_v48  ;;  %v1125_v57 = vadd.f32 %v997_v53, %v741_v50 }
 0x3db   :  { %v614_v41 = vld [vmem:[%s3622_s16 + $0x3f8] sm:$0xff] }
 0x3dc   :  { %1245 = vst [vmem:[%s3623_s24 + $0x3b0] sm:$0xff] %v1117_v29  ;;  %1246 = vst [vmem:[%s3623_s24 + $0x3b8] sm:$0xff] %v1118_v36  ;;  %v742_v54 = vmul.f32 %v614_v41, %v1418_v2 }
 0x3dd   :  { %1247 = vst [vmem:[%s3623_s24 + $0x3c0] sm:$0xff] %v1119_v37  ;;  %1248 = vst [vmem:[%s3623_s24 + $0x3c8] sm:$0xff] %v1120_v42 }
 0x3de   :  { %1249 = vst [vmem:[%s3623_s24 + $0x3d0] sm:$0xff] %v1121_v47  ;;  %1250 = vst [vmem:[%s3623_s24 + $0x3d8] sm:$0xff] %v1122_v51  ;;  %v1126_v2 = vadd.f32 %v998_v56, %v742_v54 }
 0x3df   :  { %1251 = vst [vmem:[%s3623_s24 + $0x3e0] sm:$0xff] %v1123_v52  ;;  %1252 = vst [vmem:[%s3623_s24 + $0x3e8] sm:$0xff] %v1124_v55 }
 0x3e0   :  { %1253 = vst [vmem:[%s3623_s24 + $0x3f0] sm:$0xff] %v1125_v57  ;;  %1254 = vst [vmem:[%s3623_s24 + $0x3f8] sm:$0xff] %v1126_v2 }

// kernel: simsiam_forward.3
= control target key start
LH: loop header
LB: loop body
LE: loop exit
PB: predicated region body
PF: predicated region fallthrough
CT: control target
= control target key end

     0   :  { %s5121_s0 = inlined_call_operand.vmem [shape: bf16[2,8,1024], index: 0, kind: input, shape index: {}]   ;;  %s5122_s1 = inlined_call_operand.vmem [shape: bf16[1024,128], index: 1, kind: input, shape index: {}]   ;;  %s5123_s2 = inlined_call_operand.vmem [shape: f32[1,128], index: 2, kind: input, shape index: {}]   ;;  %s5124_s3 = inlined_call_operand.vmem [shape: bf16[128,256], index: 3, kind: input, shape index: {}]   ;;  %s5125_s4 = inlined_call_operand.vmem [shape: f32[1,256], index: 4, kind: input, shape index: {}]   ;;  %s5126_s5 = inlined_call_operand.vmem [shape: f32[1,256], index: 5, kind: input, shape index: {}]   ;;  %s5127_s6 = inlined_call_operand.vmem [shape: f32[1,256], index: 6, kind: input, shape index: {}]   ;;  %s5128_s7 = inlined_call_operand.vmem [shape: bf16[256,128], index: 7, kind: input, shape index: {}]   ;;  %s5129_s8 = inlined_call_operand.vmem [shape: f32[1,128], index: 8, kind: input, shape index: {}]   ;;  %s5130_s9 = inlined_call_operand.vmem [shape: bf16[128,256], index: 9, kind: input, shape index: {}]   ;;  %s5131_s10 = inlined_call_operand.vmem [shape: f32[1,256], index: 10, kind: input, shape index: {}]   ;;  %s5132_s11 = inlined_call_operand.vmem [shape: f32[1,256], index: 11, kind: input, shape index: {}]   ;;  %s5133_s12 = inlined_call_operand.vmem [shape: f32[1,256], index: 12, kind: input, shape index: {}]   ;;  %s5134_s13 = inlined_call_operand.vmem [shape: bf16[256,128], index: 13, kind: input, shape index: {}]   ;;  %s5135_s14 = inlined_call_operand.vmem [shape: f32[1,128], index: 14, kind: input, shape index: {}]   ;;  %s5136_s15 = inlined_call_operand.vmem [shape: bf16[1024,128], index: 15, kind: input, shape index: {}]   ;;  %s5137_s16 = inlined_call_operand.vmem [shape: f32[1,128], index: 16, kind: input, shape index: {}]   ;;  %s5138_s17 = inlined_call_operand.vmem [shape: bf16[128,256], index: 17, kind: input, shape index: {}]   ;;  %s5139_s18 = inlined_call_operand.vmem [shape: f32[1,256], index: 18, kind: input, shape index: {}]   ;;  %s5140_s19 = inlined_call_operand.vmem [shape: f32[1,256], index: 19, kind: input, shape index: {}]   ;;  %s5141_s20 = inlined_call_operand.vmem [shape: f32[1,256], index: 20, kind: input, shape index: {}]   ;;  %s5142_s21 = inlined_call_operand.vmem [shape: bf16[256,128], index: 21, kind: input, shape index: {}]   ;;  %s5143_s22 = inlined_call_operand.vmem [shape: f32[1,128], index: 22, kind: input, shape index: {}]   ;;  %s5144_s23 = inlined_call_operand.vmem [shape: f32[2,8,128], index: 23, kind: output, shape index: {0}]   ;;  %s5145_s24 = inlined_call_operand.vmem [shape: f32[2,8,128], index: 24, kind: output, shape index: {1}]  }
   0x1   :  { %5150 = sst [smem:[#allocation2_spill]] %s5121_s0 }
   0x2   :  { %5151 = sst [smem:[#allocation3_spill]] %s5122_s1 }
   0x3   :  { %5152 = sst [smem:[#allocation4_spill]] %s5123_s2 }
   0x4   :  { %5153 = sst [smem:[#allocation5_spill]] %s5124_s3 }
   0x5   :  { %5154 = sst [smem:[#allocation6_spill]] %s5125_s4 }
   0x6   :  { %5155 = sst [smem:[#allocation7_spill]] %s5126_s5  ;;  %s4312_s5 = smov 0  }
   0x7   :  { %5156 = sst [smem:[#allocation8_spill]] %s5127_s6 }
   0x8   :  { %5157 = sst [smem:[#allocation9_spill]] %s5128_s7 }
   0x9   :  { %5158 = sst [smem:[#allocation10_spill]] %s5129_s8 }
   0xa LB: > { %s3410_s26 = sadd.s32 4294967295, %s4184_s5   ;;  %p3414_p0 = scmp.ge.s32.totalorder %s4184_s5, 1  ;;  %s4184_s5 = sphi %s4312_s5, %s35_s5  }
   0xb   : > { %p665_p1 = scmp.lt.s32.totalorder %s4184_s5, 3 }
   0xd   : > { %p666_p2 = pnand %p3414_p0, %p665_p1 }
   0xe   : > { %s5159_s6 = sld [smem:[#allocation3_spill]] (!%p666_p2)  ;;  %p734_p3 = scmp.lt.s32.totalorder (!%p666_p2), %s3410_s26, 1 }
   0xf   : > { %669 = sbr.rel (%p666_p2) target bundleno = 1723 (0x6bb), region = 112  ;;  %s5160_s29 = sld [smem:[#allocation2_spill]] (!%p666_p2) }
  0x10   : > { %s5162_s8 = sld [smem:[#allocation4_spill]] (!%p666_p2) }
  0x11   : > { %s5163_s1 = sld [smem:[#allocation9_spill]] (!%p666_p2) }
  0x12   : > { %s5164_s25 = sld [smem:[#allocation6_spill]] (!%p666_p2) }
  0x13   : > { %s5166_s2 = sld [smem:[#allocation8_spill]] (!%p666_p2) }
  0x14   : > { %v3910_v0 = vld [vmem:[%s5159_s6 + $0x78] sm:$0xff]   ;;  %v3914_v4 = vld [vmem:[%s5159_s6 + $0x70] sm:$0xff]   ;;  %v3918_v8 = vld [vmem:[%s5159_s6 + $0x68] sm:$0xff]   ;;  %s5170_s26 = smov (!%p734_p3, %s3410_s26), 1 }
  0x15   : > { %v3911_v1 = vld [vmem:[%s5159_s6 + $0xf8] sm:$0xff]   ;;  %3659 = vmatprep.subr.bf16.mxu0 %v3910_v0  ;;  %v3915_v5 = vld [vmem:[%s5159_s6 + $0xf0] sm:$0xff]   ;;  %v3919_v9 = vld [vmem:[%s5159_s6 + $0xe8] sm:$0xff]   ;;  %s3658_s30 = sshll.u32 %s5170_s26, 5  ;;  %s5168_s27 = sshll.u32 %s5170_s26, 3 }
  0x16   : > { %v3912_v2 = vld [vmem:[%s5159_s6 + $0x38] sm:$0xff]   ;;  %3681 = vmatprep.subr.bf16.mxu1 %v3911_v1  ;;  %v3916_v6 = vld [vmem:[%s5159_s6 + $0x30] sm:$0xff]   ;;  %v3920_v10 = vld [vmem:[%s5159_s6 + $0x28] sm:$0xff]   ;;  %s4420_s0 = scalar_lea.vmem %s5160_s29, %s3658_s30  ;;  %s5161_s30 = sld [smem:[#allocation5_spill]] }
  0x17   : > { %v3913_v3 = vld [vmem:[%s5159_s6 + $0xb8] sm:$0xff]   ;;  %3660 = vmatpush3.bf16.msra.mxu0 %v3912_v2  ;;  %v3917_v7 = vld [vmem:[%s5159_s6 + $0xb0] sm:$0xff]   ;;  %v3921_v11 = vld [vmem:[%s5159_s6 + $0xa8] sm:$0xff]   ;;  %s5167_s29 = sld [smem:[#allocation10_spill]]  ;;  %s746_s7 = scalar_lea.vmem %s5145_s24, %s5168_s27 }
  0x18   : > { %3682 = vmatpush3.bf16.msra.mxu1 %v3913_v3  ;;  %3661 = vmatprep.subr.bf16.mxu0 %v3914_v4  ;;  %v3922_v12 = vld [vmem:[%s5159_s6 + $0x60] sm:$0xff]   ;;  %v3926_v16 = vld [vmem:[%s5159_s6 + $0x58] sm:$0xff]   ;;  %v3930_v20 = vld [vmem:[%s5159_s6 + $0x50] sm:$0xff]  }
  0x19   : > { %3683 = vmatprep.subr.bf16.mxu1 %v3915_v5  ;;  %v3923_v13 = vld [vmem:[%s5159_s6 + $0xe0] sm:$0xff]   ;;  %v3927_v17 = vld [vmem:[%s5159_s6 + $0xd8] sm:$0xff]   ;;  %v3931_v21 = vld [vmem:[%s5159_s6 + $0xd0] sm:$0xff]  }
  0x1a   : > { %v3924_v14 = vld [vmem:[%s5159_s6 + $0x20] sm:$0xff]   ;;  %v3928_v18 = vld [vmem:[%s5159_s6 + $0x18] sm:$0xff]   ;;  %v3932_v22 = vld [vmem:[%s5159_s6 + $0x10] sm:$0xff]  }
  0x1b   : > { %3662 = vmatpush3.bf16.msra.mxu0 %v3916_v6  ;;  %v3925_v15 = vld [vmem:[%s5159_s6 + $0xa0] sm:$0xff]   ;;  %v3929_v19 = vld [vmem:[%s5159_s6 + $0x98] sm:$0xff]   ;;  %v3933_v23 = vld [vmem:[%s5159_s6 + $0x90] sm:$0xff]  }
  0x1c   : > { %3684 = vmatpush3.bf16.msra.mxu1 %v3917_v7  ;;  %3663 = vmatprep.subr.bf16.mxu0 %v3918_v8  ;;  %v3934_v24 = vld [vmem:[%s5159_s6 + $0x48] sm:$0xff]   ;;  %v3938_v28 = vld [vmem:[%s5159_s6 + $0x40] sm:$0xff]   ;;  %v3946_v38 = vld [vmem:[%s5159_s6 + $0x178] sm:$0xff]  }
  0x1d   : > { %3685 = vmatprep.subr.bf16.mxu1 %v3919_v9  ;;  %v3935_v25 = vld [vmem:[%s5159_s6 + $0xc8] sm:$0xff]   ;;  %v3939_v29 = vld [vmem:[%s5159_s6 + $0xc0] sm:$0xff]   ;;  %v3947_v39 = vld [vmem:[%s5159_s6 + $0x1f8] sm:$0xff]  }
  0x1e   : > { %v3936_v26 = vld [vmem:[%s5159_s6 + $0x8] sm:$0xff]   ;;  %v3940_v30 = vld [vmem:[%s5159_s6] sm:$0xff]   ;;  %v3948_v40 = vld [vmem:[%s5159_s6 + $0x138] sm:$0xff]  }
  0x1f   : > { %3664 = vmatpush3.bf16.msra.mxu0 %v3920_v10  ;;  %v3937_v27 = vld [vmem:[%s5159_s6 + $0x88] sm:$0xff]   ;;  %v3941_v31 = vld [vmem:[%s5159_s6 + $0x80] sm:$0xff]   ;;  %v3949_v41 = vld [vmem:[%s5159_s6 + $0x1b8] sm:$0xff]  }
  0x20   : > { %3686 = vmatpush3.bf16.msra.mxu1 %v3921_v11  ;;  %3665 = vmatprep.subr.bf16.mxu0 %v3922_v12  ;;  %v748_v32 = vld [vmem:[%s4420_s0] sm:$0xff]  ;;  %v749_v33 = vld [vmem:[%s4420_s0 + $0x8] sm:$0xff]  ;;  %v3950_v42 = vld [vmem:[%s5159_s6 + $0x170] sm:$0xff]  }
  0x21   : > { %3687 = vmatprep.subr.bf16.mxu1 %v3923_v13  ;;  %v4430_v34 = vcombine.low %v748_v32, %v748_v32  ;;  %v4432_v35 = vcombine.high %v748_v32, %v748_v32  ;;  %v4434_v36 = vcombine.low %v749_v33, %v749_v33  ;;  %v4436_v37 = vcombine.high %v749_v33, %v749_v33  ;;  %v3951_v43 = vld [vmem:[%s5159_s6 + $0x1f0] sm:$0xff]   ;;  %v3954_v46 = vld [vmem:[%s5159_s6 + $0x168] sm:$0xff]   ;;  %v3958_v50 = vld [vmem:[%s5159_s6 + $0x160] sm:$0xff]  }
  0x22   : > { %v3952_v44 = vld [vmem:[%s5159_s6 + $0x130] sm:$0xff]   ;;  %v3955_v47 = vld [vmem:[%s5159_s6 + $0x1e8] sm:$0xff]   ;;  %v3959_v51 = vld [vmem:[%s5159_s6 + $0x1e0] sm:$0xff]  }
  0x23   : > { %3666 = vmatpush3.bf16.msra.mxu0 %v3924_v14  ;;  %1331 = vmatprep.mubr.bf16.mxu0 %v4432_v35  ;;  %v3953_v45 = vld [vmem:[%s5159_s6 + $0x1b0] sm:$0xff]   ;;  %v3956_v48 = vld [vmem:[%s5159_s6 + $0x128] sm:$0xff]   ;;  %v3960_v52 = vld [vmem:[%s5159_s6 + $0x120] sm:$0xff]  }
  0x24   : > { %3688 = vmatpush3.bf16.msra.mxu1 %v3925_v15  ;;  %3667 = vmatprep.subr.bf16.mxu0 %v3926_v16  ;;  %v3957_v49 = vld [vmem:[%s5159_s6 + $0x1a8] sm:$0xff]   ;;  %v3961_v53 = vld [vmem:[%s5159_s6 + $0x1a0] sm:$0xff]   ;;  %v3962_v54 = vld [vmem:[%s5159_s6 + $0x158] sm:$0xff]  }
  0x25   : > { %3689 = vmatprep.subr.bf16.mxu1 %v3927_v17  ;;  %1371 = vmatprep.mubr.bf16.mxu1 %v4436_v37  ;;  %v3963_v55 = vld [vmem:[%s5159_s6 + $0x1d8] sm:$0xff]   ;;  %v3966_v58 = vld [vmem:[%s5159_s6 + $0x150] sm:$0xff]   ;;  %v3970_v62 = vld [vmem:[%s5159_s6 + $0x148] sm:$0xff]  }
  0x26   : > { %v3964_v56 = vld [vmem:[%s5159_s6 + $0x118] sm:$0xff]   ;;  %v3967_v59 = vld [vmem:[%s5159_s6 + $0x1d0] sm:$0xff]   ;;  %v3971_v63 = vld [vmem:[%s5159_s6 + $0x1c8] sm:$0xff]  }
  0x27   : > { %3668 = vmatpush3.bf16.msra.mxu0 %v3928_v18  ;;  %v3965_v57 = vld [vmem:[%s5159_s6 + $0x198] sm:$0xff]   ;;  %v3968_v60 = vld [vmem:[%s5159_s6 + $0x110] sm:$0xff]   ;;  %v3972_v0 = vld [vmem:[%s5159_s6 + $0x108] sm:$0xff]  }
  0x28   : > { %3690 = vmatpush3.bf16.msra.mxu1 %v3929_v19  ;;  %3669 = vmatprep.subr.bf16.mxu0 %v3930_v20  ;;  %v3969_v61 = vld [vmem:[%s5159_s6 + $0x190] sm:$0xff]   ;;  %v3973_v1 = vld [vmem:[%s5159_s6 + $0x188] sm:$0xff]   ;;  %v3974_v2 = vld [vmem:[%s5159_s6 + $0x140] sm:$0xff]  }
  0x29   : > { %3691 = vmatprep.subr.bf16.mxu1 %v3931_v21  ;;  %v3975_v3 = vld [vmem:[%s5159_s6 + $0x1c0] sm:$0xff]   ;;  %v750_v6 = vld [vmem:[%s4420_s0 + $0x10] sm:$0xff]  ;;  %v751_v9 = vld [vmem:[%s4420_s0 + $0x18] sm:$0xff]  ;;  %s5165_s0 = sld [smem:[#allocation7_spill]] }
  0x2a   : > { %v3976_v4 = vld [vmem:[%s5159_s6 + $0x100] sm:$0xff]   ;;  %v4539_v7 = vcombine.low %v750_v6, %v750_v6  ;;  %v4541_v8 = vcombine.high %v750_v6, %v750_v6  ;;  %v4544_v10 = vcombine.low %v751_v9, %v751_v9  ;;  %v4546_v11 = vcombine.high %v751_v9, %v751_v9  ;;  %v3982_v12 = vld [vmem:[%s5161_s30 + $0x70] ss:$8 sps:$4 sm:$0xff]   ;;  %v3984_v13 = vld [vmem:[%s5161_s30 + $0x74] ss:$8 sps:$4 sm:$0xff]  }
  0x2b   : > { %3670 = vmatpush3.bf16.msra.mxu0 %v3932_v22  ;;  %v3977_v5 = vld [vmem:[%s5159_s6 + $0x180] sm:$0xff]   ;;  %v3990_v16 = vld [vmem:[%s5161_s30 + $0x54] ss:$8 sps:$4 sm:$0xff]   ;;  %v3988_v17 = vld [vmem:[%s5161_s30 + $0x50] ss:$8 sps:$4 sm:$0xff]  }
  0x2c   : > { %3692 = vmatpush3.bf16.msra.mxu1 %v3933_v23  ;;  %3671 = vmatprep.subr.bf16.mxu0 %v3934_v24  ;;  %v3987_v14 = vld [vmem:[%s5161_s30 + $0x64] ss:$8 sps:$4 sm:$0xff]   ;;  %v3985_v15 = vld [vmem:[%s5161_s30 + $0x60] ss:$8 sps:$4 sm:$0xff]   ;;  %v3996_v20 = vld [vmem:[%s5161_s30 + $0x34] ss:$8 sps:$4 sm:$0xff]  }
  0x2d   : > { %3693 = vmatprep.subr.bf16.mxu1 %v3935_v25  ;;  %v3993_v18 = vld [vmem:[%s5161_s30 + $0x44] ss:$8 sps:$4 sm:$0xff]   ;;  %v3991_v19 = vld [vmem:[%s5161_s30 + $0x40] ss:$8 sps:$4 sm:$0xff]   ;;  %v3994_v21 = vld [vmem:[%s5161_s30 + $0x30] ss:$8 sps:$4 sm:$0xff]  }
  0x2e   : > { %v3999_v22 = vld [vmem:[%s5161_s30 + $0x24] ss:$8 sps:$4 sm:$0xff]   ;;  %v3997_v23 = vld [vmem:[%s5161_s30 + $0x20] ss:$8 sps:$4 sm:$0xff]   ;;  %v4002_v24 = vld [vmem:[%s5161_s30 + $0x14] ss:$8 sps:$4 sm:$0xff]  }
  0x2f   : > { %3672 = vmatpush3.bf16.msra.mxu0 %v3936_v26  ;;  %v4000_v25 = vld [vmem:[%s5161_s30 + $0x10] ss:$8 sps:$4 sm:$0xff]   ;;  %v4005_v26 = vld [vmem:[%s5161_s30 + $0x4] ss:$8 sps:$4 sm:$0xff]  }
  0x30   : > { %3694 = vmatpush3.bf16.msra.mxu1 %v3937_v27  ;;  %3673 = vmatprep.subr.bf16.mxu0 %v3938_v28  ;;  %v4003_v27 = vld [vmem:[%s5161_s30] ss:$8 sps:$4 sm:$0xff]   ;;  %v4186_v28 = vmov 0   ;;  %v4017_v6 = vld [vmem:[%s5163_s1 + $0x10] sm:$0xff]  }
  0x31   : > { %3695 = vmatprep.subr.bf16.mxu1 %v3939_v29  ;;  %v4018_v9 = vld [vmem:[%s5163_s1 + $0x48] sm:$0xff]  }
  0x33   : > { %3674 = vmatpush3.bf16.msra.mxu0 %v3940_v30 }
  0x34   : > { %3696 = vmatpush3.bf16.msra.mxu1 %v3941_v31  ;;  %3703 = vmatprep.subr.bf16.mxu0 %v3946_v38 }
  0x35   : > { %3725 = vmatprep.subr.bf16.mxu1 %v3947_v39 }
  0x36   : > { %1332 = vmatmul.mubr.bf16.vlgmr.msra.gmra.mxu0 %v4430_v34 }
  0x37   : > { %1372 = vmatmul.mubr.bf16.vlgmr.msra.gmra.mxu1 %v4434_v36  ;;  %3704 = vmatpush3.bf16.msra.mxu0 %v3948_v40 }
  0x38   : > { %3726 = vmatpush3.bf16.msra.mxu1 %v3949_v41  ;;  %3705 = vmatprep.subr.bf16.mxu0 %v3950_v42  ;;  %v3419_v42 = vld [vmem:[%s5162_s8] ss:$0 sm:$0xff] }
  0x39   : > { %3727 = vmatprep.subr.bf16.mxu1 %v3951_v43  ;;  %1411 = vmatprep.mubr.bf16.mxu0 %v4541_v8 }
  0x3a   : > { %1451 = vmatprep.mubr.bf16.mxu1 %v4546_v11 }
  0x3b   : > { %3706 = vmatpush3.bf16.msra.mxu0 %v3952_v44 }
  0x3c   : > { %3728 = vmatpush3.bf16.msra.mxu1 %v3953_v45  ;;  %3707 = vmatprep.subr.bf16.mxu0 %v3954_v46 }
  0x3d   : > { %3729 = vmatprep.subr.bf16.mxu1 %v3955_v47 }
  0x3f   : > { %3708 = vmatpush3.bf16.msra.mxu0 %v3956_v48 }
  0x40   : > { %3730 = vmatpush3.bf16.msra.mxu1 %v3957_v49  ;;  %3709 = vmatprep.subr.bf16.mxu0 %v3958_v50 }
  0x41   : > { %3731 = vmatprep.subr.bf16.mxu1 %v3959_v51 }
  0x43   : > { %3710 = vmatpush3.bf16.msra.mxu0 %v3960_v52 }
  0x44   : > { %3732 = vmatpush3.bf16.msra.mxu1 %v3961_v53  ;;  %3711 = vmatprep.subr.bf16.mxu0 %v3962_v54 }
  0x45   : > { %3733 = vmatprep.subr.bf16.mxu1 %v3963_v55 }
  0x47   : > { %3712 = vmatpush3.bf16.msra.mxu0 %v3964_v56 }
  0x48   : > { %3734 = vmatpush3.bf16.msra.mxu1 %v3965_v57  ;;  %3713 = vmatprep.subr.bf16.mxu0 %v3966_v58 }
  0x49   : > { %3735 = vmatprep.subr.bf16.mxu1 %v3967_v59  ;;  %v4006_v59 = vld [vmem:[%s5163_s1 + $0x78] sm:$0xff]  }
  0x4b   : > { %3714 = vmatpush3.bf16.msra.mxu0 %v3968_v60  ;;  %v4007_v60 = vld [vmem:[%s5163_s1 + $0x38] sm:$0xff]  }
  0x4c   : > { %3736 = vmatpush3.bf16.msra.mxu1 %v3969_v61  ;;  %3715 = vmatprep.subr.bf16.mxu0 %v3970_v62  ;;  %v4008_v61 = vld [vmem:[%s5163_s1 + $0x70] sm:$0xff]  }
  0x4d   : > { %3737 = vmatprep.subr.bf16.mxu1 %v3971_v63  ;;  %v4009_v62 = vld [vmem:[%s5163_s1 + $0x30] sm:$0xff]   ;;  %v4010_v63 = vld [vmem:[%s5163_s1 + $0x68] sm:$0xff]  }
  0x4f   : > { %3716 = vmatpush3.bf16.msra.mxu0 %v3972_v0  ;;  %v4011_v0 = vld [vmem:[%s5163_s1 + $0x28] sm:$0xff]  }
  0x50   : > { %3738 = vmatpush3.bf16.msra.mxu1 %v3973_v1  ;;  %3717 = vmatprep.subr.bf16.mxu0 %v3974_v2  ;;  %v4012_v1 = vld [vmem:[%s5163_s1 + $0x60] sm:$0xff]  }
  0x51   : > { %3739 = vmatprep.subr.bf16.mxu1 %v3975_v3  ;;  %v4013_v2 = vld [vmem:[%s5163_s1 + $0x20] sm:$0xff]   ;;  %v4014_v3 = vld [vmem:[%s5163_s1 + $0x58] sm:$0xff]  }
  0x53   : > { %3718 = vmatpush3.bf16.msra.mxu0 %v3976_v4  ;;  %v4015_v4 = vld [vmem:[%s5163_s1 + $0x18] sm:$0xff]  }
  0x54   : > { %3740 = vmatpush3.bf16.msra.mxu1 %v3977_v5  ;;  %1603 = vmatprep.subr.bf16.mxu0 %v3984_v13  ;;  %v4016_v5 = vld [vmem:[%s5163_s1 + $0x50] sm:$0xff]   ;;  %v4020_v13 = vld [vmem:[%s5163_s1 + $0x40] sm:$0xff]  }
  0x55   : > { %3747 = vmatprep.subr.bf16.mxu1 %v4006_v59 }
  0x56   : > { %1412 = vmatmul.mubr.bf16.vlgmr.msra.gmra.mxu0 %v4539_v7 }
  0x57   : > { %1452 = vmatmul.mubr.bf16.vlgmr.msra.gmra.mxu1 %v4544_v10  ;;  %1604 = vmatpush1.bf16.msra.mxu0 %v3982_v12  ;;  %v4019_v12 = vld [vmem:[%s5163_s1 + $0x8] sm:$0xff]  }
  0x58   : > { %1605 = vmatprep.subr.bf16.mxu0 %v3987_v14  ;;  %1635 = vmatprep.mubr.bf16.mxu0 %v4186_v28  ;;  %v4021_v14 = vld [vmem:[%s5163_s1] sm:$0xff]  }
  0x59   : > { %3748 = vmatpush3.bf16.msra.mxu1 %v4007_v60 }
  0x5a   : > { %3749 = vmatprep.subr.bf16.mxu1 %v4008_v61 }
  0x5b   : > { %1606 = vmatpush1.bf16.msra.mxu0 %v3985_v15  ;;  %v4022_v15 = vld [vmem:[%s5130_s9 + $0x70] ss:$8 sps:$4 sm:$0xff]  }
  0x5c   : > { %1607 = vmatprep.subr.bf16.mxu0 %v3990_v16  ;;  %v4024_v16 = vld [vmem:[%s5130_s9 + $0x74] ss:$8 sps:$4 sm:$0xff]  }
  0x5d   : > { %3750 = vmatpush3.bf16.msra.mxu1 %v4009_v62 }
  0x5e   : > { %3751 = vmatprep.subr.bf16.mxu1 %v4010_v63 }
  0x5f   : > { %1608 = vmatpush1.bf16.msra.mxu0 %v3988_v17  ;;  %v4027_v17 = vld [vmem:[%s5130_s9 + $0x64] ss:$8 sps:$4 sm:$0xff]  }
  0x60   : > { %1609 = vmatprep.subr.bf16.mxu0 %v3993_v18  ;;  %v4025_v18 = vld [vmem:[%s5130_s9 + $0x60] ss:$8 sps:$4 sm:$0xff]  }
  0x61   : > { %3752 = vmatpush3.bf16.msra.mxu1 %v4011_v0 }
  0x62   : > { %3753 = vmatprep.subr.bf16.mxu1 %v4012_v1 }
  0x63   : > { %1610 = vmatpush1.bf16.msra.mxu0 %v3991_v19  ;;  %v4030_v19 = vld [vmem:[%s5130_s9 + $0x54] ss:$8 sps:$4 sm:$0xff]  }
  0x64   : > { %1611 = vmatprep.subr.bf16.mxu0 %v3996_v20  ;;  %v4028_v20 = vld [vmem:[%s5130_s9 + $0x50] ss:$8 sps:$4 sm:$0xff]  }
  0x65   : > { %3754 = vmatpush3.bf16.msra.mxu1 %v4013_v2 }
  0x66   : > { %3755 = vmatprep.subr.bf16.mxu1 %v4014_v3 }
  0x67   : > { %1612 = vmatpush1.bf16.msra.mxu0 %v3994_v21  ;;  %v4033_v21 = vld [vmem:[%s5130_s9 + $0x44] ss:$8 sps:$4 sm:$0xff]  }
  0x68   : > { %1613 = vmatprep.subr.bf16.mxu0 %v3999_v22  ;;  %v4031_v22 = vld [vmem:[%s5130_s9 + $0x40] ss:$8 sps:$4 sm:$0xff]  }
  0x69   : > { %3756 = vmatpush3.bf16.msra.mxu1 %v4015_v4 }
  0x6a   : > { %3757 = vmatprep.subr.bf16.mxu1 %v4016_v5 }
  0x6b   : > { %1614 = vmatpush1.bf16.msra.mxu0 %v3997_v23  ;;  %v4036_v23 = vld [vmem:[%s5130_s9 + $0x34] ss:$8 sps:$4 sm:$0xff]  }
  0x6c   : > { %1615 = vmatprep.subr.bf16.mxu0 %v4002_v24  ;;  %v4034_v24 = vld [vmem:[%s5130_s9 + $0x30] ss:$8 sps:$4 sm:$0xff]  }
  0x6d   : > { %3758 = vmatpush3.bf16.msra.mxu1 %v4017_v6 }
  0x6e   : > { %3759 = vmatprep.subr.bf16.mxu1 %v4018_v9 }
  0x6f   : > { %1616 = vmatpush1.bf16.msra.mxu0 %v4000_v25  ;;  %v4039_v25 = vld [vmem:[%s5130_s9 + $0x24] ss:$8 sps:$4 sm:$0xff]  }
  0x70   : > { %1617 = vmatprep.subr.bf16.mxu0 %v4005_v26  ;;  %v4037_v26 = vld [vmem:[%s5130_s9 + $0x20] ss:$8 sps:$4 sm:$0xff]  }
  0x71   : > { %3760 = vmatpush3.bf16.msra.mxu1 %v4019_v12 }
  0x72   : > { %3761 = vmatprep.subr.bf16.mxu1 %v4020_v13 }
  0x73   : > { %1618 = vmatpush1.bf16.msra.mxu0 %v4003_v27  ;;  %v1513_v27 = vlaneseq }
  0x74   : > { %1999 = vmatprep.subr.bf16.mxu0 %v4024_v16 }
  0x75   : > { %3762 = vmatpush3.bf16.msra.mxu1 %v4021_v14 }
  0xf6   : > { %v3675_v29 = vpop.f32.mrf.mxu0 }
  0xf7   : > { %v3697_v30 = vpop.f32.mrf.mxu1 }
  0xf8   : > { %v3676_v31 = vpop.f32.mrf.mxu0 }
  0xf9   : > { %v3698_v32 = vpop.f32.mrf.mxu1  ;;  %v3677_v41 = vadd.f32 %v3676_v31, %v3675_v29  ;;  %v1514_v29 = vshrl.u32 %v1513_v27, 7  ;;  %v1475_v31 = vld [vmem:[%s5164_s25] sm:$0x3] }
  0xfa   : > { %v3678_v33 = vpop.f32.mrf.mxu0  ;;  %v3699_v44 = vadd.f32 %v3698_v32, %v3697_v30 }
  0xfb   : > { %v3700_v38 = vpop.f32.mrf.mxu1  ;;  %v1334_v43 = vadd.f32 %v3677_v41, %v3419_v42  ;;  %v4689_v30 = vsub.s32 0, %v1514_v29  ;;  %v4694_v32 = vsub.s32 1, %v1514_v29 }
  0xfc   : > { %v3679_v39 = vpop.f32.mrf.mxu0 }
  0xfd   : > { %v3701_v40 = vpop.f32.mrf.mxu1  ;;  %v1374_v49 = vadd.f32 %v3699_v44, %v1334_v43  ;;  %v1516_v33 = vrot.slane %v1475_v31, %v4689_v30  ;;  %v1520_v38 = vrot.slane %v1475_v31, %v4694_v32 }
 0x116   : > { %v3719_v45 = vpop.f32.mrf.mxu0 }
 0x117   : > { %v3741_v46 = vpop.f32.mrf.mxu1 }
 0x118   : > { %v3720_v47 = vpop.f32.mrf.mxu0 }
 0x119   : > { %v3742_v48 = vpop.f32.mrf.mxu1  ;;  %v3721_v50 = vadd.f32 %v3720_v47, %v3719_v45 }
 0x11a   : > { %v3722_v51 = vpop.f32.mrf.mxu0  ;;  %v3743_v54 = vadd.f32 %v3742_v48, %v3741_v46 }
 0x11b   : > { %v3744_v52 = vpop.f32.mrf.mxu1  ;;  %v1414_v53 = vadd.f32 %v3721_v50, %v1374_v49 }
 0x11c   : > { %v3723_v55 = vpop.f32.mrf.mxu0 }
 0x11d   : > { %v3745_v56 = vpop.f32.mrf.mxu1  ;;  %v1454_v57 = vadd.f32 %v3743_v54, %v1414_v53 }
 0x11f   : > { %v1511_v58 = vpack.c.bf16 %v1454_v57, %v1454_v57 }
 0x121   : > { %1636 = vmatmul.mubr.bf16.vlgmr.msra.gmra.mxu0 %v1511_v58 }
 0x122   : > { %2031 = vmatprep.mubr.bf16.mxu0 %v4186_v28  ;;  %2000 = vmatpush1.bf16.msra.mxu0 %v4022_v15 }
 0x123   : > { %2001 = vmatprep.subr.bf16.mxu0 %v4027_v17 }
 0x126   : > { %2002 = vmatpush1.bf16.msra.mxu0 %v4025_v18 }
 0x127   : > { %2003 = vmatprep.subr.bf16.mxu0 %v4030_v19  ;;  %v1476_v19 = vld [vmem:[%s5165_s0] sm:$0x3] }
 0x12a   : > { %2004 = vmatpush1.bf16.msra.mxu0 %v4028_v20  ;;  %v1477_v20 = vld [vmem:[%s5166_s2] sm:$0x3]  ;;  %s5149_s2 = sshll.u32 %s5170_s26, 3 }
 0x12b   : > { %2005 = vmatprep.subr.bf16.mxu0 %v4033_v21  ;;  %v1687_v21 = vrot.slane %v1476_v19, %v4689_v30  ;;  %v1704_v31 = vrot.slane %v1477_v20, %v4694_v32  ;;  %s742_s8 = scalar_lea.vmem %s5144_s23, %s5149_s2 }
 0x12e   : > { %2006 = vmatpush1.bf16.msra.mxu0 %v4031_v22 }
 0x12f   : > { %2007 = vmatprep.subr.bf16.mxu0 %v4036_v23 }
 0x132   : > { %2008 = vmatpush1.bf16.msra.mxu0 %v4034_v24  ;;  %v1691_v24 = vrot.slane %v1476_v19, %v4694_v32  ;;  %v4070_v19 = vld [vmem:[%s5134_s13 + $0x48] sm:$0xff]  }
 0x133   : > { %2009 = vmatprep.subr.bf16.mxu0 %v4039_v25  ;;  %v1700_v25 = vrot.slane %v1477_v20, %v4689_v30  ;;  %v4071_v20 = vld [vmem:[%s5134_s13 + $0x8] sm:$0xff]  }
 0x136   : > { %2010 = vmatpush1.bf16.msra.mxu0 %v4037_v26 }
 0x1e1   : > { %v1637_v39 = vpop.f32.mrf.mxu0 }
 0x1e2   : > { %v1638_v40 = vadd.f32 %v1637_v39, %v1516_v33 }
 0x1e3   : > { %v1639_v41 = vpop.f32.mrf.mxu0 }
 0x1e4   : > { %v1644_v42 = vrot.slane %v1638_v40, 4  ;;  %v1640_v43 = vadd.f32 %v1639_v41, %v1520_v38 }
 0x1e5   : > { %v1641_v44 = vpop.f32.mrf.mxu0 }
 0x1e6   : > { %v1645_v45 = vadd.f32 %v1644_v42, %v1638_v40  ;;  %v1650_v46 = vrot.slane %v1640_v43, 4  ;;  %v4042_v44 = vld [vmem:[%s5130_s9 + $0x14] ss:$8 sps:$4 sm:$0xff]  }
 0x1e7   : > { %v1642_v47 = vpop.f32.mrf.mxu0  ;;  %2011 = vmatprep.subr.bf16.mxu0 %v4042_v44  ;;  %v4101_v44 = vld [vmem:[%s5136_s15 + $0x110] sm:$0xff]  }
 0x1e8   : > { %v1646_v48 = vrot.slane %v1645_v45, 2  ;;  %v1651_v49 = vadd.f32 %v1650_v46, %v1640_v43  ;;  %v4045_v46 = vld [vmem:[%s5130_s9 + $0x4] ss:$8 sps:$4 sm:$0xff]   ;;  %v4043_v47 = vld [vmem:[%s5130_s9] ss:$8 sps:$4 sm:$0xff]  }
 0x1ea   : > { %v1647_v50 = vadd.f32 %v1646_v48, %v1645_v45  ;;  %v1652_v51 = vrot.slane %v1651_v49, 2  ;;  %v4040_v45 = vld [vmem:[%s5130_s9 + $0x10] ss:$8 sps:$4 sm:$0xff]  }
 0x1eb   : > { %2012 = vmatpush1.bf16.msra.mxu0 %v4040_v45  ;;  %v4104_v45 = vld [vmem:[%s5136_s15 + $0x148] sm:$0xff]  }
 0x1ec   : > { %v1648_v52 = vrot.slane %v1647_v50, 1  ;;  %v1653_v53 = vadd.f32 %v1652_v51, %v1651_v49  ;;  %2013 = vmatprep.subr.bf16.mxu0 %v4045_v46  ;;  %v3508_v49 = vld [vmem:[%s5167_s29] ss:$0 sm:$0xff]  ;;  %v4105_v46 = vld [vmem:[%s5136_s15 + $0x108] sm:$0xff]  }
 0x1ee   : > { %v1649_v54 = vadd.f32 %v1648_v52, %v1647_v50  ;;  %v1654_v55 = vrot.slane %v1653_v53, 1 }
 0x1ef   : > { %2014 = vmatpush1.bf16.msra.mxu0 %v4043_v47  ;;  %v4108_v47 = vld [vmem:[%s5136_s15 + $0x140] sm:$0xff]  }
 0x1f0   : > { %v1657_v56 = vmul.f32 0.125, %v1649_v54  ;;  %v1655_v57 = vadd.f32 %v1654_v55, %v1653_v53 }
 0x1f2   : > { %v1659_v58 = vsub.f32 %v1638_v40, %v1657_v56  ;;  %v1658_v59 = vmul.f32 0.125, %v1655_v57  ;;  %v4046_v56 = vld [vmem:[%s5134_s13 + $0x78] sm:$0xff]  }
 0x1f3   : > { %v4047_v57 = vld [vmem:[%s5134_s13 + $0x38] sm:$0xff]   ;;  %3769 = vmatprep.subr.bf16.mxu1 %v4046_v56 }
 0x1f4   : > { %v1661_v60 = vmul.f32 %v1659_v58, %v1659_v58  ;;  %v1660_v61 = vsub.f32 %v1640_v43, %v1658_v59  ;;  %v4049_v59 = vld [vmem:[%s5136_s15 + $0x38] sm:$0xff]  }
 0x1f6   : > { %v1663_v62 = vrot.slane %v1661_v60, 4  ;;  %v1662_v63 = vmul.f32 %v1660_v61, %v1660_v61 }
 0x1f8   : > { %v1664_v0 = vadd.f32 %v1663_v62, %v1661_v60  ;;  %v1669_v1 = vrot.slane %v1662_v63, 4  ;;  %v4051_v60 = vld [vmem:[%s5134_s13 + $0x30] sm:$0xff]  }
 0x1f9   : > { %v4053_v62 = vld [vmem:[%s5136_s15 + $0x30] sm:$0xff]  }
 0x1fa   : > { %v1665_v2 = vrot.slane %v1664_v0, 2  ;;  %v1670_v3 = vadd.f32 %v1669_v1, %v1662_v63  ;;  %v4054_v63 = vld [vmem:[%s5134_s13 + $0x68] sm:$0xff]  }
 0x1fb   : > { %v4056_v1 = vld [vmem:[%s5136_s15 + $0x68] sm:$0xff]  }
 0x1fc   : > { %v1666_v4 = vadd.f32 %v1665_v2, %v1664_v0  ;;  %v1671_v5 = vrot.slane %v1670_v3, 2  ;;  %v4055_v0 = vld [vmem:[%s5134_s13 + $0x28] sm:$0xff]  }
 0x1fd   : > { %v4057_v2 = vld [vmem:[%s5136_s15 + $0x28] sm:$0xff]  }
 0x1fe   : > { %v1667_v6 = vrot.slane %v1666_v4, 1  ;;  %v1672_v9 = vadd.f32 %v1671_v5, %v1670_v3  ;;  %v4058_v3 = vld [vmem:[%s5134_s13 + $0x60] sm:$0xff]  }
 0x1ff   : > { %v4060_v5 = vld [vmem:[%s5136_s15 + $0x60] sm:$0xff]  }
 0x200   : > { %v1668_v12 = vadd.f32 %v1667_v6, %v1666_v4  ;;  %v1673_v13 = vrot.slane %v1672_v9, 1  ;;  %v4059_v4 = vld [vmem:[%s5134_s13 + $0x20] sm:$0xff]  }
 0x201   : > { %v4061_v6 = vld [vmem:[%s5136_s15 + $0x20] sm:$0xff]  }
 0x202   : > { %v1675_v14 = vmul.f32 0.125, %v1668_v12  ;;  %v1674_v15 = vadd.f32 %v1673_v13, %v1672_v9  ;;  %v4062_v9 = vld [vmem:[%s5134_s13 + $0x58] sm:$0xff]  }
 0x203   : > { %v4063_v12 = vld [vmem:[%s5134_s13 + $0x18] sm:$0xff]  }
 0x204   : > { %v1677_v16 = vadd.f32 1e-05, %v1675_v14  ;;  %v1676_v17 = vmul.f32 0.125, %v1674_v15  ;;  %v4064_v13 = vld [vmem:[%s5136_s15 + $0x58] sm:$0xff]   ;;  %v4066_v15 = vld [vmem:[%s5134_s13 + $0x50] sm:$0xff]  }
 0x205   : > { %v4065_v14 = vld [vmem:[%s5136_s15 + $0x18] sm:$0xff]  }
 0x206   : > { %4166 = vrsqrt.f32 %v1677_v16  ;;  %v1678_v18 = vadd.f32 1e-05, %v1676_v17  ;;  %v4067_v16 = vld [vmem:[%s5134_s13 + $0x10] sm:$0xff]  }
 0x207   : > { %v4068_v17 = vld [vmem:[%s5136_s15 + $0x50] sm:$0xff]  }
 0x208   : > { %4168 = vrsqrt.f32 %v1678_v18  ;;  %v4069_v18 = vld [vmem:[%s5136_s15 + $0x10] sm:$0xff]  }
 0x213   : > { %v4167_v22 = vpop.eup %4166 }
 0x214   : > { %v1681_v23 = vmul.f32 %v4167_v22, %v1659_v58  ;;  %v4048_v58 = vld [vmem:[%s5136_s15 + $0x78] sm:$0xff]   ;;  %v4073_v22 = vld [vmem:[%s5136_s15 + $0x8] sm:$0xff]  }
 0x215   : > { %v4169_v26 = vpop.eup %4168  ;;  %3791 = vmatprep.subr.bf16.mxu0 %v4048_v58 }
 0x216   : > { %v1694_v27 = vmul.f32 %v1687_v21, %v1681_v23  ;;  %v1682_v29 = vmul.f32 %v4169_v26, %v1660_v61  ;;  %v4052_v61 = vld [vmem:[%s5136_s15 + $0x70] sm:$0xff]   ;;  %v4072_v21 = vld [vmem:[%s5136_s15 + $0x48] sm:$0xff]   ;;  %v4074_v23 = vld [vmem:[%s5134_s13 + $0x40] sm:$0xff]  }
 0x217   : > { %v4077_v26 = vld [vmem:[%s5136_s15] sm:$0xff]  }
 0x218   : > { %v1695_v33 = vmul.f32 %v1691_v24, %v1682_v29  ;;  %v1707_v38 = vadd.f32 %v1700_v25, %v1694_v27  ;;  %v4076_v24 = vld [vmem:[%s5136_s15 + $0x40] sm:$0xff]   ;;  %v4078_v27 = vld [vmem:[%s5136_s15 + $0xf8] sm:$0xff]  }
 0x219   : > { %v4075_v25 = vld [vmem:[%s5134_s13] sm:$0xff]   ;;  %v4080_v29 = vld [vmem:[%s5136_s15 + $0x178] sm:$0xff]  }
 0x21a   : > { %v1708_v39 = vadd.f32 %v1704_v31, %v1695_v33  ;;  %v1709_v40 = vmax.f32 %v1707_v38, 0.0  ;;  %v4081_v31 = vld [vmem:[%s5136_s15 + $0x138] sm:$0xff]   ;;  %v4084_v33 = vld [vmem:[%s5136_s15 + $0x170] sm:$0xff]  }
 0x21b   : > { %v4085_v38 = vld [vmem:[%s5136_s15 + $0x130] sm:$0xff]  }
 0x21c   : > { %v1710_v41 = vmax.f32 %v1708_v39, 0.0  ;;  %v1711_v43 = vpack.c.bf16 %v1709_v40, %v1709_v40  ;;  %v4089_v39 = vld [vmem:[%s5136_s15 + $0x128] sm:$0xff]   ;;  %v4093_v40 = vld [vmem:[%s5136_s15 + $0x120] sm:$0xff]  }
 0x21e   : > { %v1712_v42 = vpack.c.bf16 %v1710_v41, %v1710_v41  ;;  %v4096_v41 = vld [vmem:[%s5136_s15 + $0x158] sm:$0xff]  }
 0x220   : > { %1847 = vmatprep.mubr.bf16.mxu1 %v1712_v42  ;;  %v4097_v42 = vld [vmem:[%s5136_s15 + $0x118] sm:$0xff]  }
 0x221   : > { %1848 = vmatmul.mubr.bf16.vlgmr.msra.gmra.mxu1 %v1711_v43  ;;  %v4100_v43 = vld [vmem:[%s5136_s15 + $0x150] sm:$0xff]  }
 0x222   : > { %3770 = vmatpush3.bf16.msra.mxu1 %v4047_v57 }
 0x2e1   : > { %v3763_v48 = vpop.f32.mrf.mxu1 }
 0x2e3   : > { %v3764_v50 = vpop.f32.mrf.mxu1 }
 0x2e4   : > { %v3765_v51 = vadd.f32 %v3764_v50, %v3763_v48  ;;  %v4109_v48 = vld [vmem:[%s5136_s15 + $0x100] sm:$0xff]  }
 0x2e5   : > { %v3766_v52 = vpop.f32.mrf.mxu1 }
 0x2e6   : > { %v1850_v53 = vadd.f32 %v3765_v51, %v3508_v49  ;;  %v1871_v49 = vld [vmem:[%s5131_s10] sm:$0x3] }
 0x2e7   : > { %v3767_v54 = vpop.f32.mrf.mxu1  ;;  %v1912_v50 = vrot.slane %v1871_v49, %v4689_v30  ;;  %v1916_v51 = vrot.slane %v1871_v49, %v4694_v32 }
 0x2e8   : > { %v1907_v55 = vpack.c.bf16 %v1850_v53, %v1850_v53 }
 0x2ea   : > { %2032 = vmatmul.mubr.bf16.vlgmr.msra.gmra.mxu0 %v1907_v55 }
 0x2eb   : > { %2802 = vmatprep.mubr.bf16.mxu0 %v4432_v35  ;;  %v4050_v35 = vld [vmem:[%s5134_s13 + $0x70] sm:$0xff]   ;;  %3792 = vmatpush3.bf16.msra.mxu0 %v4049_v59 }
 0x2ec   : > { %3771 = vmatprep.subr.bf16.mxu1 %v4050_v35  ;;  %3793 = vmatprep.subr.bf16.mxu0 %v4052_v61 }
 0x2ed   : > { %3772 = vmatpush3.bf16.msra.mxu1 %v4051_v60 }
 0x2ee   : > { %3773 = vmatprep.subr.bf16.mxu1 %v4054_v63 }
 0x2ef   : > { %3794 = vmatpush3.bf16.msra.mxu0 %v4053_v62 }
 0x2f0   : > { %3795 = vmatprep.subr.bf16.mxu0 %v4056_v1 }
 0x2f1   : > { %3774 = vmatpush3.bf16.msra.mxu1 %v4055_v0 }
 0x2f2   : > { %3775 = vmatprep.subr.bf16.mxu1 %v4058_v3 }
 0x2f3   : > { %3796 = vmatpush3.bf16.msra.mxu0 %v4057_v2 }
 0x2f4   : > { %3797 = vmatprep.subr.bf16.mxu0 %v4060_v5 }
 0x2f5   : > { %3776 = vmatpush3.bf16.msra.mxu1 %v4059_v4 }
 0x2f6   : > { %3777 = vmatprep.subr.bf16.mxu1 %v4062_v9 }
 0x2f7   : > { %3798 = vmatpush3.bf16.msra.mxu0 %v4061_v6 }
 0x2f8   : > { %3799 = vmatprep.subr.bf16.mxu0 %v4064_v13 }
 0x2f9   : > { %3778 = vmatpush3.bf16.msra.mxu1 %v4063_v12 }
 0x2fa   : > { %3779 = vmatprep.subr.bf16.mxu1 %v4066_v15 }
 0x2fb   : > { %3800 = vmatpush3.bf16.msra.mxu0 %v4065_v14 }
 0x2fc   : > { %3801 = vmatprep.subr.bf16.mxu0 %v4068_v17 }
 0x2fd   : > { %3780 = vmatpush3.bf16.msra.mxu1 %v4067_v16 }
 0x2fe   : > { %3781 = vmatprep.subr.bf16.mxu1 %v4070_v19 }
 0x2ff   : > { %3802 = vmatpush3.bf16.msra.mxu0 %v4069_v18 }
 0x300   : > { %3803 = vmatprep.subr.bf16.mxu0 %v4072_v21 }
 0x301   : > { %3782 = vmatpush3.bf16.msra.mxu1 %v4071_v20 }
 0x302   : > { %3783 = vmatprep.subr.bf16.mxu1 %v4074_v23 }
 0x303   : > { %3804 = vmatpush3.bf16.msra.mxu0 %v4073_v22 }
 0x304   : > { %3805 = vmatprep.subr.bf16.mxu0 %v4076_v24 }
 0x305   : > { %3784 = vmatpush3.bf16.msra.mxu1 %v4075_v25 }
 0x306   : > { %3813 = vmatprep.subr.bf16.mxu1 %v4078_v27 }
 0x307   : > { %3806 = vmatpush3.bf16.msra.mxu0 %v4077_v26 }
 0x308   : > { %3835 = vmatprep.subr.bf16.mxu0 %v4080_v29 }
 0x30a   : > { %2803 = vmatmul.mubr.bf16.vlgmr.msra.gmra.mxu0 %v4430_v34  ;;  %v4088_v34 = vld [vmem:[%s5136_s15 + $0x168] sm:$0xff]  }
 0x30b   : > { %2882 = vmatprep.mubr.bf16.mxu0 %v4541_v8  ;;  %3836 = vmatpush3.bf16.msra.mxu0 %v4081_v31  ;;  %v4092_v8 = vld [vmem:[%s5136_s15 + $0x160] sm:$0xff]  }
 0x30c   : > { %3837 = vmatprep.subr.bf16.mxu0 %v4084_v33  ;;  %v1872_v31 = vld [vmem:[%s5132_s11] sm:$0x3] }
 0x30d   : > { %v1873_v33 = vld [vmem:[%s5133_s12] sm:$0x3] }
 0x30f   : > { %3838 = vmatpush3.bf16.msra.mxu0 %v4085_v38  ;;  %v2082_v38 = vrot.slane %v1872_v31, %v4689_v30 }
 0x310   : > { %3839 = vmatprep.subr.bf16.mxu0 %v4088_v34 }
 0x313   : > { %3840 = vmatpush3.bf16.msra.mxu0 %v4089_v39 }
 0x314   : > { %3841 = vmatprep.subr.bf16.mxu0 %v4092_v8  ;;  %v2086_v8 = vrot.slane %v1872_v31, %v4694_v32  ;;  %v4129_v31 = vld [vmem:[%s5138_s17 + $0x60] ss:$8 sps:$4 sm:$0xff]  }
 0x317   : > { %3842 = vmatpush3.bf16.msra.mxu0 %v4093_v40  ;;  %v2095_v40 = vrot.slane %v1873_v33, %v4689_v30 }
 0x318   : > { %3843 = vmatprep.subr.bf16.mxu0 %v4096_v41 }
 0x31b   : > { %3844 = vmatpush3.bf16.msra.mxu0 %v4097_v42 }
 0x31c   : > { %3845 = vmatprep.subr.bf16.mxu0 %v4100_v43 }
 0x31f   : > { %3846 = vmatpush3.bf16.msra.mxu0 %v4101_v44  ;;  %v2099_v44 = vrot.slane %v1873_v33, %v4694_v32  ;;  %v4134_v33 = vld [vmem:[%s5138_s17 + $0x54] ss:$8 sps:$4 sm:$0xff]  }
 0x320   : > { %3847 = vmatprep.subr.bf16.mxu0 %v4104_v45 }
 0x323   : > { %3848 = vmatpush3.bf16.msra.mxu0 %v4105_v46 }
 0x324   : > { %3849 = vmatprep.subr.bf16.mxu0 %v4108_v47 }
 0x327   : > { %3850 = vmatpush3.bf16.msra.mxu0 %v4109_v48 }
 0x32a   : > { %2883 = vmatmul.mubr.bf16.vlgmr.msra.gmra.mxu0 %v4539_v7 }
 0x32b   : > { %3106 = vmatprep.mubr.bf16.mxu0 %v4186_v28 }
 0x3aa   : > { %v2033_v52 = vpop.f32.mrf.mxu0 }
 0x3ab   : > { %v2034_v53 = vadd.f32 %v2033_v52, %v1912_v50 }
 0x3ac   : > { %v2035_v54 = vpop.f32.mrf.mxu0 }
 0x3ad   : > { %v2040_v55 = vrot.slane %v2034_v53, 4  ;;  %v2036_v56 = vadd.f32 %v2035_v54, %v1916_v51  ;;  %v4079_v51 = vld [vmem:[%s5136_s15 + $0xb8] sm:$0xff]   ;;  %v4083_v54 = vld [vmem:[%s5136_s15 + $0xb0] sm:$0xff]  }
 0x3ae   : > { %v2037_v57 = vpop.f32.mrf.mxu0 }
 0x3af   : > { %v2041_v58 = vadd.f32 %v2040_v55, %v2034_v53  ;;  %v2046_v59 = vrot.slane %v2036_v56, 4  ;;  %v4086_v55 = vld [vmem:[%s5136_s15 + $0xe8] sm:$0xff]   ;;  %v4090_v57 = vld [vmem:[%s5136_s15 + $0xe0] sm:$0xff]  }
 0x3b0   : > { %v2038_v35 = vpop.f32.mrf.mxu0 }
 0x3b1   : > { %v2042_v7 = vrot.slane %v2041_v58, 2  ;;  %v2047_v60 = vadd.f32 %v2046_v59, %v2036_v56  ;;  %v4095_v59 = vld [vmem:[%s5136_s15 + $0x98] sm:$0xff]   ;;  %v4098_v35 = vld [vmem:[%s5136_s15 + $0xd0] sm:$0xff]  }
 0x3b3   : > { %v2043_v28 = vadd.f32 %v2042_v7, %v2041_v58  ;;  %v2048_v61 = vrot.slane %v2047_v60, 2  ;;  %v4094_v58 = vld [vmem:[%s5136_s15 + $0xd8] sm:$0xff]   ;;  %v4099_v7 = vld [vmem:[%s5136_s15 + $0x90] sm:$0xff]  }
 0x3b5   : > { %v2044_v62 = vrot.slane %v2043_v28, 1  ;;  %v2049_v63 = vadd.f32 %v2048_v61, %v2047_v60  ;;  %v4102_v60 = vld [vmem:[%s5136_s15 + $0xc8] sm:$0xff]   ;;  %v4106_v61 = vld [vmem:[%s5136_s15 + $0xc0] sm:$0xff]  }
 0x3b7   : > { %v2045_v0 = vadd.f32 %v2044_v62, %v2043_v28  ;;  %v2050_v1 = vrot.slane %v2049_v63, 1  ;;  %v4103_v28 = vld [vmem:[%s5136_s15 + $0x88] sm:$0xff]   ;;  %v4107_v62 = vld [vmem:[%s5136_s15 + $0x80] sm:$0xff]  }
 0x3b9   : > { %v2052_v2 = vmul.f32 0.125, %v2045_v0  ;;  %v2051_v3 = vadd.f32 %v2050_v1, %v2049_v63  ;;  %v4110_v63 = vld [vmem:[%s5136_s15 + $0x1f8] sm:$0xff]   ;;  %v4112_v1 = vld [vmem:[%s5136_s15 + $0x1f0] sm:$0xff]  }
 0x3ba   : > { %v4111_v0 = vld [vmem:[%s5136_s15 + $0x1b8] sm:$0xff]  }
 0x3bb   : > { %v2054_v4 = vsub.f32 %v2034_v53, %v2052_v2  ;;  %v2053_v5 = vmul.f32 0.125, %v2051_v3  ;;  %v4082_v53 = vld [vmem:[%s5136_s15 + $0xf0] sm:$0xff]   ;;  %v4114_v3 = vld [vmem:[%s5136_s15 + $0x1e8] sm:$0xff]  }
 0x3bc   : > { %v4113_v2 = vld [vmem:[%s5136_s15 + $0x1b0] sm:$0xff]  }
 0x3bd   : > { %v2056_v6 = vmul.f32 %v2054_v4, %v2054_v4  ;;  %v2055_v9 = vsub.f32 %v2036_v56, %v2053_v5  ;;  %v4087_v56 = vld [vmem:[%s5136_s15 + $0xa8] sm:$0xff]   ;;  %v4118_v5 = vld [vmem:[%s5136_s15 + $0x1d8] sm:$0xff]  }
 0x3bf   : > { %v2058_v12 = vrot.slane %v2056_v6, 4  ;;  %v2057_v13 = vmul.f32 %v2055_v9, %v2055_v9 }
 0x3c1   : > { %v2059_v14 = vadd.f32 %v2058_v12, %v2056_v6  ;;  %v2064_v15 = vrot.slane %v2057_v13, 4  ;;  %v4119_v6 = vld [vmem:[%s5136_s15 + $0x198] sm:$0xff]   ;;  %v4121_v12 = vld [vmem:[%s5136_s15 + $0x190] sm:$0xff]  }
 0x3c3   : > { %v2060_v16 = vrot.slane %v2059_v14, 2  ;;  %v2065_v17 = vadd.f32 %v2064_v15, %v2057_v13  ;;  %v4122_v13 = vld [vmem:[%s5136_s15 + $0x1c8] sm:$0xff]   ;;  %v4124_v15 = vld [vmem:[%s5136_s15 + $0x1c0] sm:$0xff]  }
 0x3c5   : > { %v2061_v18 = vadd.f32 %v2060_v16, %v2059_v14  ;;  %v2066_v19 = vrot.slane %v2065_v17, 2  ;;  %v4123_v14 = vld [vmem:[%s5136_s15 + $0x188] sm:$0xff]   ;;  %v4125_v16 = vld [vmem:[%s5136_s15 + $0x180] sm:$0xff]  }
 0x3c7   : > { %v2062_v20 = vrot.slane %v2061_v18, 1  ;;  %v2067_v21 = vadd.f32 %v2066_v19, %v2065_v17 }
 0x3c9   : > { %v2063_v22 = vadd.f32 %v2062_v20, %v2061_v18  ;;  %v2068_v23 = vrot.slane %v2067_v21, 1 }
 0x3ca   : > { %v3807_v17 = vpop.f32.mrf.mxu0 }
 0x3cb   : > { %v2070_v24 = vmul.f32 0.125, %v2063_v22  ;;  %v2069_v25 = vadd.f32 %v2068_v23, %v2067_v21 }
 0x3cc   : > { %v3808_v18 = vpop.f32.mrf.mxu0 }
 0x3cd   : > { %v2072_v26 = vadd.f32 1e-05, %v2070_v24  ;;  %v2071_v27 = vmul.f32 0.125, %v2069_v25  ;;  %v3809_v19 = vadd.f32 %v3808_v18, %v3807_v17  ;;  %v4163_v17 = vld [vmem:[%s5142_s21 + $0x8] sm:$0xff]   ;;  %v4164_v18 = vld [vmem:[%s5142_s21 + $0x40] sm:$0xff]  }
 0x3ce   : > { %v3810_v20 = vpop.f32.mrf.mxu0 }
 0x3cf   : > { %4170 = vrsqrt.f32 %v2072_v26  ;;  %v2073_v29 = vadd.f32 1e-05, %v2071_v27  ;;  %v4126_v26 = vld [vmem:[%s5138_s17 + $0x70] ss:$8 sps:$4 sm:$0xff]   ;;  %v4128_v27 = vld [vmem:[%s5138_s17 + $0x74] ss:$8 sps:$4 sm:$0xff]  }
 0x3d0   : > { %v3811_v21 = vpop.f32.mrf.mxu0  ;;  %3074 = vmatprep.subr.bf16.mxu0 %v4128_v27  ;;  %v2946_v20 = vld [vmem:[%s5139_s18] sm:$0x3] }
 0x3d1   : > { %4172 = vrsqrt.f32 %v2073_v29  ;;  %3075 = vmatpush1.bf16.msra.mxu0 %v4126_v26  ;;  %v2987_v21 = vrot.slane %v2946_v20, %v4689_v30 }
 0x3dc   : > { %v4171_v34 = vpop.eup %4170 }
 0x3dd   : > { %v2076_v39 = vmul.f32 %v4171_v34, %v2054_v4  ;;  %v4115_v4 = vld [vmem:[%s5136_s15 + $0x1a8] sm:$0xff]  }
 0x3de   : > { %v4173_v41 = vpop.eup %4172  ;;  %v4137_v34 = vld [vmem:[%s5138_s17 + $0x44] ss:$8 sps:$4 sm:$0xff]  }
 0x3df   : > { %v2089_v42 = vmul.f32 %v2082_v38, %v2076_v39  ;;  %v2077_v43 = vmul.f32 %v4173_v41, %v2055_v9  ;;  %v4120_v9 = vld [vmem:[%s5136_s15 + $0x1d0] sm:$0xff]   ;;  %v4135_v39 = vld [vmem:[%s5138_s17 + $0x40] ss:$8 sps:$4 sm:$0xff]   ;;  %v4143_v41 = vld [vmem:[%s5138_s17 + $0x24] ss:$8 sps:$4 sm:$0xff]  }
 0x3e0   : > { %v4132_v38 = vld [vmem:[%s5138_s17 + $0x50] ss:$8 sps:$4 sm:$0xff]  }
 0x3e1   : > { %v2090_v45 = vmul.f32 %v2086_v8, %v2077_v43  ;;  %v2102_v46 = vadd.f32 %v2095_v40, %v2089_v42  ;;  %v4140_v8 = vld [vmem:[%s5138_s17 + $0x34] ss:$8 sps:$4 sm:$0xff]   ;;  %v4138_v40 = vld [vmem:[%s5138_s17 + $0x30] ss:$8 sps:$4 sm:$0xff]   ;;  %v4141_v42 = vld [vmem:[%s5138_s17 + $0x20] ss:$8 sps:$4 sm:$0xff]  }
 0x3e2   : > { %v4146_v43 = vld [vmem:[%s5138_s17 + $0x14] ss:$8 sps:$4 sm:$0xff]  }
 0x3e3   : > { %v2103_v47 = vadd.f32 %v2099_v44, %v2090_v45  ;;  %v2104_v48 = vmax.f32 %v2102_v46, 0.0  ;;  %v4144_v44 = vld [vmem:[%s5138_s17 + $0x10] ss:$8 sps:$4 sm:$0xff]   ;;  %v4149_v45 = vld [vmem:[%s5138_s17 + $0x4] ss:$8 sps:$4 sm:$0xff]  }
 0x3e4   : > { %v4147_v46 = vld [vmem:[%s5138_s17] ss:$8 sps:$4 sm:$0xff]  }
 0x3e5   : > { %v2105_v49 = vmax.f32 %v2103_v47, 0.0  ;;  %v2106_v52 = vpack.c.bf16 %v2104_v48, %v2104_v48  ;;  %v3541_v48 = vld [vmem:[%s5135_s14] ss:$0 sm:$0xff] }
 0x3e7   : > { %v2107_v50 = vpack.c.bf16 %v2105_v49, %v2105_v49 }
 0x3e9   : > { %2242 = vmatprep.mubr.bf16.mxu1 %v2107_v50 }
 0x3ea   : > { %2243 = vmatmul.mubr.bf16.vlgmr.msra.gmra.mxu1 %v2106_v52  ;;  %v3851_v22 = vpop.f32.mrf.mxu0 }
 0x3eb   : > { %3814 = vmatpush3.bf16.msra.mxu1 %v4079_v51  ;;  %2842 = vmatprep.mubr.bf16.mxu1 %v4436_v37  ;;  %v4091_v37 = vld [vmem:[%s5136_s15 + $0xa0] sm:$0xff]  }
 0x3ec   : > { %3815 = vmatprep.subr.bf16.mxu1 %v4082_v53  ;;  %v3852_v23 = vpop.f32.mrf.mxu0 }
 0x3ed   : > { %v3853_v24 = vadd.f32 %v3852_v23, %v3851_v22  ;;  %v2991_v22 = vrot.slane %v2946_v20, %v4694_v32 }
 0x3ee   : > { %v3854_v25 = vpop.f32.mrf.mxu0 }
 0x3ef   : > { %3816 = vmatpush3.bf16.msra.mxu1 %v4083_v54  ;;  %v3558_v54 = vld [vmem:[%s5137_s16] ss:$0 sm:$0xff] }
 0x3f0   : > { %3817 = vmatprep.subr.bf16.mxu1 %v4086_v55  ;;  %v3855_v29 = vpop.f32.mrf.mxu0 }
 0x3f3   : > { %3818 = vmatpush3.bf16.msra.mxu1 %v4087_v56  ;;  %v2805_v56 = vadd.f32 %v3809_v19, %v3558_v54  ;;  %v4165_v19 = vld [vmem:[%s5142_s21] sm:$0xff]  }
 0x3f4   : > { %3819 = vmatprep.subr.bf16.mxu1 %v4090_v57 }
 0x3f7   : > { %3820 = vmatpush3.bf16.msra.mxu1 %v4091_v37 }
 0x3f8   : > { %3821 = vmatprep.subr.bf16.mxu1 %v4094_v58 }
 0x3fb   : > { %3822 = vmatpush3.bf16.msra.mxu1 %v4095_v59 }
 0x3fc   : > { %3823 = vmatprep.subr.bf16.mxu1 %v4098_v35 }
 0x3ff   : > { %3824 = vmatpush3.bf16.msra.mxu1 %v4099_v7 }
 0x400   : > { %3825 = vmatprep.subr.bf16.mxu1 %v4102_v60 }
 0x403   : > { %3826 = vmatpush3.bf16.msra.mxu1 %v4103_v28 }
 0x404   : > { %3827 = vmatprep.subr.bf16.mxu1 %v4106_v61 }
 0x407   : > { %3828 = vmatpush3.bf16.msra.mxu1 %v4107_v62 }
 0x408   : > { %3857 = vmatprep.subr.bf16.mxu1 %v4110_v63 }
 0x40a   : > { %2843 = vmatmul.mubr.bf16.vlgmr.msra.gmra.mxu1 %v4434_v36  ;;  %v4116_v36 = vld [vmem:[%s5136_s15 + $0x1e0] sm:$0xff]  }
 0x40b   : > { %3858 = vmatpush3.bf16.msra.mxu1 %v4111_v0  ;;  %2922 = vmatprep.mubr.bf16.mxu1 %v4546_v11  ;;  %v4117_v11 = vld [vmem:[%s5136_s15 + $0x1a0] sm:$0xff]  }
 0x40c   : > { %3859 = vmatprep.subr.bf16.mxu1 %v4112_v1 }
 0x40f   : > { %3860 = vmatpush3.bf16.msra.mxu1 %v4113_v2  ;;  %v4150_v2 = vld [vmem:[%s5142_s21 + $0x78] sm:$0xff]  }
 0x410   : > { %3861 = vmatprep.subr.bf16.mxu1 %v4114_v3  ;;  %v4151_v3 = vld [vmem:[%s5142_s21 + $0x38] sm:$0xff]  }
 0x413   : > { %3862 = vmatpush3.bf16.msra.mxu1 %v4115_v4  ;;  %v4152_v4 = vld [vmem:[%s5142_s21 + $0x70] sm:$0xff]  }
 0x414   : > { %3863 = vmatprep.subr.bf16.mxu1 %v4116_v36  ;;  %v4153_v36 = vld [vmem:[%s5142_s21 + $0x30] sm:$0xff]  }
 0x417   : > { %3864 = vmatpush3.bf16.msra.mxu1 %v4117_v11  ;;  %v4154_v11 = vld [vmem:[%s5142_s21 + $0x68] sm:$0xff]  }
 0x418   : > { %3865 = vmatprep.subr.bf16.mxu1 %v4118_v5  ;;  %v4155_v5 = vld [vmem:[%s5142_s21 + $0x28] sm:$0xff]  }
 0x41b   : > { %3866 = vmatpush3.bf16.msra.mxu1 %v4119_v6  ;;  %v4156_v6 = vld [vmem:[%s5142_s21 + $0x60] sm:$0xff]  }
 0x41c   : > { %3867 = vmatprep.subr.bf16.mxu1 %v4120_v9  ;;  %v4157_v9 = vld [vmem:[%s5142_s21 + $0x20] sm:$0xff]  }
 0x41f   : > { %3868 = vmatpush3.bf16.msra.mxu1 %v4121_v12  ;;  %v4158_v12 = vld [vmem:[%s5142_s21 + $0x58] sm:$0xff]  }
 0x420   : > { %3869 = vmatprep.subr.bf16.mxu1 %v4122_v13  ;;  %v4159_v13 = vld [vmem:[%s5142_s21 + $0x18] sm:$0xff]  }
 0x423   : > { %3870 = vmatpush3.bf16.msra.mxu1 %v4123_v14  ;;  %v4160_v14 = vld [vmem:[%s5142_s21 + $0x50] sm:$0xff]  }
 0x424   : > { %3871 = vmatprep.subr.bf16.mxu1 %v4124_v15  ;;  %v4161_v15 = vld [vmem:[%s5142_s21 + $0x10] sm:$0xff]  }
 0x427   : > { %3872 = vmatpush3.bf16.msra.mxu1 %v4125_v16  ;;  %v4162_v16 = vld [vmem:[%s5142_s21 + $0x48] sm:$0xff]  }
 0x428   : > { %3879 = vmatprep.subr.bf16.mxu1 %v4150_v2 }
 0x42a   : > { %2923 = vmatmul.mubr.bf16.vlgmr.msra.gmra.mxu1 %v4544_v10  ;;  %v4131_v10 = vld [vmem:[%s5138_s17 + $0x64] ss:$8 sps:$4 sm:$0xff]  }
 0x42b   : > { %3076 = vmatprep.subr.bf16.mxu0 %v4131_v10  ;;  %3880 = vmatpush3.bf16.msra.mxu1 %v4151_v3 }
 0x42c   : > { %3077 = vmatpush1.bf16.msra.mxu0 %v4129_v31  ;;  %3881 = vmatprep.subr.bf16.mxu1 %v4152_v4 }
 0x42d   : > { %3078 = vmatprep.subr.bf16.mxu0 %v4134_v33 }
 0x42f   : > { %3882 = vmatpush3.bf16.msra.mxu1 %v4153_v36 }
 0x430   : > { %3079 = vmatpush1.bf16.msra.mxu0 %v4132_v38  ;;  %3883 = vmatprep.subr.bf16.mxu1 %v4154_v11 }
 0x431   : > { %3080 = vmatprep.subr.bf16.mxu0 %v4137_v34 }
 0x433   : > { %3884 = vmatpush3.bf16.msra.mxu1 %v4155_v5 }
 0x434   : > { %3081 = vmatpush1.bf16.msra.mxu0 %v4135_v39  ;;  %3885 = vmatprep.subr.bf16.mxu1 %v4156_v6 }
 0x435   : > { %3082 = vmatprep.subr.bf16.mxu0 %v4140_v8 }
 0x437   : > { %3886 = vmatpush3.bf16.msra.mxu1 %v4157_v9 }
 0x438   : > { %3083 = vmatpush1.bf16.msra.mxu0 %v4138_v40  ;;  %3887 = vmatprep.subr.bf16.mxu1 %v4158_v12 }
 0x439   : > { %3084 = vmatprep.subr.bf16.mxu0 %v4143_v41 }
 0x43b   : > { %3888 = vmatpush3.bf16.msra.mxu1 %v4159_v13 }
 0x43c   : > { %3085 = vmatpush1.bf16.msra.mxu0 %v4141_v42  ;;  %3889 = vmatprep.subr.bf16.mxu1 %v4160_v14 }
 0x43d   : > { %3086 = vmatprep.subr.bf16.mxu0 %v4146_v43 }
 0x43f   : > { %3890 = vmatpush3.bf16.msra.mxu1 %v4161_v15 }
 0x440   : > { %3087 = vmatpush1.bf16.msra.mxu0 %v4144_v44  ;;  %3891 = vmatprep.subr.bf16.mxu1 %v4162_v16 }
 0x441   : > { %3088 = vmatprep.subr.bf16.mxu0 %v4149_v45 }
 0x443   : > { %3892 = vmatpush3.bf16.msra.mxu1 %v4163_v17 }
 0x444   : > { %3089 = vmatpush1.bf16.msra.mxu0 %v4147_v46  ;;  %3893 = vmatprep.subr.bf16.mxu1 %v4164_v18 }
 0x447   : > { %3894 = vmatpush3.bf16.msra.mxu1 %v4165_v19 }
 0x4aa   : > { %v3785_v47 = vpop.f32.mrf.mxu1 }
 0x4ac   : > { %v3786_v49 = vpop.f32.mrf.mxu1 }
 0x4ad   : > { %v3787_v50 = vadd.f32 %v3786_v49, %v3785_v47 }
 0x4ae   : > { %v3788_v51 = vpop.f32.mrf.mxu1 }
 0x4af   : > { %v2245_v52 = vadd.f32 %v3787_v50, %v3541_v48 }
 0x4b0   : > { %v3789_v53 = vpop.f32.mrf.mxu1 }
 0x4b1   : > { %2250 = vst [vmem:[%s742_s8] sm:$0xff] %v2245_v52 }
 0x4ca   : > { %v3829_v55 = vpop.f32.mrf.mxu1 }
 0x4cc   : > { %v3830_v57 = vpop.f32.mrf.mxu1 }
 0x4cd   : > { %v3831_v37 = vadd.f32 %v3830_v57, %v3829_v55 }
 0x4ce   : > { %v3832_v58 = vpop.f32.mrf.mxu1 }
 0x4cf   : > { %v2845_v59 = vadd.f32 %v3831_v37, %v2805_v56 }
 0x4d0   : > { %v3833_v35 = vpop.f32.mrf.mxu1 }
 0x4d1   : > { %v2885_v7 = vadd.f32 %v3853_v24, %v2845_v59 }
 0x4ea   : > { %v3873_v60 = vpop.f32.mrf.mxu1 }
 0x4ec   : > { %v3874_v28 = vpop.f32.mrf.mxu1 }
 0x4ed   : > { %v3875_v61 = vadd.f32 %v3874_v28, %v3873_v60 }
 0x4ee   : > { %v3876_v62 = vpop.f32.mrf.mxu1 }
 0x4ef   : > { %v2925_v63 = vadd.f32 %v3875_v61, %v2885_v7 }
 0x4f0   : > { %v3877_v0 = vpop.f32.mrf.mxu1 }
 0x4f1   : > { %v2982_v1 = vpack.c.bf16 %v2925_v63, %v2925_v63  ;;  %v2947_v63 = vld [vmem:[%s5140_s19] sm:$0x3] }
 0x4f2   : > { %v2948_v0 = vld [vmem:[%s5141_s20] sm:$0x3]  ;;  %v3161_v4 = vrot.slane %v2947_v63, %v4694_v32 }
 0x4f3   : > { %3107 = vmatmul.mubr.bf16.vlgmr.msra.gmra.mxu0 %v2982_v1  ;;  %v3157_v1 = vrot.slane %v2947_v63, %v4689_v30  ;;  %v3170_v36 = vrot.slane %v2948_v0, %v4689_v30  ;;  %v3174_v9 = vrot.slane %v2948_v0, %v4694_v32  ;;  %v3639_v30 = vld [vmem:[%s5143_s22] ss:$0 sm:$0xff] }
 0x5b3   : > { %v3108_v23 = vpop.f32.mrf.mxu0 }
 0x5b4   : > { %v3109_v24 = vadd.f32 %v3108_v23, %v2987_v21 }
 0x5b5   : > { %v3110_v25 = vpop.f32.mrf.mxu0 }
 0x5b6   : > { %v3115_v26 = vrot.slane %v3109_v24, 4  ;;  %v3111_v27 = vadd.f32 %v3110_v25, %v2991_v22 }
 0x5b7   : > { %v3112_v10 = vpop.f32.mrf.mxu0 }
 0x5b8   : > { %v3116_v29 = vadd.f32 %v3115_v26, %v3109_v24  ;;  %v3121_v31 = vrot.slane %v3111_v27, 4 }
 0x5b9   : > { %v3113_v33 = vpop.f32.mrf.mxu0 }
 0x5ba   : > { %v3117_v38 = vrot.slane %v3116_v29, 2  ;;  %v3122_v34 = vadd.f32 %v3121_v31, %v3111_v27 }
 0x5bc   : > { %v3118_v39 = vadd.f32 %v3117_v38, %v3116_v29  ;;  %v3123_v8 = vrot.slane %v3122_v34, 2 }
 0x5be   : > { %v3119_v40 = vrot.slane %v3118_v39, 1  ;;  %v3124_v41 = vadd.f32 %v3123_v8, %v3122_v34 }
 0x5c0   : > { %v3120_v42 = vadd.f32 %v3119_v40, %v3118_v39  ;;  %v3125_v43 = vrot.slane %v3124_v41, 1 }
 0x5c2   : > { %v3127_v44 = vmul.f32 0.125, %v3120_v42  ;;  %v3126_v45 = vadd.f32 %v3125_v43, %v3124_v41 }
 0x5c4   : > { %v3129_v46 = vsub.f32 %v3109_v24, %v3127_v44  ;;  %v3128_v47 = vmul.f32 0.125, %v3126_v45 }
 0x5c6   : > { %v3131_v48 = vmul.f32 %v3129_v46, %v3129_v46  ;;  %v3130_v49 = vsub.f32 %v3111_v27, %v3128_v47 }
 0x5c8   : > { %v3133_v50 = vrot.slane %v3131_v48, 4  ;;  %v3132_v51 = vmul.f32 %v3130_v49, %v3130_v49 }
 0x5ca   : > { %v3134_v52 = vadd.f32 %v3133_v50, %v3131_v48  ;;  %v3139_v53 = vrot.slane %v3132_v51, 4 }
 0x5cc   : > { %v3135_v54 = vrot.slane %v3134_v52, 2  ;;  %v3140_v55 = vadd.f32 %v3139_v53, %v3132_v51 }
 0x5ce   : > { %v3136_v56 = vadd.f32 %v3135_v54, %v3134_v52  ;;  %v3141_v57 = vrot.slane %v3140_v55, 2 }
 0x5d0   : > { %v3137_v37 = vrot.slane %v3136_v56, 1  ;;  %v3142_v58 = vadd.f32 %v3141_v57, %v3140_v55 }
 0x5d2   : > { %v3138_v59 = vadd.f32 %v3137_v37, %v3136_v56  ;;  %v3143_v35 = vrot.slane %v3142_v58, 1 }
 0x5d4   : > { %v3145_v7 = vmul.f32 0.125, %v3138_v59  ;;  %v3144_v60 = vadd.f32 %v3143_v35, %v3142_v58 }
 0x5d6   : > { %v3147_v28 = vadd.f32 1e-05, %v3145_v7  ;;  %v3146_v61 = vmul.f32 0.125, %v3144_v60 }
 0x5d8   : > { %4174 = vrsqrt.f32 %v3147_v28  ;;  %v3148_v62 = vadd.f32 1e-05, %v3146_v61 }
 0x5da   : > { %4176 = vrsqrt.f32 %v3148_v62 }
 0x5e5   : > { %v4175_v2 = vpop.eup %4174 }
 0x5e6   : > { %v3151_v3 = vmul.f32 %v4175_v2, %v3129_v46 }
 0x5e7   : > { %v4177_v11 = vpop.eup %4176 }
 0x5e8   : > { %v3164_v5 = vmul.f32 %v3157_v1, %v3151_v3  ;;  %v3152_v6 = vmul.f32 %v4177_v11, %v3130_v49 }
 0x5ea   : > { %v3165_v12 = vmul.f32 %v3161_v4, %v3152_v6  ;;  %v3177_v13 = vadd.f32 %v3170_v36, %v3164_v5 }
 0x5ec   : > { %v3178_v14 = vadd.f32 %v3174_v9, %v3165_v12  ;;  %v3179_v15 = vmax.f32 %v3177_v13, 0.0 }
 0x5ee   : > { %v3180_v16 = vmax.f32 %v3178_v14, 0.0  ;;  %v3181_v18 = vpack.c.bf16 %v3179_v15, %v3179_v15 }
 0x5f0   : > { %v3182_v17 = vpack.c.bf16 %v3180_v16, %v3180_v16 }
 0x5f2   : > { %3317 = vmatprep.mubr.bf16.mxu1 %v3182_v17 }
 0x5f3   : > { %3318 = vmatmul.mubr.bf16.vlgmr.msra.gmra.mxu1 %v3181_v18 }
 0x6b3   : > { %v3895_v19 = vpop.f32.mrf.mxu1 }
 0x6b5   : > { %v3896_v20 = vpop.f32.mrf.mxu1 }
 0x6b6   : > { %v3897_v21 = vadd.f32 %v3896_v20, %v3895_v19 }
 0x6b7   : > { %v3898_v32 = vpop.f32.mrf.mxu1 }
 0x6b8   : > { %v3320_v22 = vadd.f32 %v3897_v21, %v3639_v30 }
 0x6b9   : > { %v3899_v23 = vpop.f32.mrf.mxu1 }
 0x6ba   : > { %3325 = vst [vmem:[%s746_s7] sm:$0xff] %v3320_v22 }
 0x6bb PF: > { %s35_s5 = sadd.s32 1, %s4184_s5  }
 0x6bc   : > { %p32_p4 = scmp.ge.s32.totalorder %s35_s5, 4  }
 0x6be   :  { %34 = sbr.rel (!%p32_p4) target bundleno = 10 (0xa), region = 154 }

</bundles_post_ra>
